<compile_context>
chip_gen: v7x
topology: tpu7x:2x2x1
jax: 0.10.0
libtpu: 0.0.40
codegen_flags: <defaults>
</compile_context>

<pallas_src>
import math
from functools import partial

import jax
import jax.numpy as jnp
from jax import lax
from jax.experimental import pallas as pl
from jax.experimental.pallas import tpu as pltpu

EPS = 1e-5
VMEM_LIMIT = 32 * 1024 * 1024      # explicit budget; fits v5e / v6e / v7x scoped VMEM


def _round_up(x, m):
    return (x + m - 1) // m * m


def _pick_tile(padded, candidates):
    for c in candidates:
        if padded % c == 0:
            return c
    return 128


# ---------------------------------------------------------------------------
# Tiled GEMM kernel with fused per-channel BN-statistics reduction
# (and optional fused "bn+relu of the previous layer" applied to the A operand)
# ---------------------------------------------------------------------------
def _gemm_stats_kernel(*refs, m_valid, fuse_input_bn):
    """Grid = (Nb, Mb, Kb): N outermost (its stats block is visited contiguously and
    never revisited), K innermost (reduction).  Accumulates the GEMM in an f32 VMEM
    scratch; at k==last it writes the output tile and accumulates per-output-channel
    sum / sum-of-squares (rows beyond m_valid are padding and are masked out)."""
    if fuse_input_bn:
        s_ref, t_ref, a_ref, b_ref, o_ref, csum_ref, csq_ref, acc_ref = refs
    else:
        a_ref, b_ref, o_ref, csum_ref, csq_ref, acc_ref = refs
        s_ref = t_ref = None

    i = pl.program_id(1)           # M block
    k = pl.program_id(2)           # K block (reduction)

    @pl.when(jnp.logical_and(i == 0, k == 0))
    def _():                       # fresh N block -> reset the channel-stat accumulators
        csum_ref[...] = jnp.zeros_like(csum_ref)
        csq_ref[...] = jnp.zeros_like(csq_ref)

    @pl.when(k == 0)
    def _():
        acc_ref[...] = jnp.zeros_like(acc_ref)

    a = a_ref[...]
    if fuse_input_bn:
        # Fused BatchNorm + ReLU of the previous layer, applied to the A operand tile.
        a = jnp.maximum(a.astype(jnp.float32) * s_ref[...] + t_ref[...], 0.0)
        a = a.astype(jnp.bfloat16)
    acc_ref[...] += jnp.dot(a, b_ref[...], preferred_element_type=jnp.float32)

    @pl.when(k == pl.num_programs(2) - 1)
    def _():
        acc = acc_ref[...]
        o_ref[...] = acc.astype(o_ref.dtype)
        tm = acc.shape[0]
        rows = i * tm + lax.broadcasted_iota(jnp.int32, (tm, 1), 0)
        masked = acc * (rows < m_valid).astype(jnp.float32)
        csum_ref[...] += jnp.sum(masked, axis=0, keepdims=True)
        csq_ref[...] += jnp.sum(masked * acc, axis=0, keepdims=True)


def gemm_with_channel_stats(a, b, *, out_dtype, in_scale=None, in_shift=None):
    """out = [relu(a*scale+shift)] @ b, plus per-column sum and sum-of-squares of out.

    a: (M, K), b: (K, N).  Both operands are cast to bf16 (MXU path) with f32 accumulation.
    """
    M, K = a.shape
    K2, N = b.shape
    assert K == K2
    fuse = in_scale is not None

    Kp = _round_up(K, 128)
    Np = _round_up(N, 128)
    tm = 256 if M > 256 else _round_up(M, 8)
    Mp = _round_up(M, tm)
    tk = _pick_tile(Kp, (512, 256, 128))
    tn = _pick_tile(Np, (256, 128))
    nb, mb, kb = Np // tn, Mp // tm, Kp // tk

    a_p = jnp.pad(a.astype(jnp.bfloat16), ((0, Mp - M), (0, Kp - K)))
    b_p = jnp.pad(b.astype(jnp.bfloat16), ((0, Kp - K), (0, Np - N)))

    in_specs, args = [], []
    if fuse:
        s_p = jnp.pad(in_scale.astype(jnp.float32).reshape(1, K), ((0, 0), (0, Kp - K)))
        t_p = jnp.pad(in_shift.astype(jnp.float32).reshape(1, K), ((0, 0), (0, Kp - K)))
        in_specs += [pl.BlockSpec((1, tk), lambda j, i, k: (0, k)),
                     pl.BlockSpec((1, tk), lambda j, i, k: (0, k))]
        args += [s_p, t_p]
    in_specs += [pl.BlockSpec((tm, tk), lambda j, i, k: (i, k)),
                 pl.BlockSpec((tk, tn), lambda j, i, k: (k, j))]
    args += [a_p, b_p]

    out, csum, csq = pl.pallas_call(
        partial(_gemm_stats_kernel, m_valid=M, fuse_input_bn=fuse),
        out_shape=(jax.ShapeDtypeStruct((Mp, Np), out_dtype),
                   jax.ShapeDtypeStruct((1, Np), jnp.float32),
                   jax.ShapeDtypeStruct((1, Np), jnp.float32)),
        grid_spec=pltpu.PrefetchScalarGridSpec(
            num_scalar_prefetch=0,
            grid=(nb, mb, kb),
            in_specs=in_specs,
            out_specs=[pl.BlockSpec((tm, tn), lambda j, i, k: (i, j)),
                       pl.BlockSpec((1, tn), lambda j, i, k: (0, j)),
                       pl.BlockSpec((1, tn), lambda j, i, k: (0, j))],
            scratch_shapes=[pltpu.VMEM((tm, tn), jnp.float32)]),
        compiler_params=pltpu.CompilerParams(
            # Channel stats accumulate across the M and K axes -> those stay "arbitrary";
            # the N axis carries nothing across iterations and can be core-sharded.
            dimension_semantics=("parallel", "arbitrary", "arbitrary"),
            vmem_limit_bytes=VMEM_LIMIT),
    )(*args)
    return out[:M, :N], csum[0, :N], csq[0, :N]


# ---------------------------------------------------------------------------
# Tiled elementwise kernels: BN apply (+ReLU) and fused BN+BN+add+ReLU epilogue
# ---------------------------------------------------------------------------
def _affine_act_kernel(x_ref, s_ref, t_ref, o_ref, *, relu):
    y = x_ref[...].astype(jnp.float32) * s_ref[...] + t_ref[...]
    if relu:
        y = jnp.maximum(y, 0.0)
    o_ref[...] = y.astype(o_ref.dtype)


def _affine_add_relu_kernel(a_ref, sa_ref, ta_ref, b_ref, sb_ref, tb_ref, o_ref):
    y = (a_ref[...].astype(jnp.float32) * sa_ref[...] + ta_ref[...]
         + b_ref[...].astype(jnp.float32) * sb_ref[...] + tb_ref[...])
    o_ref[...] = jnp.maximum(y, 0.0).astype(o_ref.dtype)


def _ew_tiles(M, C):
    Cp = _round_up(C, 128)
    tm = min(512, max(8, (262144 // Cp) // 8 * 8))     # ~1 MiB f32 per (tm, Cp) tile
    if M <= tm:
        tm = _round_up(M, 8)
    Mp = _round_up(M, tm)
    return Mp, Cp, tm


def _pad2d(x, Mp, Cp):
    M, C = x.shape
    return jnp.pad(x, ((0, Mp - M), (0, Cp - C)))


def _pad_vec(v, Cp):
    C = v.shape[0]
    return jnp.pad(v.astype(jnp.float32).reshape(1, C), ((0, 0), (0, Cp - C)))


def bn_apply(x, scale, shift, *, out_dtype, relu=True):
    """y = [relu](x * scale + shift), tiled over rows.  x: (M, C)."""
    M, C = x.shape
    Mp, Cp, tm = _ew_tiles(M, C)
    row = pl.BlockSpec((tm, Cp), lambda m: (m, 0))
    vec = pl.BlockSpec((1, Cp), lambda m: (0, 0))
    out = pl.pallas_call(
        partial(_affine_act_kernel, relu=relu),
        out_shape=jax.ShapeDtypeStruct((Mp, Cp), out_dtype),
        grid_spec=pltpu.PrefetchScalarGridSpec(
            num_scalar_prefetch=0, grid=(Mp // tm,),
            in_specs=[row, vec, vec], out_specs=row),
        compiler_params=pltpu.CompilerParams(
            dimension_semantics=("parallel",), vmem_limit_bytes=VMEM_LIMIT),
    )(_pad2d(x, Mp, Cp), _pad_vec(scale, Cp), _pad_vec(shift, Cp))
    return out[:M, :C]


def bn_add_relu(a, sa, ta, b, sb, tb):
    """relu(a*sa + ta + b*sb + tb): bn3 + bn_downsample + residual add + relu in one pass."""
    M, C = a.shape
    Mp, Cp, tm = _ew_tiles(M, C)
    row = pl.BlockSpec((tm, Cp), lambda m: (m, 0))
    vec = pl.BlockSpec((1, Cp), lambda m: (0, 0))
    out = pl.pallas_call(
        _affine_add_relu_kernel,
        out_shape=jax.ShapeDtypeStruct((Mp, Cp), jnp.float32),
        grid_spec=pltpu.PrefetchScalarGridSpec(
            num_scalar_prefetch=0, grid=(Mp // tm,),
            in_specs=[row, vec, vec, row, vec, vec], out_specs=row),
        compiler_params=pltpu.CompilerParams(
            dimension_semantics=("parallel",), vmem_limit_bytes=VMEM_LIMIT),
    )(_pad2d(a, Mp, Cp), _pad_vec(sa, Cp), _pad_vec(ta, Cp),
      _pad2d(b, Mp, Cp), _pad_vec(sb, Cp), _pad_vec(tb, Cp))
    return out[:M, :C]


# ---------------------------------------------------------------------------
# Glue: BN statistics -> per-channel affine, and im2col for the single 3x3 conv
# ---------------------------------------------------------------------------
def _bn_affine(csum, csq, count, gamma, beta):
    mean = csum / count
    var = csq / count - mean * mean           # biased variance (training-mode BN)
    inv = lax.rsqrt(var + EPS)
    scale = gamma * inv
    shift = beta - mean * scale
    return scale, shift


def _im2col_3x3(x, *, stride, dilation):
    """x: (N,H,W,C) NHWC -> ((N*Ho*Wo, 9*C) bf16, Ho, Wo), padding = dilation.

    TODO(synk): replace with in-kernel tap accumulation (9 shifted GEMMs into one
    accumulator) to avoid materializing the 9x-inflated bf16 im2col matrix in HBM.
    """
    N, H, W, C = x.shape
    d, s = dilation, stride
    Ho = (H - 1) // s + 1
    Wo = (W - 1) // s + 1
    xp = jnp.pad(x, ((0, 0), (d, d), (d, d), (0, 0)))
    taps = []
    for i in range(3):
        for j in range(3):
            taps.append(xp[:, i * d: i * d + s * (Ho - 1) + 1: s,
                           j * d: j * d + s * (Wo - 1) + 1: s, :])
    cols = jnp.stack(taps, axis=3).reshape(N * Ho * Wo, 9 * C)
    return cols, Ho, Wo


# ---------------------------------------------------------------------------
# Bottleneck forward pass
# ---------------------------------------------------------------------------
def bottleneck_forward(params, x_nchw, *, stride=1, dilation=1):
    """torchvision Bottleneck forward (groups=1, base_width=64), NCHW in / NCHW out."""
    x = jnp.transpose(x_nchw, (0, 2, 3, 1)).astype(jnp.float32)      # NHWC
    N, H, W, Cin = x.shape
    x_bf = x.astype(jnp.bfloat16)

    # conv1 (1x1) -> bn1 stats fused in the GEMM epilogue
    w1 = params['conv1_w']                                  # (Cin, width)
    width = w1.shape[1]
    M1 = N * H * W
    o1, s1, q1 = gemm_with_channel_stats(x_bf.reshape(M1, Cin), w1,
                                         out_dtype=jnp.bfloat16)
    sc1, sh1 = _bn_affine(s1, q1, M1, params['bn1_g'], params['bn1_b'])
    # bn1+relu must be applied *before* conv2's zero padding (padding has to stay zero
    # after the affine), so it gets its own tiled elementwise pass.
    h1 = bn_apply(o1, sc1, sh1, out_dtype=jnp.bfloat16, relu=True).reshape(N, H, W, width)

    # conv2 (3x3, stride, dilation) -> bn2 stats fused
    cols, Ho, Wo = _im2col_3x3(h1, stride=stride, dilation=dilation)
    M2 = N * Ho * Wo
    w2 = params['conv2_w'].reshape(9 * width, width)
    o2, s2, q2 = gemm_with_channel_stats(cols, w2, out_dtype=jnp.bfloat16)
    sc2, sh2 = _bn_affine(s2, q2, M2, params['bn2_g'], params['bn2_b'])

    # conv3 (1x1): bn2+relu fused into the GEMM's A-operand read; bn3 stats fused
    w3 = params['conv3_w']                                  # (width, out_ch)
    out_ch = w3.shape[1]
    o3, s3, q3 = gemm_with_channel_stats(o2, w3, out_dtype=jnp.float32,
                                         in_scale=sc2, in_shift=sh2)
    sc3, sh3 = _bn_affine(s3, q3, M2, params['bn3_g'], params['bn3_b'])

    # identity / downsample path
    if 'ds_w' in params:
        xs = x_bf[:, ::stride, ::stride, :].reshape(M2, Cin)   # strided 1x1 conv input
        od, sd, qd = gemm_with_channel_stats(xs, params['ds_w'], out_dtype=jnp.float32)
        sc_i, sh_i = _bn_affine(sd, qd, M2, params['ds_bn_g'], params['ds_bn_b'])
        identity = od
    else:
        identity = x.reshape(M1, Cin)                          # stride==1, Cin==out_ch
        sc_i = jnp.ones((out_ch,), jnp.float32)
        sh_i = jnp.zeros((out_ch,), jnp.float32)

    y = bn_add_relu(o3, sc3, sh3, identity, sc_i, sh_i)        # fused final epilogue
    return jnp.transpose(y.reshape(N, Ho, Wo, out_ch), (0, 3, 1, 2))


# ---------------------------------------------------------------------------
# Parameter construction (mirrors Bottleneck.__init__ + ResNet's downsample)
# ---------------------------------------------------------------------------
def init_bottleneck_params(key, inplanes, planes, *, stride=1, groups=1,
                           base_width=64, dilation=1):
    assert groups == 1  # TODO(synk): grouped 3x3 conv not implemented (module default is 1)
    width = int(planes * (base_width / 64.0)) * groups
    out_ch = planes * 4
    ks = jax.random.split(key, 4)

    def conv_w(k, kh, kw, cin, cout):
        std = math.sqrt(2.0 / (cout * kh * kw))        # kaiming-normal-style init
        return std * jax.random.normal(k, (kh, kw, cin, cout), jnp.float32)

    p = {
        'conv1_w': conv_w(ks[0], 1, 1, inplanes, width).reshape(inplanes, width),
        'bn1_g': jnp.ones((width,), jnp.float32), 'bn1_b': jnp.zeros((width,), jnp.float32),
        'conv2_w': conv_w(ks[1], 3, 3, width, width),
        'bn2_g': jnp.ones((width,), jnp.float32), 'bn2_b': jnp.zeros((width,), jnp.float32),
        'conv3_w': conv_w(ks[2], 1, 1, width, out_ch).reshape(width, out_ch),
        'bn3_g': jnp.ones((out_ch,), jnp.float32), 'bn3_b': jnp.zeros((out_ch,), jnp.float32),
    }
    if stride != 1 or inplanes != out_ch:
        p['ds_w'] = conv_w(ks[3], 1, 1, inplanes, out_ch).reshape(inplanes, out_ch)
        p['ds_bn_g'] = jnp.ones((out_ch,), jnp.float32)
        p['ds_bn_b'] = jnp.zeros((out_ch,), jnp.float32)
    return p


# ---------------------------------------------------------------------------
# Pure-JAX f32 reference (for a correctness sanity check)
# ---------------------------------------------------------------------------
def _ref_bn(x, g, b):
    mean = jnp.mean(x, axis=(0, 1, 2))
    var = jnp.mean(jnp.square(x - mean), axis=(0, 1, 2))
    return (x - mean) * lax.rsqrt(var + EPS) * g + b


def _ref_conv(x, w, stride, pad, dil=1):
    return lax.conv_general_dilated(
        x, w, window_strides=(stride, stride), padding=[(pad, pad), (pad, pad)],
        rhs_dilation=(dil, dil), dimension_numbers=('NHWC', 'HWIO', 'NHWC'),
        precision=lax.Precision.HIGHEST)


def bottleneck_reference(params, x_nchw, *, stride=1, dilation=1):
    x = jnp.transpose(x_nchw, (0, 2, 3, 1)).astype(jnp.float32)
    h = _ref_conv(x, params['conv1_w'][None, None], 1, 0)
    h = jax.nn.relu(_ref_bn(h, params['bn1_g'], params['bn1_b']))
    h = _ref_conv(h, params['conv2_w'], stride, dilation, dilation)
    h = jax.nn.relu(_ref_bn(h, params['bn2_g'], params['bn2_b']))
    h = _ref_conv(h, params['conv3_w'][None, None], 1, 0)
    h = _ref_bn(h, params['bn3_g'], params['bn3_b'])
    if 'ds_w' in params:
        idn = _ref_conv(x, params['ds_w'][None, None], stride, 0)
        idn = _ref_bn(idn, params['ds_bn_g'], params['ds_bn_b'])
    else:
        idn = x
    return jnp.transpose(jax.nn.relu(h + idn), (0, 3, 1, 2))


if __name__ == "__main__":
    key = jax.random.PRNGKey(0)
    kp, kx = jax.random.split(key)

    # Bottleneck(inplanes=16, planes=8, stride=2) with the standard downsample
    # (conv1x1 stride 2 + BN) that ResNet._make_layer would attach.
    inplanes, planes, stride, dilation = 16, 8, 2, 1
    x = jax.random.normal(kx, (2, inplanes, 16, 16), jnp.float32)   # NCHW

    params = init_bottleneck_params(kp, inplanes, planes, stride=stride,
                                    dilation=dilation)

    fwd = jax.jit(partial(bottleneck_forward, stride=stride, dilation=dilation))
    out = jax.block_until_ready(fwd(params, x))

    assert out.shape == (2, planes * 4, 8, 8), out.shape
    assert bool(jnp.all(jnp.isfinite(out)))

    ref = bottleneck_reference(params, x, stride=stride, dilation=dilation)
    max_err = float(jnp.max(jnp.abs(out - ref)))
    assert max_err < 0.2, f"max abs err vs f32 reference = {max_err}"

    print("KERNEL_OK")
</pallas_src>

<mosaic_0001>
module attributes {stable_mosaic.version = 11 : i64} {
  func.func @_gemm_stats_kernel(%arg0: i32, %arg1: i32, %arg2: i32, %arg3: memref<128x128xbf16, #tpu.memory_space<vmem>>, %arg4: memref<128x128xbf16, #tpu.memory_space<vmem>>, %arg5: memref<128x128xf32, #tpu.memory_space<vmem>>, %arg6: memref<1x128xf32, #tpu.memory_space<vmem>>, %arg7: memref<1x128xf32, #tpu.memory_space<vmem>>, %arg8: memref<128x128xf32, #tpu.memory_space<vmem>>) attributes {dimension_semantics = [#tpu.dimension_semantics<parallel>, #tpu.dimension_semantics<arbitrary>, #tpu.dimension_semantics<arbitrary>], iteration_bounds = array<i64: 1, 1, 1>, scalar_prefetch = 0 : i64, scratch_operands = 1 : i64, tpu.core_type = #tpu.core_type<tc>, window_params = [{transform_indices = @transform_0, window_bounds = array<i64: 128, 128>}, {transform_indices = @transform_1, window_bounds = array<i64: 128, 128>}, {transform_indices = @transform_2, window_bounds = array<i64: 128, 128>}, {transform_indices = @transform_3, window_bounds = array<i64: 1, 128>}, {transform_indices = @transform_4, window_bounds = array<i64: 1, 128>}]} {
    %c0_i32 = arith.constant 0 : i32
    %0 = arith.cmpi eq, %arg1, %c0_i32 : i32
    %c0_i32_0 = arith.constant 0 : i32
    %1 = arith.cmpi eq, %arg2, %c0_i32_0 : i32
    %2 = arith.andi %0, %1 : i1
    %3 = arith.extui %2 : i1 to i32
    %c0_i32_1 = arith.constant 0 : i32
    %4 = arith.cmpi ne, %3, %c0_i32_1 : i32
    scf.if %4 {
      %cst_13 = arith.constant 0.000000e+00 : f32
      %17 = vector.broadcast %cst_13 : f32 to vector<1x128xf32>
      %c0_14 = arith.constant 0 : index
      %c0_15 = arith.constant 0 : index
      %18 = vector.load %arg6[%c0_14, %c0_15] : memref<1x128xf32, #tpu.memory_space<vmem>>, vector<1x128xf32>
      tpu.vector_store %arg6[%c0_14, %c0_15], %17 {strides = array<i32>} : memref<1x128xf32, #tpu.memory_space<vmem>>, vector<1x128xf32>,
      %cst_16 = arith.constant 0.000000e+00 : f32
      %19 = vector.broadcast %cst_16 : f32 to vector<1x128xf32>
      %c0_17 = arith.constant 0 : index
      %c0_18 = arith.constant 0 : index
      %20 = vector.load %arg7[%c0_17, %c0_18] : memref<1x128xf32, #tpu.memory_space<vmem>>, vector<1x128xf32>
      tpu.vector_store %arg7[%c0_17, %c0_18], %19 {strides = array<i32>} : memref<1x128xf32, #tpu.memory_space<vmem>>, vector<1x128xf32>,
    } else {
    }
    %c0_i32_2 = arith.constant 0 : i32
    %5 = arith.cmpi eq, %arg2, %c0_i32_2 : i32
    %6 = arith.extui %5 : i1 to i32
    %c0_i32_3 = arith.constant 0 : i32
    %7 = arith.cmpi ne, %6, %c0_i32_3 : i32
    scf.if %7 {
      %cst_13 = arith.constant 0.000000e+00 : f32
      %17 = vector.broadcast %cst_13 : f32 to vector<128x128xf32>
      %c0_14 = arith.constant 0 : index
      %c0_15 = arith.constant 0 : index
      %18 = vector.load %arg8[%c0_14, %c0_15] : memref<128x128xf32, #tpu.memory_space<vmem>>, vector<128x128xf32>
      tpu.vector_store %arg8[%c0_14, %c0_15], %17 {strides = array<i32>} : memref<128x128xf32, #tpu.memory_space<vmem>>, vector<128x128xf32>,
    } else {
    }
    %c0 = arith.constant 0 : index
    %c0_4 = arith.constant 0 : index
    %8 = vector.load %arg3[%c0, %c0_4] : memref<128x128xbf16, #tpu.memory_space<vmem>>, vector<128x128xbf16>
    %c0_5 = arith.constant 0 : index
    %c0_6 = arith.constant 0 : index
    %9 = vector.load %arg8[%c0_5, %c0_6] : memref<128x128xf32, #tpu.memory_space<vmem>>, vector<128x128xf32>
    %c0_7 = arith.constant 0 : index
    %c0_8 = arith.constant 0 : index
    %10 = vector.load %arg4[%c0_7, %c0_8] : memref<128x128xbf16, #tpu.memory_space<vmem>>, vector<128x128xbf16>
    %cst = arith.constant dense<0.000000e+00> : vector<128x128xf32>
    %11 = tpu.matmul %8, %10, %cst {dimension_numbers = #tpu.dot_dimension_numbers<[1], [0], [0], [1], [0, 0, 1, 1], [], []>} : vector<128x128xbf16>, vector<128x128xbf16>, vector<128x128xf32> -> vector<128x128xf32>
    %12 = arith.addf %9, %11 : vector<128x128xf32>
    %c0_9 = arith.constant 0 : index
    %c0_10 = arith.constant 0 : index
    %13 = vector.load %arg8[%c0_9, %c0_10] : memref<128x128xf32, #tpu.memory_space<vmem>>, vector<128x128xf32>
    tpu.vector_store %arg8[%c0_9, %c0_10], %12 {strides = array<i32>} : memref<128x128xf32, #tpu.memory_space<vmem>>, vector<128x128xf32>,
    %c0_i32_11 = arith.constant 0 : i32
    %14 = arith.cmpi eq, %arg2, %c0_i32_11 : i32
    %15 = arith.extui %14 : i1 to i32
    %c0_i32_12 = arith.constant 0 : i32
    %16 = arith.cmpi ne, %15, %c0_i32_12 : i32
    scf.if %16 {
      %c0_13 = arith.constant 0 : index
      %c0_14 = arith.constant 0 : index
      %17 = vector.load %arg8[%c0_13, %c0_14] : memref<128x128xf32, #tpu.memory_space<vmem>>, vector<128x128xf32>
      %c0_15 = arith.constant 0 : index
      %c0_16 = arith.constant 0 : index
      %18 = vector.load %arg5[%c0_15, %c0_16] : memref<128x128xf32, #tpu.memory_space<vmem>>, vector<128x128xf32>
      tpu.vector_store %arg5[%c0_15, %c0_16], %17 {strides = array<i32>} : memref<128x128xf32, #tpu.memory_space<vmem>>, vector<128x128xf32>,
      %c128_i32 = arith.constant 128 : i32
      %19 = arith.muli %arg1, %c128_i32 : i32
      %20 = tpu.iota {dimensions = array<i32: 0>} : vector<128x1xi32>
      %21 = vector.broadcast %19 : i32 to vector<128x1xi32>
      %22 = arith.addi %21, %20 : vector<128x1xi32>
      %c128_i32_17 = arith.constant 128 : i32
      %23 = vector.broadcast %c128_i32_17 : i32 to vector<128x1xi32>
      %24 = arith.cmpi slt, %22, %23 : vector<128x1xi32>
      %25 = arith.extui %24 : vector<128x1xi1> to vector<128x1xi32>
      %26 = arith.sitofp %25 : vector<128x1xi32> to vector<128x1xf32>
      %27 = vector.broadcast %26 : vector<128x1xf32> to vector<128x128xf32>
      %28 = arith.mulf %17, %27 : vector<128x128xf32>
      %c0_18 = arith.constant 0 : index
      %c0_19 = arith.constant 0 : index
      %29 = vector.load %arg6[%c0_18, %c0_19] : memref<1x128xf32, #tpu.memory_space<vmem>>, vector<1x128xf32>
      %cst_20 = arith.constant dense<0.000000e+00> : vector<128xf32>
      %30 = vector.multi_reduction <add>, %28, %cst_20 [0] : vector<128x128xf32> to vector<128xf32>
      %31 = vector.shape_cast %30 : vector<128xf32> to vector<1x128xf32>
      %32 = arith.addf %29, %31 : vector<1x128xf32>
      %c0_21 = arith.constant 0 : index
      %c0_22 = arith.constant 0 : index
      %33 = vector.load %arg6[%c0_21, %c0_22] : memref<1x128xf32, #tpu.memory_space<vmem>>, vector<1x128xf32>
      tpu.vector_store %arg6[%c0_21, %c0_22], %32 {strides = array<i32>} : memref<1x128xf32, #tpu.memory_space<vmem>>, vector<1x128xf32>,
      %c0_23 = arith.constant 0 : index
      %c0_24 = arith.constant 0 : index
      %34 = vector.load %arg7[%c0_23, %c0_24] : memref<1x128xf32, #tpu.memory_space<vmem>>, vector<1x128xf32>
      %35 = arith.mulf %28, %17 : vector<128x128xf32>
      %cst_25 = arith.constant dense<0.000000e+00> : vector<128xf32>
      %36 = vector.multi_reduction <add>, %35, %cst_25 [0] : vector<128x128xf32> to vector<128xf32>
      %37 = vector.shape_cast %36 : vector<128xf32> to vector<1x128xf32>
      %38 = arith.addf %34, %37 : vector<1x128xf32>
      %c0_26 = arith.constant 0 : index
      %c0_27 = arith.constant 0 : index
      %39 = vector.load %arg7[%c0_26, %c0_27] : memref<1x128xf32, #tpu.memory_space<vmem>>, vector<1x128xf32>
      tpu.vector_store %arg7[%c0_26, %c0_27], %38 {strides = array<i32>} : memref<1x128xf32, #tpu.memory_space<vmem>>, vector<1x128xf32>,
    } else {
    }
    return
  }
  func.func @transform_0(%arg0: i32, %arg1: i32, %arg2: i32) -> (i32, i32) {
    %c0_i32 = arith.constant 0 : i32
    return %arg1, %arg2 : i32, i32
  }
  func.func @transform_1(%arg0: i32, %arg1: i32, %arg2: i32) -> (i32, i32) {
    %c0_i32 = arith.constant 0 : i32
    return %arg2, %arg0 : i32, i32
  }
  func.func @transform_2(%arg0: i32, %arg1: i32, %arg2: i32) -> (i32, i32) {
    %c0_i32 = arith.constant 0 : i32
    return %arg1, %arg0 : i32, i32
  }
  func.func @transform_3(%arg0: i32, %arg1: i32, %arg2: i32) -> (i32, i32) {
    %c0_i32 = arith.constant 0 : i32
    %c0_i32_0 = arith.constant 0 : i32
    return %c0_i32, %arg0 : i32, i32
  }
  func.func @transform_4(%arg0: i32, %arg1: i32, %arg2: i32) -> (i32, i32) {
    %c0_i32 = arith.constant 0 : i32
    %c0_i32_0 = arith.constant 0 : i32
    return %c0_i32, %arg0 : i32, i32
  }
}

module attributes {stable_mosaic.version = 11 : i64} {
  func.func @_gemm_stats_kernel(%arg0: i32, %arg1: i32, %arg2: i32, %arg3: memref<256x128xbf16, #tpu.memory_space<vmem>>, %arg4: memref<128x128xbf16, #tpu.memory_space<vmem>>, %arg5: memref<256x128xbf16, #tpu.memory_space<vmem>>, %arg6: memref<1x128xf32, #tpu.memory_space<vmem>>, %arg7: memref<1x128xf32, #tpu.memory_space<vmem>>, %arg8: memref<256x128xf32, #tpu.memory_space<vmem>>) attributes {dimension_semantics = [#tpu.dimension_semantics<parallel>, #tpu.dimension_semantics<arbitrary>, #tpu.dimension_semantics<arbitrary>], iteration_bounds = array<i64: 1, 2, 1>, scalar_prefetch = 0 : i64, scratch_operands = 1 : i64, tpu.core_type = #tpu.core_type<tc>, window_params = [{transform_indices = @transform_0, window_bounds = array<i64: 256, 128>}, {transform_indices = @transform_1, window_bounds = array<i64: 128, 128>}, {transform_indices = @transform_2, window_bounds = array<i64: 256, 128>}, {transform_indices = @transform_3, window_bounds = array<i64: 1, 128>}, {transform_indices = @transform_4, window_bounds = array<i64: 1, 128>}]} {
    %c0_i32 = arith.constant 0 : i32
    %0 = arith.cmpi eq, %arg1, %c0_i32 : i32
    %c0_i32_0 = arith.constant 0 : i32
    %1 = arith.cmpi eq, %arg2, %c0_i32_0 : i32
    %2 = arith.andi %0, %1 : i1
    %3 = arith.extui %2 : i1 to i32
    %c0_i32_1 = arith.constant 0 : i32
    %4 = arith.cmpi ne, %3, %c0_i32_1 : i32
    scf.if %4 {
      %cst_13 = arith.constant 0.000000e+00 : f32
      %17 = vector.broadcast %cst_13 : f32 to vector<1x128xf32>
      %c0_14 = arith.constant 0 : index
      %c0_15 = arith.constant 0 : index
      %18 = vector.load %arg6[%c0_14, %c0_15] : memref<1x128xf32, #tpu.memory_space<vmem>>, vector<1x128xf32>
      tpu.vector_store %arg6[%c0_14, %c0_15], %17 {strides = array<i32>} : memref<1x128xf32, #tpu.memory_space<vmem>>, vector<1x128xf32>,
      %cst_16 = arith.constant 0.000000e+00 : f32
      %19 = vector.broadcast %cst_16 : f32 to vector<1x128xf32>
      %c0_17 = arith.constant 0 : index
      %c0_18 = arith.constant 0 : index
      %20 = vector.load %arg7[%c0_17, %c0_18] : memref<1x128xf32, #tpu.memory_space<vmem>>, vector<1x128xf32>
      tpu.vector_store %arg7[%c0_17, %c0_18], %19 {strides = array<i32>} : memref<1x128xf32, #tpu.memory_space<vmem>>, vector<1x128xf32>,
    } else {
    }
    %c0_i32_2 = arith.constant 0 : i32
    %5 = arith.cmpi eq, %arg2, %c0_i32_2 : i32
    %6 = arith.extui %5 : i1 to i32
    %c0_i32_3 = arith.constant 0 : i32
    %7 = arith.cmpi ne, %6, %c0_i32_3 : i32
    scf.if %7 {
      %cst_13 = arith.constant 0.000000e+00 : f32
      %17 = vector.broadcast %cst_13 : f32 to vector<256x128xf32>
      %c0_14 = arith.constant 0 : index
      %c0_15 = arith.constant 0 : index
      %18 = vector.load %arg8[%c0_14, %c0_15] : memref<256x128xf32, #tpu.memory_space<vmem>>, vector<256x128xf32>
      tpu.vector_store %arg8[%c0_14, %c0_15], %17 {strides = array<i32>} : memref<256x128xf32, #tpu.memory_space<vmem>>, vector<256x128xf32>,
    } else {
    }
    %c0 = arith.constant 0 : index
    %c0_4 = arith.constant 0 : index
    %8 = vector.load %arg3[%c0, %c0_4] : memref<256x128xbf16, #tpu.memory_space<vmem>>, vector<256x128xbf16>
    %c0_5 = arith.constant 0 : index
    %c0_6 = arith.constant 0 : index
    %9 = vector.load %arg8[%c0_5, %c0_6] : memref<256x128xf32, #tpu.memory_space<vmem>>, vector<256x128xf32>
    %c0_7 = arith.constant 0 : index
    %c0_8 = arith.constant 0 : index
    %10 = vector.load %arg4[%c0_7, %c0_8] : memref<128x128xbf16, #tpu.memory_space<vmem>>, vector<128x128xbf16>
    %cst = arith.constant dense<0.000000e+00> : vector<256x128xf32>
    %11 = tpu.matmul %8, %10, %cst {dimension_numbers = #tpu.dot_dimension_numbers<[1], [0], [0], [1], [0, 0, 1, 1], [], []>} : vector<256x128xbf16>, vector<128x128xbf16>, vector<256x128xf32> -> vector<256x128xf32>
    %12 = arith.addf %9, %11 : vector<256x128xf32>
    %c0_9 = arith.constant 0 : index
    %c0_10 = arith.constant 0 : index
    %13 = vector.load %arg8[%c0_9, %c0_10] : memref<256x128xf32, #tpu.memory_space<vmem>>, vector<256x128xf32>
    tpu.vector_store %arg8[%c0_9, %c0_10], %12 {strides = array<i32>} : memref<256x128xf32, #tpu.memory_space<vmem>>, vector<256x128xf32>,
    %c0_i32_11 = arith.constant 0 : i32
    %14 = arith.cmpi eq, %arg2, %c0_i32_11 : i32
    %15 = arith.extui %14 : i1 to i32
    %c0_i32_12 = arith.constant 0 : i32
    %16 = arith.cmpi ne, %15, %c0_i32_12 : i32
    scf.if %16 {
      %c0_13 = arith.constant 0 : index
      %c0_14 = arith.constant 0 : index
      %17 = vector.load %arg8[%c0_13, %c0_14] : memref<256x128xf32, #tpu.memory_space<vmem>>, vector<256x128xf32>
      %18 = arith.truncf %17 : vector<256x128xf32> to vector<256x128xbf16>
      %c0_15 = arith.constant 0 : index
      %c0_16 = arith.constant 0 : index
      %19 = vector.load %arg5[%c0_15, %c0_16] : memref<256x128xbf16, #tpu.memory_space<vmem>>, vector<256x128xbf16>
      tpu.vector_store %arg5[%c0_15, %c0_16], %18 {strides = array<i32>} : memref<256x128xbf16, #tpu.memory_space<vmem>>, vector<256x128xbf16>,
      %c256_i32 = arith.constant 256 : i32
      %20 = arith.muli %arg1, %c256_i32 : i32
      %21 = tpu.iota {dimensions = array<i32: 0>} : vector<256x1xi32>
      %22 = vector.broadcast %20 : i32 to vector<256x1xi32>
      %23 = arith.addi %22, %21 : vector<256x1xi32>
      %c512_i32 = arith.constant 512 : i32
      %24 = vector.broadcast %c512_i32 : i32 to vector<256x1xi32>
      %25 = arith.cmpi slt, %23, %24 : vector<256x1xi32>
      %26 = arith.extui %25 : vector<256x1xi1> to vector<256x1xi32>
      %27 = arith.sitofp %26 : vector<256x1xi32> to vector<256x1xf32>
      %28 = vector.broadcast %27 : vector<256x1xf32> to vector<256x128xf32>
      %29 = arith.mulf %17, %28 : vector<256x128xf32>
      %c0_17 = arith.constant 0 : index
      %c0_18 = arith.constant 0 : index
      %30 = vector.load %arg6[%c0_17, %c0_18] : memref<1x128xf32, #tpu.memory_space<vmem>>, vector<1x128xf32>
      %cst_19 = arith.constant dense<0.000000e+00> : vector<128xf32>
      %31 = vector.multi_reduction <add>, %29, %cst_19 [0] : vector<256x128xf32> to vector<128xf32>
      %32 = vector.shape_cast %31 : vector<128xf32> to vector<1x128xf32>
      %33 = arith.addf %30, %32 : vector<1x128xf32>
      %c0_20 = arith.constant 0 : index
      %c0_21 = arith.constant 0 : index
      %34 = vector.load %arg6[%c0_20, %c0_21] : memref<1x128xf32, #tpu.memory_space<vmem>>, vector<1x128xf32>
      tpu.vector_store %arg6[%c0_20, %c0_21], %33 {strides = array<i32>} : memref<1x128xf32, #tpu.memory_space<vmem>>, vector<1x128xf32>,
      %c0_22 = arith.constant 0 : index
      %c0_23 = arith.constant 0 : index
      %35 = vector.load %arg7[%c0_22, %c0_23] : memref<1x128xf32, #tpu.memory_space<vmem>>, vector<1x128xf32>
      %36 = arith.mulf %29, %17 : vector<256x128xf32>
      %cst_24 = arith.constant dense<0.000000e+00> : vector<128xf32>
      %37 = vector.multi_reduction <add>, %36, %cst_24 [0] : vector<256x128xf32> to vector<128xf32>
      %38 = vector.shape_cast %37 : vector<128xf32> to vector<1x128xf32>
      %39 = arith.addf %35, %38 : vector<1x128xf32>
      %c0_25 = arith.constant 0 : index
      %c0_26 = arith.constant 0 : index
      %40 = vector.load %arg7[%c0_25, %c0_26] : memref<1x128xf32, #tpu.memory_space<vmem>>, vector<1x128xf32>
      tpu.vector_store %arg7[%c0_25, %c0_26], %39 {strides = array<i32>} : memref<1x128xf32, #tpu.memory_space<vmem>>, vector<1x128xf32>,
    } else {
    }
    return
  }
  func.func @transform_0(%arg0: i32, %arg1: i32, %arg2: i32) -> (i32, i32) {
    %c0_i32 = arith.constant 0 : i32
    return %arg1, %arg2 : i32, i32
  }
  func.func @transform_1(%arg0: i32, %arg1: i32, %arg2: i32) -> (i32, i32) {
    %c0_i32 = arith.constant 0 : i32
    return %arg2, %arg0 : i32, i32
  }
  func.func @transform_2(%arg0: i32, %arg1: i32, %arg2: i32) -> (i32, i32) {
    %c0_i32 = arith.constant 0 : i32
    return %arg1, %arg0 : i32, i32
  }
  func.func @transform_3(%arg0: i32, %arg1: i32, %arg2: i32) -> (i32, i32) {
    %c0_i32 = arith.constant 0 : i32
    %c0_i32_0 = arith.constant 0 : i32
    return %c0_i32, %arg0 : i32, i32
  }
  func.func @transform_4(%arg0: i32, %arg1: i32, %arg2: i32) -> (i32, i32) {
    %c0_i32 = arith.constant 0 : i32
    %c0_i32_0 = arith.constant 0 : i32
    return %c0_i32, %arg0 : i32, i32
  }
}

module attributes {stable_mosaic.version = 11 : i64} {
  func.func @_affine_act_kernel(%arg0: i32, %arg1: memref<512x128xbf16, #tpu.memory_space<vmem>>, %arg2: memref<1x128xf32, #tpu.memory_space<vmem>>, %arg3: memref<1x128xf32, #tpu.memory_space<vmem>>, %arg4: memref<512x128xbf16, #tpu.memory_space<vmem>>) attributes {dimension_semantics = [#tpu.dimension_semantics<parallel>], iteration_bounds = array<i64: 1>, scalar_prefetch = 0 : i64, scratch_operands = 0 : i64, tpu.core_type = #tpu.core_type<tc>, window_params = [{transform_indices = @transform_0, window_bounds = array<i64: 512, 128>}, {pipeline_mode = #tpu.pipeline_mode<synchronous>, transform_indices = @transform_1, window_bounds = array<i64: 1, 128>}, {pipeline_mode = #tpu.pipeline_mode<synchronous>, transform_indices = @transform_2, window_bounds = array<i64: 1, 128>}, {transform_indices = @transform_3, window_bounds = array<i64: 512, 128>}]} {
    %c0 = arith.constant 0 : index
    %c0_0 = arith.constant 0 : index
    %0 = vector.load %arg1[%c0, %c0_0] : memref<512x128xbf16, #tpu.memory_space<vmem>>, vector<512x128xbf16>
    %1 = arith.extf %0 : vector<512x128xbf16> to vector<512x128xf32>
    %c0_1 = arith.constant 0 : index
    %c0_2 = arith.constant 0 : index
    %2 = vector.load %arg2[%c0_1, %c0_2] : memref<1x128xf32, #tpu.memory_space<vmem>>, vector<1x128xf32>
    %3 = vector.broadcast %2 : vector<1x128xf32> to vector<512x128xf32>
    %4 = arith.mulf %1, %3 : vector<512x128xf32>
    %c0_3 = arith.constant 0 : index
    %c0_4 = arith.constant 0 : index
    %5 = vector.load %arg3[%c0_3, %c0_4] : memref<1x128xf32, #tpu.memory_space<vmem>>, vector<1x128xf32>
    %6 = vector.broadcast %5 : vector<1x128xf32> to vector<512x128xf32>
    %7 = arith.addf %4, %6 : vector<512x128xf32>
    %cst = arith.constant 0.000000e+00 : f32
    %8 = vector.broadcast %cst : f32 to vector<512x128xf32>
    %9 = arith.maximumf %7, %8 : vector<512x128xf32>
    %10 = arith.truncf %9 : vector<512x128xf32> to vector<512x128xbf16>
    %c0_5 = arith.constant 0 : index
    %c0_6 = arith.constant 0 : index
    %11 = vector.load %arg4[%c0_5, %c0_6] : memref<512x128xbf16, #tpu.memory_space<vmem>>, vector<512x128xbf16>
    tpu.vector_store %arg4[%c0_5, %c0_6], %10 {strides = array<i32>} : memref<512x128xbf16, #tpu.memory_space<vmem>>, vector<512x128xbf16>,
    return
  }
  func.func @transform_0(%arg0: i32) -> (i32, i32) {
    %c0_i32 = arith.constant 0 : i32
    %c0_i32_0 = arith.constant 0 : i32
    return %arg0, %c0_i32 : i32, i32
  }
  func.func @transform_1(%arg0: i32) -> (i32, i32) {
    %c0_i32 = arith.constant 0 : i32
    %c0_i32_0 = arith.constant 0 : i32
    %c0_i32_1 = arith.constant 0 : i32
    return %c0_i32, %c0_i32_0 : i32, i32
  }
  func.func @transform_2(%arg0: i32) -> (i32, i32) {
    %c0_i32 = arith.constant 0 : i32
    %c0_i32_0 = arith.constant 0 : i32
    %c0_i32_1 = arith.constant 0 : i32
    return %c0_i32, %c0_i32_0 : i32, i32
  }
  func.func @transform_3(%arg0: i32) -> (i32, i32) {
    %c0_i32 = arith.constant 0 : i32
    %c0_i32_0 = arith.constant 0 : i32
    return %arg0, %c0_i32 : i32, i32
  }
}

module attributes {stable_mosaic.version = 11 : i64} {
  func.func @_gemm_stats_kernel(%arg0: i32, %arg1: i32, %arg2: i32, %arg3: memref<128x128xbf16, #tpu.memory_space<vmem>>, %arg4: memref<128x128xbf16, #tpu.memory_space<vmem>>, %arg5: memref<128x128xbf16, #tpu.memory_space<vmem>>, %arg6: memref<1x128xf32, #tpu.memory_space<vmem>>, %arg7: memref<1x128xf32, #tpu.memory_space<vmem>>, %arg8: memref<128x128xf32, #tpu.memory_space<vmem>>) attributes {dimension_semantics = [#tpu.dimension_semantics<parallel>, #tpu.dimension_semantics<arbitrary>, #tpu.dimension_semantics<arbitrary>], iteration_bounds = array<i64: 1, 1, 1>, scalar_prefetch = 0 : i64, scratch_operands = 1 : i64, tpu.core_type = #tpu.core_type<tc>, window_params = [{transform_indices = @transform_0, window_bounds = array<i64: 128, 128>}, {transform_indices = @transform_1, window_bounds = array<i64: 128, 128>}, {transform_indices = @transform_2, window_bounds = array<i64: 128, 128>}, {transform_indices = @transform_3, window_bounds = array<i64: 1, 128>}, {transform_indices = @transform_4, window_bounds = array<i64: 1, 128>}]} {
    %c0_i32 = arith.constant 0 : i32
    %0 = arith.cmpi eq, %arg1, %c0_i32 : i32
    %c0_i32_0 = arith.constant 0 : i32
    %1 = arith.cmpi eq, %arg2, %c0_i32_0 : i32
    %2 = arith.andi %0, %1 : i1
    %3 = arith.extui %2 : i1 to i32
    %c0_i32_1 = arith.constant 0 : i32
    %4 = arith.cmpi ne, %3, %c0_i32_1 : i32
    scf.if %4 {
      %cst_13 = arith.constant 0.000000e+00 : f32
      %17 = vector.broadcast %cst_13 : f32 to vector<1x128xf32>
      %c0_14 = arith.constant 0 : index
      %c0_15 = arith.constant 0 : index
      %18 = vector.load %arg6[%c0_14, %c0_15] : memref<1x128xf32, #tpu.memory_space<vmem>>, vector<1x128xf32>
      tpu.vector_store %arg6[%c0_14, %c0_15], %17 {strides = array<i32>} : memref<1x128xf32, #tpu.memory_space<vmem>>, vector<1x128xf32>,
      %cst_16 = arith.constant 0.000000e+00 : f32
      %19 = vector.broadcast %cst_16 : f32 to vector<1x128xf32>
      %c0_17 = arith.constant 0 : index
      %c0_18 = arith.constant 0 : index
      %20 = vector.load %arg7[%c0_17, %c0_18] : memref<1x128xf32, #tpu.memory_space<vmem>>, vector<1x128xf32>
      tpu.vector_store %arg7[%c0_17, %c0_18], %19 {strides = array<i32>} : memref<1x128xf32, #tpu.memory_space<vmem>>, vector<1x128xf32>,
    } else {
    }
    %c0_i32_2 = arith.constant 0 : i32
    %5 = arith.cmpi eq, %arg2, %c0_i32_2 : i32
    %6 = arith.extui %5 : i1 to i32
    %c0_i32_3 = arith.constant 0 : i32
    %7 = arith.cmpi ne, %6, %c0_i32_3 : i32
    scf.if %7 {
      %cst_13 = arith.constant 0.000000e+00 : f32
      %17 = vector.broadcast %cst_13 : f32 to vector<128x128xf32>
      %c0_14 = arith.constant 0 : index
      %c0_15 = arith.constant 0 : index
      %18 = vector.load %arg8[%c0_14, %c0_15] : memref<128x128xf32, #tpu.memory_space<vmem>>, vector<128x128xf32>
      tpu.vector_store %arg8[%c0_14, %c0_15], %17 {strides = array<i32>} : memref<128x128xf32, #tpu.memory_space<vmem>>, vector<128x128xf32>,
    } else {
    }
    %c0 = arith.constant 0 : index
    %c0_4 = arith.constant 0 : index
    %8 = vector.load %arg3[%c0, %c0_4] : memref<128x128xbf16, #tpu.memory_space<vmem>>, vector<128x128xbf16>
    %c0_5 = arith.constant 0 : index
    %c0_6 = arith.constant 0 : index
    %9 = vector.load %arg8[%c0_5, %c0_6] : memref<128x128xf32, #tpu.memory_space<vmem>>, vector<128x128xf32>
    %c0_7 = arith.constant 0 : index
    %c0_8 = arith.constant 0 : index
    %10 = vector.load %arg4[%c0_7, %c0_8] : memref<128x128xbf16, #tpu.memory_space<vmem>>, vector<128x128xbf16>
    %cst = arith.constant dense<0.000000e+00> : vector<128x128xf32>
    %11 = tpu.matmul %8, %10, %cst {dimension_numbers = #tpu.dot_dimension_numbers<[1], [0], [0], [1], [0, 0, 1, 1], [], []>} : vector<128x128xbf16>, vector<128x128xbf16>, vector<128x128xf32> -> vector<128x128xf32>
    %12 = arith.addf %9, %11 : vector<128x128xf32>
    %c0_9 = arith.constant 0 : index
    %c0_10 = arith.constant 0 : index
    %13 = vector.load %arg8[%c0_9, %c0_10] : memref<128x128xf32, #tpu.memory_space<vmem>>, vector<128x128xf32>
    tpu.vector_store %arg8[%c0_9, %c0_10], %12 {strides = array<i32>} : memref<128x128xf32, #tpu.memory_space<vmem>>, vector<128x128xf32>,
    %c0_i32_11 = arith.constant 0 : i32
    %14 = arith.cmpi eq, %arg2, %c0_i32_11 : i32
    %15 = arith.extui %14 : i1 to i32
    %c0_i32_12 = arith.constant 0 : i32
    %16 = arith.cmpi ne, %15, %c0_i32_12 : i32
    scf.if %16 {
      %c0_13 = arith.constant 0 : index
      %c0_14 = arith.constant 0 : index
      %17 = vector.load %arg8[%c0_13, %c0_14] : memref<128x128xf32, #tpu.memory_space<vmem>>, vector<128x128xf32>
      %18 = arith.truncf %17 : vector<128x128xf32> to vector<128x128xbf16>
      %c0_15 = arith.constant 0 : index
      %c0_16 = arith.constant 0 : index
      %19 = vector.load %arg5[%c0_15, %c0_16] : memref<128x128xbf16, #tpu.memory_space<vmem>>, vector<128x128xbf16>
      tpu.vector_store %arg5[%c0_15, %c0_16], %18 {strides = array<i32>} : memref<128x128xbf16, #tpu.memory_space<vmem>>, vector<128x128xbf16>,
      %c128_i32 = arith.constant 128 : i32
      %20 = arith.muli %arg1, %c128_i32 : i32
      %21 = tpu.iota {dimensions = array<i32: 0>} : vector<128x1xi32>
      %22 = vector.broadcast %20 : i32 to vector<128x1xi32>
      %23 = arith.addi %22, %21 : vector<128x1xi32>
      %c128_i32_17 = arith.constant 128 : i32
      %24 = vector.broadcast %c128_i32_17 : i32 to vector<128x1xi32>
      %25 = arith.cmpi slt, %23, %24 : vector<128x1xi32>
      %26 = arith.extui %25 : vector<128x1xi1> to vector<128x1xi32>
      %27 = arith.sitofp %26 : vector<128x1xi32> to vector<128x1xf32>
      %28 = vector.broadcast %27 : vector<128x1xf32> to vector<128x128xf32>
      %29 = arith.mulf %17, %28 : vector<128x128xf32>
      %c0_18 = arith.constant 0 : index
      %c0_19 = arith.constant 0 : index
      %30 = vector.load %arg6[%c0_18, %c0_19] : memref<1x128xf32, #tpu.memory_space<vmem>>, vector<1x128xf32>
      %cst_20 = arith.constant dense<0.000000e+00> : vector<128xf32>
      %31 = vector.multi_reduction <add>, %29, %cst_20 [0] : vector<128x128xf32> to vector<128xf32>
      %32 = vector.shape_cast %31 : vector<128xf32> to vector<1x128xf32>
      %33 = arith.addf %30, %32 : vector<1x128xf32>
      %c0_21 = arith.constant 0 : index
      %c0_22 = arith.constant 0 : index
      %34 = vector.load %arg6[%c0_21, %c0_22] : memref<1x128xf32, #tpu.memory_space<vmem>>, vector<1x128xf32>
      tpu.vector_store %arg6[%c0_21, %c0_22], %33 {strides = array<i32>} : memref<1x128xf32, #tpu.memory_space<vmem>>, vector<1x128xf32>,
      %c0_23 = arith.constant 0 : index
      %c0_24 = arith.constant 0 : index
      %35 = vector.load %arg7[%c0_23, %c0_24] : memref<1x128xf32, #tpu.memory_space<vmem>>, vector<1x128xf32>
      %36 = arith.mulf %29, %17 : vector<128x128xf32>
      %cst_25 = arith.constant dense<0.000000e+00> : vector<128xf32>
      %37 = vector.multi_reduction <add>, %36, %cst_25 [0] : vector<128x128xf32> to vector<128xf32>
      %38 = vector.shape_cast %37 : vector<128xf32> to vector<1x128xf32>
      %39 = arith.addf %35, %38 : vector<1x128xf32>
      %c0_26 = arith.constant 0 : index
      %c0_27 = arith.constant 0 : index
      %40 = vector.load %arg7[%c0_26, %c0_27] : memref<1x128xf32, #tpu.memory_space<vmem>>, vector<1x128xf32>
      tpu.vector_store %arg7[%c0_26, %c0_27], %39 {strides = array<i32>} : memref<1x128xf32, #tpu.memory_space<vmem>>, vector<1x128xf32>,
    } else {
    }
    return
  }
  func.func @transform_0(%arg0: i32, %arg1: i32, %arg2: i32) -> (i32, i32) {
    %c0_i32 = arith.constant 0 : i32
    return %arg1, %arg2 : i32, i32
  }
  func.func @transform_1(%arg0: i32, %arg1: i32, %arg2: i32) -> (i32, i32) {
    %c0_i32 = arith.constant 0 : i32
    return %arg2, %arg0 : i32, i32
  }
  func.func @transform_2(%arg0: i32, %arg1: i32, %arg2: i32) -> (i32, i32) {
    %c0_i32 = arith.constant 0 : i32
    return %arg1, %arg0 : i32, i32
  }
  func.func @transform_3(%arg0: i32, %arg1: i32, %arg2: i32) -> (i32, i32) {
    %c0_i32 = arith.constant 0 : i32
    %c0_i32_0 = arith.constant 0 : i32
    return %c0_i32, %arg0 : i32, i32
  }
  func.func @transform_4(%arg0: i32, %arg1: i32, %arg2: i32) -> (i32, i32) {
    %c0_i32 = arith.constant 0 : i32
    %c0_i32_0 = arith.constant 0 : i32
    return %c0_i32, %arg0 : i32, i32
  }
}

module attributes {stable_mosaic.version = 11 : i64} {
  func.func @_gemm_stats_kernel(%arg0: i32, %arg1: i32, %arg2: i32, %arg3: memref<1x128xf32, #tpu.memory_space<vmem>>, %arg4: memref<1x128xf32, #tpu.memory_space<vmem>>, %arg5: memref<128x128xbf16, #tpu.memory_space<vmem>>, %arg6: memref<128x128xbf16, #tpu.memory_space<vmem>>, %arg7: memref<128x128xf32, #tpu.memory_space<vmem>>, %arg8: memref<1x128xf32, #tpu.memory_space<vmem>>, %arg9: memref<1x128xf32, #tpu.memory_space<vmem>>, %arg10: memref<128x128xf32, #tpu.memory_space<vmem>>) attributes {dimension_semantics = [#tpu.dimension_semantics<parallel>, #tpu.dimension_semantics<arbitrary>, #tpu.dimension_semantics<arbitrary>], iteration_bounds = array<i64: 1, 1, 1>, scalar_prefetch = 0 : i64, scratch_operands = 1 : i64, tpu.core_type = #tpu.core_type<tc>, window_params = [{transform_indices = @transform_0, window_bounds = array<i64: 1, 128>}, {transform_indices = @transform_1, window_bounds = array<i64: 1, 128>}, {transform_indices = @transform_2, window_bounds = array<i64: 128, 128>}, {transform_indices = @transform_3, window_bounds = array<i64: 128, 128>}, {transform_indices = @transform_4, window_bounds = array<i64: 128, 128>}, {transform_indices = @transform_5, window_bounds = array<i64: 1, 128>}, {transform_indices = @transform_6, window_bounds = array<i64: 1, 128>}]} {
    %c0_i32 = arith.constant 0 : i32
    %0 = arith.cmpi eq, %arg1, %c0_i32 : i32
    %c0_i32_0 = arith.constant 0 : i32
    %1 = arith.cmpi eq, %arg2, %c0_i32_0 : i32
    %2 = arith.andi %0, %1 : i1
    %3 = arith.extui %2 : i1 to i32
    %c0_i32_1 = arith.constant 0 : i32
    %4 = arith.cmpi ne, %3, %c0_i32_1 : i32
    scf.if %4 {
      %cst_18 = arith.constant 0.000000e+00 : f32
      %27 = vector.broadcast %cst_18 : f32 to vector<1x128xf32>
      %c0_19 = arith.constant 0 : index
      %c0_20 = arith.constant 0 : index
      %28 = vector.load %arg8[%c0_19, %c0_20] : memref<1x128xf32, #tpu.memory_space<vmem>>, vector<1x128xf32>
      tpu.vector_store %arg8[%c0_19, %c0_20], %27 {strides = array<i32>} : memref<1x128xf32, #tpu.memory_space<vmem>>, vector<1x128xf32>,
      %cst_21 = arith.constant 0.000000e+00 : f32
      %29 = vector.broadcast %cst_21 : f32 to vector<1x128xf32>
      %c0_22 = arith.constant 0 : index
      %c0_23 = arith.constant 0 : index
      %30 = vector.load %arg9[%c0_22, %c0_23] : memref<1x128xf32, #tpu.memory_space<vmem>>, vector<1x128xf32>
      tpu.vector_store %arg9[%c0_22, %c0_23], %29 {strides = array<i32>} : memref<1x128xf32, #tpu.memory_space<vmem>>, vector<1x128xf32>,
    } else {
    }
    %c0_i32_2 = arith.constant 0 : i32
    %5 = arith.cmpi eq, %arg2, %c0_i32_2 : i32
    %6 = arith.extui %5 : i1 to i32
    %c0_i32_3 = arith.constant 0 : i32
    %7 = arith.cmpi ne, %6, %c0_i32_3 : i32
    scf.if %7 {
      %cst_18 = arith.constant 0.000000e+00 : f32
      %27 = vector.broadcast %cst_18 : f32 to vector<128x128xf32>
      %c0_19 = arith.constant 0 : index
      %c0_20 = arith.constant 0 : index
      %28 = vector.load %arg10[%c0_19, %c0_20] : memref<128x128xf32, #tpu.memory_space<vmem>>, vector<128x128xf32>
      tpu.vector_store %arg10[%c0_19, %c0_20], %27 {strides = array<i32>} : memref<128x128xf32, #tpu.memory_space<vmem>>, vector<128x128xf32>,
    } else {
    }
    %c0 = arith.constant 0 : index
    %c0_4 = arith.constant 0 : index
    %8 = vector.load %arg5[%c0, %c0_4] : memref<128x128xbf16, #tpu.memory_space<vmem>>, vector<128x128xbf16>
    %9 = arith.extf %8 : vector<128x128xbf16> to vector<128x128xf32>
    %c0_5 = arith.constant 0 : index
    %c0_6 = arith.constant 0 : index
    %10 = vector.load %arg3[%c0_5, %c0_6] : memref<1x128xf32, #tpu.memory_space<vmem>>, vector<1x128xf32>
    %11 = vector.broadcast %10 : vector<1x128xf32> to vector<128x128xf32>
    %12 = arith.mulf %9, %11 : vector<128x128xf32>
    %c0_7 = arith.constant 0 : index
    %c0_8 = arith.constant 0 : index
    %13 = vector.load %arg4[%c0_7, %c0_8] : memref<1x128xf32, #tpu.memory_space<vmem>>, vector<1x128xf32>
    %14 = vector.broadcast %13 : vector<1x128xf32> to vector<128x128xf32>
    %15 = arith.addf %12, %14 : vector<128x128xf32>
    %cst = arith.constant 0.000000e+00 : f32
    %16 = vector.broadcast %cst : f32 to vector<128x128xf32>
    %17 = arith.maximumf %15, %16 : vector<128x128xf32>
    %18 = arith.truncf %17 : vector<128x128xf32> to vector<128x128xbf16>
    %c0_9 = arith.constant 0 : index
    %c0_10 = arith.constant 0 : index
    %19 = vector.load %arg10[%c0_9, %c0_10] : memref<128x128xf32, #tpu.memory_space<vmem>>, vector<128x128xf32>
    %c0_11 = arith.constant 0 : index
    %c0_12 = arith.constant 0 : index
    %20 = vector.load %arg6[%c0_11, %c0_12] : memref<128x128xbf16, #tpu.memory_space<vmem>>, vector<128x128xbf16>
    %cst_13 = arith.constant dense<0.000000e+00> : vector<128x128xf32>
    %21 = tpu.matmul %18, %20, %cst_13 {dimension_numbers = #tpu.dot_dimension_numbers<[1], [0], [0], [1], [0, 0, 1, 1], [], []>} : vector<128x128xbf16>, vector<128x128xbf16>, vector<128x128xf32> -> vector<128x128xf32>
    %22 = arith.addf %19, %21 : vector<128x128xf32>
    %c0_14 = arith.constant 0 : index
    %c0_15 = arith.constant 0 : index
    %23 = vector.load %arg10[%c0_14, %c0_15] : memref<128x128xf32, #tpu.memory_space<vmem>>, vector<128x128xf32>
    tpu.vector_store %arg10[%c0_14, %c0_15], %22 {strides = array<i32>} : memref<128x128xf32, #tpu.memory_space<vmem>>, vector<128x128xf32>,
    %c0_i32_16 = arith.constant 0 : i32
    %24 = arith.cmpi eq, %arg2, %c0_i32_16 : i32
    %25 = arith.extui %24 : i1 to i32
    %c0_i32_17 = arith.constant 0 : i32
    %26 = arith.cmpi ne, %25, %c0_i32_17 : i32
    scf.if %26 {
      %c0_18 = arith.constant 0 : index
      %c0_19 = arith.constant 0 : index
      %27 = vector.load %arg10[%c0_18, %c0_19] : memref<128x128xf32, #tpu.memory_space<vmem>>, vector<128x128xf32>
      %c0_20 = arith.constant 0 : index
      %c0_21 = arith.constant 0 : index
      %28 = vector.load %arg7[%c0_20, %c0_21] : memref<128x128xf32, #tpu.memory_space<vmem>>, vector<128x128xf32>
      tpu.vector_store %arg7[%c0_20, %c0_21], %27 {strides = array<i32>} : memref<128x128xf32, #tpu.memory_space<vmem>>, vector<128x128xf32>,
      %c128_i32 = arith.constant 128 : i32
      %29 = arith.muli %arg1, %c128_i32 : i32
      %30 = tpu.iota {dimensions = array<i32: 0>} : vector<128x1xi32>
      %31 = vector.broadcast %29 : i32 to vector<128x1xi32>
      %32 = arith.addi %31, %30 : vector<128x1xi32>
      %c128_i32_22 = arith.constant 128 : i32
      %33 = vector.broadcast %c128_i32_22 : i32 to vector<128x1xi32>
      %34 = arith.cmpi slt, %32, %33 : vector<128x1xi32>
      %35 = arith.extui %34 : vector<128x1xi1> to vector<128x1xi32>
      %36 = arith.sitofp %35 : vector<128x1xi32> to vector<128x1xf32>
      %37 = vector.broadcast %36 : vector<128x1xf32> to vector<128x128xf32>
      %38 = arith.mulf %27, %37 : vector<128x128xf32>
      %c0_23 = arith.constant 0 : index
      %c0_24 = arith.constant 0 : index
      %39 = vector.load %arg8[%c0_23, %c0_24] : memref<1x128xf32, #tpu.memory_space<vmem>>, vector<1x128xf32>
      %cst_25 = arith.constant dense<0.000000e+00> : vector<128xf32>
      %40 = vector.multi_reduction <add>, %38, %cst_25 [0] : vector<128x128xf32> to vector<128xf32>
      %41 = vector.shape_cast %40 : vector<128xf32> to vector<1x128xf32>
      %42 = arith.addf %39, %41 : vector<1x128xf32>
      %c0_26 = arith.constant 0 : index
      %c0_27 = arith.constant 0 : index
      %43 = vector.load %arg8[%c0_26, %c0_27] : memref<1x128xf32, #tpu.memory_space<vmem>>, vector<1x128xf32>
      tpu.vector_store %arg8[%c0_26, %c0_27], %42 {strides = array<i32>} : memref<1x128xf32, #tpu.memory_space<vmem>>, vector<1x128xf32>,
      %c0_28 = arith.constant 0 : index
      %c0_29 = arith.constant 0 : index
      %44 = vector.load %arg9[%c0_28, %c0_29] : memref<1x128xf32, #tpu.memory_space<vmem>>, vector<1x128xf32>
      %45 = arith.mulf %38, %27 : vector<128x128xf32>
      %cst_30 = arith.constant dense<0.000000e+00> : vector<128xf32>
      %46 = vector.multi_reduction <add>, %45, %cst_30 [0] : vector<128x128xf32> to vector<128xf32>
      %47 = vector.shape_cast %46 : vector<128xf32> to vector<1x128xf32>
      %48 = arith.addf %44, %47 : vector<1x128xf32>
      %c0_31 = arith.constant 0 : index
      %c0_32 = arith.constant 0 : index
      %49 = vector.load %arg9[%c0_31, %c0_32] : memref<1x128xf32, #tpu.memory_space<vmem>>, vector<1x128xf32>
      tpu.vector_store %arg9[%c0_31, %c0_32], %48 {strides = array<i32>} : memref<1x128xf32, #tpu.memory_space<vmem>>, vector<1x128xf32>,
    } else {
    }
    return
  }
  func.func @transform_0(%arg0: i32, %arg1: i32, %arg2: i32) -> (i32, i32) {
    %c0_i32 = arith.constant 0 : i32
    %c0_i32_0 = arith.constant 0 : i32
    return %c0_i32, %arg2 : i32, i32
  }
  func.func @transform_1(%arg0: i32, %arg1: i32, %arg2: i32) -> (i32, i32) {
    %c0_i32 = arith.constant 0 : i32
    %c0_i32_0 = arith.constant 0 : i32
    return %c0_i32, %arg2 : i32, i32
  }
  func.func @transform_2(%arg0: i32, %arg1: i32, %arg2: i32) -> (i32, i32) {
    %c0_i32 = arith.constant 0 : i32
    return %arg1, %arg2 : i32, i32
  }
  func.func @transform_3(%arg0: i32, %arg1: i32, %arg2: i32) -> (i32, i32) {
    %c0_i32 = arith.constant 0 : i32
    return %arg2, %arg0 : i32, i32
  }
  func.func @transform_4(%arg0: i32, %arg1: i32, %arg2: i32) -> (i32, i32) {
    %c0_i32 = arith.constant 0 : i32
    return %arg1, %arg0 : i32, i32
  }
  func.func @transform_5(%arg0: i32, %arg1: i32, %arg2: i32) -> (i32, i32) {
    %c0_i32 = arith.constant 0 : i32
    %c0_i32_0 = arith.constant 0 : i32
    return %c0_i32, %arg0 : i32, i32
  }
  func.func @transform_6(%arg0: i32, %arg1: i32, %arg2: i32) -> (i32, i32) {
    %c0_i32 = arith.constant 0 : i32
    %c0_i32_0 = arith.constant 0 : i32
    return %c0_i32, %arg0 : i32, i32
  }
}

module attributes {stable_mosaic.version = 11 : i64} {
  func.func @_affine_add_relu_kernel(%arg0: i32, %arg1: memref<128x128xf32, #tpu.memory_space<vmem>>, %arg2: memref<1x128xf32, #tpu.memory_space<vmem>>, %arg3: memref<1x128xf32, #tpu.memory_space<vmem>>, %arg4: memref<128x128xf32, #tpu.memory_space<vmem>>, %arg5: memref<1x128xf32, #tpu.memory_space<vmem>>, %arg6: memref<1x128xf32, #tpu.memory_space<vmem>>, %arg7: memref<128x128xf32, #tpu.memory_space<vmem>>) attributes {dimension_semantics = [#tpu.dimension_semantics<parallel>], iteration_bounds = array<i64: 1>, scalar_prefetch = 0 : i64, scratch_operands = 0 : i64, tpu.core_type = #tpu.core_type<tc>, window_params = [{transform_indices = @transform_0, window_bounds = array<i64: 128, 128>}, {pipeline_mode = #tpu.pipeline_mode<synchronous>, transform_indices = @transform_1, window_bounds = array<i64: 1, 128>}, {pipeline_mode = #tpu.pipeline_mode<synchronous>, transform_indices = @transform_2, window_bounds = array<i64: 1, 128>}, {transform_indices = @transform_3, window_bounds = array<i64: 128, 128>}, {pipeline_mode = #tpu.pipeline_mode<synchronous>, transform_indices = @transform_4, window_bounds = array<i64: 1, 128>}, {pipeline_mode = #tpu.pipeline_mode<synchronous>, transform_indices = @transform_5, window_bounds = array<i64: 1, 128>}, {transform_indices = @transform_6, window_bounds = array<i64: 128, 128>}]} {
    %c0 = arith.constant 0 : index
    %c0_0 = arith.constant 0 : index
    %0 = vector.load %arg1[%c0, %c0_0] : memref<128x128xf32, #tpu.memory_space<vmem>>, vector<128x128xf32>
    %c0_1 = arith.constant 0 : index
    %c0_2 = arith.constant 0 : index
    %1 = vector.load %arg2[%c0_1, %c0_2] : memref<1x128xf32, #tpu.memory_space<vmem>>, vector<1x128xf32>
    %2 = vector.broadcast %1 : vector<1x128xf32> to vector<128x128xf32>
    %3 = arith.mulf %0, %2 : vector<128x128xf32>
    %c0_3 = arith.constant 0 : index
    %c0_4 = arith.constant 0 : index
    %4 = vector.load %arg3[%c0_3, %c0_4] : memref<1x128xf32, #tpu.memory_space<vmem>>, vector<1x128xf32>
    %5 = vector.broadcast %4 : vector<1x128xf32> to vector<128x128xf32>
    %6 = arith.addf %3, %5 : vector<128x128xf32>
    %c0_5 = arith.constant 0 : index
    %c0_6 = arith.constant 0 : index
    %7 = vector.load %arg4[%c0_5, %c0_6] : memref<128x128xf32, #tpu.memory_space<vmem>>, vector<128x128xf32>
    %c0_7 = arith.constant 0 : index
    %c0_8 = arith.constant 0 : index
    %8 = vector.load %arg5[%c0_7, %c0_8] : memref<1x128xf32, #tpu.memory_space<vmem>>, vector<1x128xf32>
    %9 = vector.broadcast %8 : vector<1x128xf32> to vector<128x128xf32>
    %10 = arith.mulf %7, %9 : vector<128x128xf32>
    %11 = arith.addf %6, %10 : vector<128x128xf32>
    %c0_9 = arith.constant 0 : index
    %c0_10 = arith.constant 0 : index
    %12 = vector.load %arg6[%c0_9, %c0_10] : memref<1x128xf32, #tpu.memory_space<vmem>>, vector<1x128xf32>
    %13 = vector.broadcast %12 : vector<1x128xf32> to vector<128x128xf32>
    %14 = arith.addf %11, %13 : vector<128x128xf32>
    %cst = arith.constant 0.000000e+00 : f32
    %15 = vector.broadcast %cst : f32 to vector<128x128xf32>
    %16 = arith.maximumf %14, %15 : vector<128x128xf32>
    %c0_11 = arith.constant 0 : index
    %c0_12 = arith.constant 0 : index
    %17 = vector.load %arg7[%c0_11, %c0_12] : memref<128x128xf32, #tpu.memory_space<vmem>>, vector<128x128xf32>
    tpu.vector_store %arg7[%c0_11, %c0_12], %16 {strides = array<i32>} : memref<128x128xf32, #tpu.memory_space<vmem>>, vector<128x128xf32>,
    return
  }
  func.func @transform_0(%arg0: i32) -> (i32, i32) {
    %c0_i32 = arith.constant 0 : i32
    %c0_i32_0 = arith.constant 0 : i32
    return %arg0, %c0_i32 : i32, i32
  }
  func.func @transform_1(%arg0: i32) -> (i32, i32) {
    %c0_i32 = arith.constant 0 : i32
    %c0_i32_0 = arith.constant 0 : i32
    %c0_i32_1 = arith.constant 0 : i32
    return %c0_i32, %c0_i32_0 : i32, i32
  }
  func.func @transform_2(%arg0: i32) -> (i32, i32) {
    %c0_i32 = arith.constant 0 : i32
    %c0_i32_0 = arith.constant 0 : i32
    %c0_i32_1 = arith.constant 0 : i32
    return %c0_i32, %c0_i32_0 : i32, i32
  }
  func.func @transform_3(%arg0: i32) -> (i32, i32) {
    %c0_i32 = arith.constant 0 : i32
    %c0_i32_0 = arith.constant 0 : i32
    return %arg0, %c0_i32 : i32, i32
  }
  func.func @transform_4(%arg0: i32) -> (i32, i32) {
    %c0_i32 = arith.constant 0 : i32
    %c0_i32_0 = arith.constant 0 : i32
    %c0_i32_1 = arith.constant 0 : i32
    return %c0_i32, %c0_i32_0 : i32, i32
  }
  func.func @transform_5(%arg0: i32) -> (i32, i32) {
    %c0_i32 = arith.constant 0 : i32
    %c0_i32_0 = arith.constant 0 : i32
    %c0_i32_1 = arith.constant 0 : i32
    return %c0_i32, %c0_i32_0 : i32, i32
  }
  func.func @transform_6(%arg0: i32) -> (i32, i32) {
    %c0_i32 = arith.constant 0 : i32
    %c0_i32_0 = arith.constant 0 : i32
    return %arg0, %c0_i32 : i32, i32
  }
}

</mosaic_0001>

<bundles_post_ra>
// kernel: bottleneck_forward.10
= control target key start
LH: loop header
LB: loop body
LE: loop exit
PB: predicated region body
PF: predicated region fallthrough
CT: control target
= control target key end

     0   :  { %v622_v16 = vmov 0.0   ;;  %s762_s1 = inlined_call_operand.vmem [shape: bf16[128,128], index: 1, kind: input, shape index: {}]   ;;  %s763_s0 = inlined_call_operand.vmem [shape: bf16[128,128], index: 0, kind: input, shape index: {}]   ;;  %s764_s3 = inlined_call_operand.vmem [shape: f32[1,128], index: 3, kind: output, shape index: {1}]   ;;  %s765_s4 = inlined_call_operand.vmem [shape: f32[1,128], index: 4, kind: output, shape index: {2}]   ;;  %s766_s2 = inlined_call_operand.vmem [shape: f32[128,128], index: 2, kind: output, shape index: {0}]  }
   0x1   :  { %v606_v0 = vld [vmem:[%s762_s1] sm:$0xff]   ;;  %v607_v1 = vld [vmem:[%s762_s1 + $0x8] sm:$0xff]   ;;  %v608_v2 = vld [vmem:[%s762_s1 + $0x10] sm:$0xff]   ;;  %21 = vst [vmem:[%s764_s3] sm:$0x1] %v622_v16 }
   0x2   :  { %557 = vmatprep.subr.bf16.mxu0 %v606_v0  ;;  %589 = vmatprep.subr.bf16.mxu1 %v606_v0  ;;  %v609_v3 = vld [vmem:[%s762_s1 + $0x18] sm:$0xff]   ;;  %v614_v4 = vld [vmem:[%s763_s0] sm:$0xff]   ;;  %v611_v7 = vld [vmem:[%s762_s1 + $0x28] sm:$0xff]   ;;  %22 = vst [vmem:[%s765_s4] sm:$0x1] %v622_v16 }
   0x3   :  { %558 = vmatpush3.bf16.msra.mxu0 %v606_v0  ;;  %597 = vmatpush3.bf16.msra.mxu1 %v606_v0  ;;  %v610_v5 = vld [vmem:[%s762_s1 + $0x20] sm:$0xff]   ;;  %v612_v8 = vld [vmem:[%s762_s1 + $0x30] sm:$0xff]   ;;  %v613_v9 = vld [vmem:[%s762_s1 + $0x38] sm:$0xff]  }
   0x4   :  { %559 = vmatprep.subr.bf16.mxu0 %v607_v1  ;;  %590 = vmatprep.subr.bf16.mxu1 %v607_v1  ;;  %v618_v6 = vld [vmem:[%s763_s0 + $0x20] sm:$0xff]   ;;  %v615_v10 = vld [vmem:[%s763_s0 + $0x8] sm:$0xff]   ;;  %v616_v12 = vld [vmem:[%s763_s0 + $0x10] sm:$0xff]  }
   0x5   :  { %573 = vmatprep.mubr.bf16.mxu0 %v614_v4  ;;  %581 = vmatprep.mubr.bf16.mxu1 %v618_v6  ;;  %v619_v11 = vld [vmem:[%s763_s0 + $0x28] sm:$0xff]   ;;  %v620_v13 = vld [vmem:[%s763_s0 + $0x30] sm:$0xff]   ;;  %v617_v14 = vld [vmem:[%s763_s0 + $0x18] sm:$0xff]  }
   0x6   :  { %v621_v15 = vld [vmem:[%s763_s0 + $0x38] sm:$0xff]  }
   0x7   :  { %560 = vmatpush3.bf16.msra.mxu0 %v607_v1  ;;  %598 = vmatpush3.bf16.msra.mxu1 %v607_v1 }
   0x8   :  { %561 = vmatprep.subr.bf16.mxu0 %v608_v2  ;;  %591 = vmatprep.subr.bf16.mxu1 %v608_v2 }
   0xb   :  { %562 = vmatpush3.bf16.msra.mxu0 %v608_v2  ;;  %599 = vmatpush3.bf16.msra.mxu1 %v608_v2 }
   0xc   :  { %563 = vmatprep.subr.bf16.mxu0 %v609_v3  ;;  %592 = vmatprep.subr.bf16.mxu1 %v609_v3 }
   0xf   :  { %564 = vmatpush3.bf16.msra.mxu0 %v609_v3  ;;  %600 = vmatpush3.bf16.msra.mxu1 %v609_v3 }
  0x10   :  { %565 = vmatprep.subr.bf16.mxu0 %v610_v5  ;;  %593 = vmatprep.subr.bf16.mxu1 %v610_v5 }
  0x13   :  { %566 = vmatpush3.bf16.msra.mxu0 %v610_v5  ;;  %601 = vmatpush3.bf16.msra.mxu1 %v610_v5 }
  0x14   :  { %567 = vmatprep.subr.bf16.mxu0 %v611_v7  ;;  %594 = vmatprep.subr.bf16.mxu1 %v611_v7 }
  0x17   :  { %568 = vmatpush3.bf16.msra.mxu0 %v611_v7  ;;  %602 = vmatpush3.bf16.msra.mxu1 %v611_v7 }
  0x18   :  { %569 = vmatprep.subr.bf16.mxu0 %v612_v8  ;;  %595 = vmatprep.subr.bf16.mxu1 %v612_v8 }
  0x1b   :  { %570 = vmatpush3.bf16.msra.mxu0 %v612_v8  ;;  %603 = vmatpush3.bf16.msra.mxu1 %v612_v8 }
  0x1c   :  { %571 = vmatprep.subr.bf16.mxu0 %v613_v9  ;;  %596 = vmatprep.subr.bf16.mxu1 %v613_v9 }
  0x1f   :  { %572 = vmatpush3.bf16.msra.mxu0 %v613_v9  ;;  %604 = vmatpush3.bf16.msra.mxu1 %v613_v9 }
  0x22   :  { %574 = vmatmul.mubr.bf16.vlgmr.msra.gmra.mrb[0].mxu0 %v615_v10  ;;  %582 = vmatmul.mubr.bf16.vlgmr.msra.gmra.mrb[0].mxu1 %v619_v11 }
  0x23   :  { %577 = vmatprep.mubr.bf16.mxu0 %v616_v12  ;;  %585 = vmatprep.mubr.bf16.mxu1 %v620_v13 }
  0x2a   :  { %578 = vmatmul.mubr.bf16.gmra.mrb[4].mxu0 %v617_v14  ;;  %586 = vmatmul.mubr.bf16.gmra.mrb[4].mxu1 %v621_v15 }
  0xf5   :  { %v575_v17 = vpop.f32.mrb[0].mxu0  ;;  %v583_v18 = vpop.f32.mrb[0].mxu1 }
  0xf6   :  { %336 = vst [vmem:[%s766_s2 + $0x10] sm:$0xff] %v575_v17  ;;  %v220_v19 = vpop.f32.mrb[1].mxu0  ;;  %344 = vst [vmem:[%s766_s2 + $0x50] sm:$0xff] %v583_v18  ;;  %v252_v20 = vpop.f32.mrb[1].mxu1  ;;  %v476_v28 = vmul.f32 %v575_v17, %v575_v17  ;;  %v484_v60 = vmul.f32 %v583_v18, %v583_v18 }
  0xf7   :  { %334 = vst [vmem:[%s766_s2] sm:$0xff] %v220_v19  ;;  %v576_v21 = vpop.f32.mrb[2].mxu0  ;;  %342 = vst [vmem:[%s766_s2 + $0x40] sm:$0xff] %v252_v20  ;;  %v584_v22 = vpop.f32.mrb[2].mxu1  ;;  %v474_v25 = vmul.f32 %v220_v19, %v220_v19  ;;  %v482_v54 = vmul.f32 %v252_v20, %v252_v20 }
  0xf8   :  { %337 = vst [vmem:[%s766_s2 + $0x18] sm:$0xff] %v576_v21  ;;  %v223_v23 = vpop.f32.mrb[3].mxu0  ;;  %345 = vst [vmem:[%s766_s2 + $0x58] sm:$0xff] %v584_v22  ;;  %v255_v24 = vpop.f32.mrb[3].mxu1  ;;  %v477_v31 = vmul.f32 %v576_v21, %v576_v21  ;;  %v485_v63 = vmul.f32 %v584_v22, %v584_v22 }
  0xf9   :  { %335 = vst [vmem:[%s766_s2 + $0x8] sm:$0xff] %v223_v23  ;;  %v450_v26 = vadd.f32 %v223_v23, %v220_v19  ;;  %v475_v27 = vmul.f32 %v223_v23, %v223_v23  ;;  %343 = vst [vmem:[%s766_s2 + $0x48] sm:$0xff] %v255_v24  ;;  %v483_v59 = vmul.f32 %v255_v24, %v255_v24 }
  0xfb   :  { %v451_v29 = vadd.f32 %v575_v17, %v450_v26  ;;  %v490_v30 = vadd.f32 %v475_v27, %v474_v25  ;;  %v473_v27 = vld [vmem:[%s765_s4] sm:$0x1] }
  0xfd   :  { %v491_v32 = vadd.f32 %v490_v30, %v476_v28  ;;  %v579_v33 = vpop.f32.mrb[4].mxu0  ;;  %v452_v34 = vadd.f32 %v576_v21, %v451_v29  ;;  %v587_v35 = vpop.f32.mrb[4].mxu1 }
  0xfe   :  { %340 = vst [vmem:[%s766_s2 + $0x30] sm:$0xff] %v579_v33  ;;  %v236_v36 = vpop.f32.mrb[5].mxu0  ;;  %348 = vst [vmem:[%s766_s2 + $0x70] sm:$0xff] %v587_v35  ;;  %v268_v37 = vpop.f32.mrb[5].mxu1  ;;  %v480_v48 = vmul.f32 %v579_v33, %v579_v33  ;;  %v488_v8 = vmul.f32 %v587_v35, %v587_v35 }
  0xff   :  { %338 = vst [vmem:[%s766_s2 + $0x20] sm:$0xff] %v236_v36  ;;  %v453_v38 = vadd.f32 %v452_v34, %v236_v36  ;;  %v478_v39 = vmul.f32 %v236_v36, %v236_v36  ;;  %v492_v40 = vadd.f32 %v491_v32, %v477_v31  ;;  %v580_v41 = vpop.f32.mrb[6].mxu0  ;;  %346 = vst [vmem:[%s766_s2 + $0x60] sm:$0xff] %v268_v37  ;;  %v588_v42 = vpop.f32.mrb[6].mxu1 }
 0x100   :  { %341 = vst [vmem:[%s766_s2 + $0x38] sm:$0xff] %v580_v41  ;;  %v239_v43 = vpop.f32.mrb[7].mxu0  ;;  %349 = vst [vmem:[%s766_s2 + $0x78] sm:$0xff] %v588_v42  ;;  %v271_v44 = vpop.f32.mrb[7].mxu1  ;;  %v481_v51 = vmul.f32 %v580_v41, %v580_v41  ;;  %v486_v2 = vmul.f32 %v268_v37, %v268_v37  ;;  %v489_v11 = vmul.f32 %v588_v42, %v588_v42 }
 0x101   :  { %v493_v45 = vadd.f32 %v492_v40, %v478_v39  ;;  %339 = vst [vmem:[%s766_s2 + $0x28] sm:$0xff] %v239_v43  ;;  %v454_v46 = vadd.f32 %v453_v38, %v239_v43  ;;  %v479_v47 = vmul.f32 %v239_v43, %v239_v43  ;;  %347 = vst [vmem:[%s766_s2 + $0x68] sm:$0xff] %v271_v44 }
 0x102   :  { %v487_v7 = vmul.f32 %v271_v44, %v271_v44 }
 0x103   :  { %v455_v49 = vadd.f32 %v579_v33, %v454_v46  ;;  %v494_v50 = vadd.f32 %v493_v45, %v479_v47 }
 0x105   :  { %v495_v52 = vadd.f32 %v494_v50, %v480_v48  ;;  %v456_v53 = vadd.f32 %v580_v41, %v455_v49 }
 0x107   :  { %v457_v55 = vadd.f32 %v456_v53, %v252_v20  ;;  %v496_v56 = vadd.f32 %v495_v52, %v481_v51 }
 0x109   :  { %v497_v57 = vadd.f32 %v496_v56, %v482_v54  ;;  %v458_v58 = vadd.f32 %v457_v55, %v255_v24  ;;  %v449_v24 = vld [vmem:[%s764_s3] sm:$0x1] }
 0x10b   :  { %v459_v61 = vadd.f32 %v583_v18, %v458_v58  ;;  %v498_v62 = vadd.f32 %v497_v57, %v483_v59 }
 0x10d   :  { %v499_v0 = vadd.f32 %v498_v62, %v484_v60  ;;  %v460_v1 = vadd.f32 %v584_v22, %v459_v61 }
 0x10f   :  { %v461_v3 = vadd.f32 %v460_v1, %v268_v37  ;;  %v500_v4 = vadd.f32 %v499_v0, %v485_v63 }
 0x111   :  { %v501_v5 = vadd.f32 %v500_v4, %v486_v2  ;;  %v462_v6 = vadd.f32 %v461_v3, %v271_v44 }
 0x113   :  { %v463_v9 = vadd.f32 %v587_v35, %v462_v6  ;;  %v502_v10 = vadd.f32 %v501_v5, %v487_v7 }
 0x115   :  { %v464_v12 = vadd.f32 %v588_v42, %v463_v9  ;;  %v503_v13 = vadd.f32 %v502_v10, %v488_v8 }
 0x117   :  { %v465_v14 = vrot.slane %v464_v12, 4  ;;  %v504_v15 = vadd.f32 %v503_v13, %v489_v11 }
 0x119   :  { %v466_v16 = vadd.f32 %v465_v14, %v464_v12  ;;  %v505_v17 = vrot.slane %v504_v15, 4 }
 0x11b   :  { %v467_v18 = vrot.slane %v466_v16, 2  ;;  %v506_v19 = vadd.f32 %v505_v17, %v504_v15 }
 0x11d   :  { %v468_v20 = vadd.f32 %v467_v18, %v466_v16  ;;  %v507_v21 = vrot.slane %v506_v19, 2 }
 0x11f   :  { %v469_v22 = vrot.slane %v468_v20, 1  ;;  %v508_v23 = vadd.f32 %v507_v21, %v506_v19 }
 0x121   :  { %v470_v25 = vadd.f32 %v469_v22, %v468_v20  ;;  %v509_v26 = vrot.slane %v508_v23, 1 }
 0x123   :  { %v471_v28 = vadd.f32 %v470_v25, %v449_v24  ;;  %v510_v29 = vadd.f32 %v509_v26, %v508_v23 }
 0x125   :  { %472 = vst [vmem:[%s764_s3] sm:$0x1] %v471_v28  ;;  %v511_v30 = vadd.f32 %v510_v29, %v473_v27 }
 0x127   :  { %512 = vst [vmem:[%s765_s4] sm:$0x1] %v511_v30 }

// kernel: bottleneck_forward.6
= control target key start
LH: loop header
LB: loop body
LE: loop exit
PB: predicated region body
PF: predicated region fallthrough
CT: control target
= control target key end

     0   :  { %s1848_s15 = smov 0   ;;  %s1850_s16 = smov 0   ;;  %s2180_s0 = inlined_call_operand.vmem [shape: bf16[512,128], index: 0, kind: input, shape index: {}]   ;;  %s2181_s1 = inlined_call_operand.vmem [shape: bf16[128,128], index: 1, kind: input, shape index: {}]   ;;  %s2182_s2 = inlined_call_operand.vmem [shape: bf16[512,128], index: 2, kind: output, shape index: {0}]   ;;  %s2183_s3 = inlined_call_operand.vmem [shape: f32[1,128], index: 3, kind: output, shape index: {1}]   ;;  %s2184_s4 = inlined_call_operand.vmem [shape: f32[1,128], index: 4, kind: output, shape index: {2}]  }
   0x1   :  { %s1852_s17 = smov 0  }
   0x2 LB: > { %s30_s18 = sadd.s32 1, %s1815_s16  ;;  %p1432_p0 = scmp.ge.s32.totalorder %s1819_s17, 1  ;;  %s1819_s17 = sphi %s1852_s17, %s15_s17   ;;  %s1815_s16 = sphi %s1850_s16, %s2186_s16   ;;  %s1811_s15 = sphi %s1848_s15, %s2185_s15  }
   0x3   : > { %p32_p1 = scmp.ge.s32.totalorder %s30_s18, 2  ;;  %p210_p2 = scmp.lt.s32.totalorder %s1819_s17, 3 }
   0x5   : > { %s2188_s18 = smov (%p32_p1, %s30_s18), 0  ;;  %p211_p3 = pnand %p1432_p0, %p210_p2 }
   0x6   : > { %s1433_s19 = sshll.u32 (!%p211_p3), %s1811_s15, 5  ;;  %p290_p4 = scmp.eq.s32.totalorder (!%p211_p3), %s1811_s15, 0 }
   0x7   : > { %214 = sbr.rel (%p211_p3) target bundleno = 351 (0x15f), region = 28  ;;  %p257_p5 = scmp.lt.s32.totalorder (!%p211_p3), %s1433_s19, 63 }
   0xe   : > { %s2190_s19 = smov (!%p257_p5, %s1433_s19), 63  ;;  %295 = sbr.rel (!%p290_p4) target bundleno = 21 (0x15), region = 32 }
   0xf   : > { %s1434_s20 = sshll.u32 %s2190_s19, 2  ;;  %v1821_v0 = vmov (%p290_p4), 0.0  }
  0x10   : > { %s1873_s23 = scalar_lea.vmem %s2180_s0, %s1434_s20  ;;  %s1878_s26 = scalar_lea.vmem %s2182_s2, %s1434_s20  ;;  %296 = vst [vmem:[%s2183_s3] sm:$0x1] (%p290_p4), %v1821_v0  ;;  %297 = vst [vmem:[%s2184_s4] sm:$0x1] (%p290_p4), %v1821_v0 }
  0x15 PF: > { %v1773_v1 = vld [vmem:[%s2181_s1] sm:$0xff]   ;;  %v1774_v2 = vld [vmem:[%s2181_s1 + $0x8] sm:$0xff]   ;;  %v1775_v3 = vld [vmem:[%s2181_s1 + $0x10] sm:$0xff]   ;;  %v978_v25 = vlaneseq  ;;  %s1494_s27 = sshll.u32 %s1811_s15, 8  ;;  %v1822_v43 = vmov 0.0  }
  0x16   : > { %1683 = vmatprep.subr.bf16.mxu0 %v1773_v1  ;;  %1731 = vmatprep.subr.bf16.mxu1 %v1773_v1  ;;  %v1776_v4 = vld [vmem:[%s2181_s1 + $0x18] sm:$0xff]   ;;  %v1781_v5 = vld [vmem:[%s1873_s23] sm:$0xff]   ;;  %v1778_v7 = vld [vmem:[%s2181_s1 + $0x28] sm:$0xff]   ;;  %v1929_v27 = vstv %s1494_s27 }
  0x17   : > { %1684 = vmatpush3.bf16.msra.mxu0 %v1773_v1  ;;  %1739 = vmatpush3.bf16.msra.mxu1 %v1773_v1  ;;  %v1777_v6 = vld [vmem:[%s2181_s1 + $0x20] sm:$0xff]   ;;  %v1779_v9 = vld [vmem:[%s2181_s1 + $0x30] sm:$0xff]   ;;  %v1780_v10 = vld [vmem:[%s2181_s1 + $0x38] sm:$0xff]   ;;  %v1927_v26 = vshrl.u32 %v978_v25, 7 }
  0x18   : > { %1685 = vmatprep.subr.bf16.mxu0 %v1774_v2  ;;  %1732 = vmatprep.subr.bf16.mxu1 %v1774_v2  ;;  %v1789_v8 = vld [vmem:[%s1873_s23 + $0x40] sm:$0xff]   ;;  %v1782_v11 = vld [vmem:[%s1873_s23 + $0x8] sm:$0xff]   ;;  %v1783_v13 = vld [vmem:[%s1873_s23 + $0x10] sm:$0xff]  }
  0x19   : > { %1699 = vmatprep.mubr.bf16.mxu0 %v1781_v5  ;;  %1715 = vmatprep.mubr.bf16.mxu1 %v1789_v8  ;;  %v1790_v12 = vld [vmem:[%s1873_s23 + $0x48] sm:$0xff]   ;;  %v1791_v14 = vld [vmem:[%s1873_s23 + $0x50] sm:$0xff]   ;;  %v1784_v15 = vld [vmem:[%s1873_s23 + $0x18] sm:$0xff]   ;;  %v981_v28 = vadd.s32 16, %v1927_v26  ;;  %v982_v29 = vadd.s32 24, %v1927_v26  ;;  %v980_v30 = vadd.s32 8, %v1927_v26  ;;  %v1012_v32 = vadd.s32 %v1929_v27, %v1927_v26 }
  0x1a   : > { %v1792_v16 = vld [vmem:[%s1873_s23 + $0x58] sm:$0xff]   ;;  %v1785_v17 = vld [vmem:[%s1873_s23 + $0x20] sm:$0xff]   ;;  %v1786_v19 = vld [vmem:[%s1873_s23 + $0x28] sm:$0xff]   ;;  %v985_v31 = vadd.s32 48, %v1927_v26  ;;  %v983_v33 = vadd.s32 32, %v1927_v26  ;;  %v986_v34 = vadd.s32 56, %v1927_v26 }
  0x1b   : > { %1686 = vmatpush3.bf16.msra.mxu0 %v1774_v2  ;;  %1740 = vmatpush3.bf16.msra.mxu1 %v1774_v2  ;;  %v1793_v18 = vld [vmem:[%s1873_s23 + $0x60] sm:$0xff]   ;;  %v1794_v20 = vld [vmem:[%s1873_s23 + $0x68] sm:$0xff]   ;;  %v1787_v21 = vld [vmem:[%s1873_s23 + $0x30] sm:$0xff]   ;;  %v1014_v35 = vadd.s32 %v1929_v27, %v981_v28  ;;  %v1015_v36 = vadd.s32 %v1929_v27, %v982_v29  ;;  %v1013_v37 = vadd.s32 %v1929_v27, %v980_v30  ;;  %vm1044_vm0 = vcmp.lt.s32.totalorder %v1012_v32, 512 }
  0x1c   : > { %1687 = vmatprep.subr.bf16.mxu0 %v1775_v3  ;;  %1733 = vmatprep.subr.bf16.mxu1 %v1775_v3  ;;  %v1795_v22 = vld [vmem:[%s1873_s23 + $0x70] sm:$0xff]   ;;  %v1788_v23 = vld [vmem:[%s1873_s23 + $0x38] sm:$0xff]   ;;  %v1018_v38 = vadd.s32 %v1929_v27, %v985_v31  ;;  %v1016_v39 = vadd.s32 %v1929_v27, %v983_v33  ;;  %v1019_v40 = vadd.s32 %v1929_v27, %v986_v34  ;;  %v984_v41 = vadd.s32 40, %v1927_v26 }
  0x1d   : > { %v1796_v24 = vld [vmem:[%s1873_s23 + $0x78] sm:$0xff]   ;;  %v989_v42 = vadd.s32 80, %v1927_v26  ;;  %vm1046_vm1 = vcmp.lt.s32.totalorder %v1014_v35, 512  ;;  %v1495_v44 = vsel %vm1044_vm0, 1.0, %v1822_v43  ;;  %vm1047_vm2 = vcmp.lt.s32.totalorder %v1015_v36, 512 }
  0x1e   : > { %vm1045_vm3 = vcmp.lt.s32.totalorder %v1013_v37, 512  ;;  %vm1050_vm4 = vcmp.lt.s32.totalorder %v1018_v38, 512  ;;  %vm1048_vm5 = vcmp.lt.s32.totalorder %v1016_v39, 512  ;;  %vm1051_vm6 = vcmp.lt.s32.totalorder %v1019_v40, 512 }
  0x1f   : > { %1688 = vmatpush3.bf16.msra.mxu0 %v1775_v3  ;;  %1741 = vmatpush3.bf16.msra.mxu1 %v1775_v3  ;;  %v1017_v45 = vadd.s32 %v1929_v27, %v984_v41  ;;  %v987_v46 = vadd.s32 64, %v1927_v26  ;;  %v1022_v48 = vadd.s32 %v1929_v27, %v989_v42  ;;  %v1497_v50 = vsel %vm1046_vm1, 1.0, %v1822_v43 }
  0x20   : > { %1689 = vmatprep.subr.bf16.mxu0 %v1776_v4  ;;  %1734 = vmatprep.subr.bf16.mxu1 %v1776_v4  ;;  %v1498_v52 = vsel %vm1047_vm2, 1.0, %v1822_v43  ;;  %v1496_v53 = vsel %vm1045_vm3, 1.0, %v1822_v43  ;;  %v990_v54 = vadd.s32 88, %v1927_v26  ;;  %v1501_v58 = vsel %vm1050_vm4, 1.0, %v1822_v43 }
  0x21   : > { %v1499_v59 = vsel %vm1048_vm5, 1.0, %v1822_v43  ;;  %v1965_v60 = vsel %vm1051_vm6, 1.0, %v1822_v43  ;;  %vm1049_vm7 = vcmp.lt.s32.totalorder %v1017_v45, 512  ;;  %v1970_v0 = vadd.s32 %v1929_v27, %v987_v46 }
  0x22   : > { %v988_v1 = vadd.s32 72, %v1927_v26  ;;  %vm1054_vm8 = vcmp.lt.s32.totalorder %v1022_v48, 512  ;;  %v992_v28 = vadd.s32 104, %v1927_v26 }
  0x23   : > { %1690 = vmatpush3.bf16.msra.mxu0 %v1776_v4  ;;  %1742 = vmatpush3.bf16.msra.mxu1 %v1776_v4  ;;  %vm1052_vm9 = vcmp.lt.s32.totalorder %v1970_v0, 512 }
  0x24   : > { %1691 = vmatprep.subr.bf16.mxu0 %v1777_v6  ;;  %1735 = vmatprep.subr.bf16.mxu1 %v1777_v6 }
  0x27   : > { %1692 = vmatpush3.bf16.msra.mxu0 %v1777_v6  ;;  %1743 = vmatpush3.bf16.msra.mxu1 %v1777_v6  ;;  %v1023_v6 = vadd.s32 %v1929_v27, %v990_v54 }
  0x28   : > { %1693 = vmatprep.subr.bf16.mxu0 %v1778_v7  ;;  %1736 = vmatprep.subr.bf16.mxu1 %v1778_v7 }
  0x29   : > { %vm1055_vm10 = vcmp.lt.s32.totalorder %v1023_v6, 512 }
  0x2b   : > { %1694 = vmatpush3.bf16.msra.mxu0 %v1778_v7  ;;  %1744 = vmatpush3.bf16.msra.mxu1 %v1778_v7  ;;  %v991_v7 = vadd.s32 96, %v1927_v26 }
  0x2c   : > { %1695 = vmatprep.subr.bf16.mxu0 %v1779_v9  ;;  %1737 = vmatprep.subr.bf16.mxu1 %v1779_v9 }
  0x2d   : > { %v1024_v25 = vadd.s32 %v1929_v27, %v991_v7 }
  0x2f   : > { %1696 = vmatpush3.bf16.msra.mxu0 %v1779_v9  ;;  %1745 = vmatpush3.bf16.msra.mxu1 %v1779_v9  ;;  %vm1056_vm12 = vcmp.lt.s32.totalorder %v1024_v25, 512 }
  0x30   : > { %1697 = vmatprep.subr.bf16.mxu0 %v1780_v10  ;;  %1738 = vmatprep.subr.bf16.mxu1 %v1780_v10 }
  0x33   : > { %1698 = vmatpush3.bf16.msra.mxu0 %v1780_v10  ;;  %1746 = vmatpush3.bf16.msra.mxu1 %v1780_v10 }
  0x36   : > { %1700 = vmatmul.mubr.bf16.vlgmr.msra.gmra.mrb[0].mxu0 %v1782_v11  ;;  %1716 = vmatmul.mubr.bf16.vlgmr.msra.gmra.mrb[0].mxu1 %v1790_v12 }
  0x37   : > { %1703 = vmatprep.mubr.bf16.mxu0 %v1783_v13  ;;  %1719 = vmatprep.mubr.bf16.mxu1 %v1791_v14  ;;  %v1500_v14 = vsel %vm1049_vm7, 1.0, %v1822_v43 }
  0x3e   : > { %1704 = vmatmul.mubr.bf16.gmra.mrb[4].mxu0 %v1784_v15  ;;  %1720 = vmatmul.mubr.bf16.gmra.mrb[4].mxu1 %v1792_v16  ;;  %v1021_v15 = vadd.s32 %v1929_v27, %v988_v1  ;;  %v993_v16 = vadd.s32 112, %v1927_v26  ;;  %v1507_v1 = vsel %vm1056_vm12, 1.0, %v1822_v43 }
  0x3f   : > { %1707 = vmatprep.mubr.bf16.mxu0 %v1785_v17  ;;  %1723 = vmatprep.mubr.bf16.mxu1 %v1793_v18  ;;  %v994_v17 = vadd.s32 120, %v1927_v26 }
  0x40   : > { %vm1053_vm11 = vcmp.lt.s32.totalorder %v1021_v15, 512  ;;  %v2004_v38 = vadd.s32 %v1929_v27, %v993_v16 }
  0x41   : > { %v2007_v39 = vadd.s32 %v1929_v27, %v994_v17 }
  0x42   : > { %vm1058_vm13 = vcmp.lt.s32.totalorder %v2004_v38, 512 }
  0x43   : > { %vm1059_vm14 = vcmp.lt.s32.totalorder %v2007_v39, 512 }
  0x46   : > { %1708 = vmatmul.mubr.bf16.gmra.mrb[8].mxu0 %v1786_v19  ;;  %1724 = vmatmul.mubr.bf16.gmra.mrb[8].mxu1 %v1794_v20 }
  0x47   : > { %1711 = vmatprep.mubr.bf16.mxu0 %v1787_v21  ;;  %1727 = vmatprep.mubr.bf16.mxu1 %v1795_v22  ;;  %v1992_v22 = vsel %vm1054_vm8, 1.0, %v1822_v43 }
  0x4e   : > { %1712 = vmatmul.mubr.bf16.gmra.mrb[12].mxu0 %v1788_v23  ;;  %1728 = vmatmul.mubr.bf16.gmra.mrb[12].mxu1 %v1796_v24 }
 0x109   : > { %v1701_v47 = vpop.f32.mrb[0].mxu0  ;;  %v1951_v49 = vpop.f32.mrb[0].mxu1 }
 0x10a   : > { %v591_v51 = vpop.f32.mrb[1].mxu0  ;;  %v1957_v55 = vpop.f32.mrb[1].mxu1  ;;  %v1142_v3 = vmul.f32 %v1701_v47, %v1497_v50 }
 0x10b   : > { %v1140_v56 = vmul.f32 %v1495_v44, %v591_v51  ;;  %v1702_v57 = vpop.f32.mrb[2].mxu0  ;;  %v1967_v61 = vpop.f32.mrb[2].mxu1 }
 0x10c   : > { %v1572_v62 = vpack.c.bf16 %v1702_v57, %v1701_v47  ;;  %v594_v63 = vpop.f32.mrb[3].mxu0  ;;  %v1973_v2 = vpop.f32.mrb[3].mxu1  ;;  %v1612_v8 = vpack.c.bf16 %v1967_v61, %v1951_v49  ;;  %v1143_v11 = vmul.f32 %v1702_v57, %v1498_v52  ;;  %v1215_v18 = vmul.f32 %v1701_v47, %v1142_v3 }
 0x10d   : > { %v1567_v4 = vpack.c.bf16 %v594_v63, %v591_v51  ;;  %v1141_v5 = vmul.f32 %v1496_v53, %v594_v63  ;;  %v1607_v9 = vpack.c.bf16 %v1973_v2, %v1957_v55  ;;  %v1213_v10 = vmul.f32 %v1140_v56, %v591_v51 }
 0x10e   : > { %1644 = vst [vmem:[%s1878_s26 + $0x8] sm:$0xff] %v1572_v62   ;;  %1652 = vst [vmem:[%s1878_s26 + $0x48] sm:$0xff] %v1612_v8   ;;  %v1216_v30 = vmul.f32 %v1702_v57, %v1143_v11  ;;  %v1025_v51 = vadd.s32 %v1929_v27, %v992_v28  ;;  %v995_v52 = vadd.s32 128, %v1927_v26  ;;  %v1506_v62 = vsel %vm1055_vm10, 1.0, %v1822_v43 }
 0x10f   : > { %1568 = vst [vmem:[%s1878_s26] sm:$0xff] %v1567_v4   ;;  %v1173_v12 = vadd.f32 %v1141_v5, %v1140_v56  ;;  %v1214_v13 = vmul.f32 %v1141_v5, %v594_v63  ;;  %1651 = vst [vmem:[%s1878_s26 + $0x40] sm:$0xff] %v1607_v9   ;;  %v1504_v63 = vsel %vm1053_vm11, 1.0, %v1822_v43  ;;  %v997_v9 = vadd.s32 144, %v1927_v26 }
 0x110   : > { %vm1057_vm15 = vcmp.lt.s32.totalorder %v1025_v51, 512 }
 0x111   : > { %v1174_v19 = vadd.f32 %v1173_v12, %v1142_v3  ;;  %v1245_v20 = vadd.f32 %v1214_v13, %v1213_v10  ;;  %v1705_v21 = vpop.f32.mrb[4].mxu0  ;;  %v1994_v23 = vpop.f32.mrb[4].mxu1  ;;  %v1028_v10 = vadd.s32 %v1929_v27, %v995_v52 }
 0x112   : > { %v607_v24 = vpop.f32.mrb[5].mxu0  ;;  %v1999_v29 = vpop.f32.mrb[5].mxu1  ;;  %v1146_v46 = vmul.f32 %v1705_v21, %v1501_v58  ;;  %v1503_v58 = vsel %vm1052_vm9, 1.0, %v1822_v43 }
 0x113   : > { %v1246_v31 = vadd.f32 %v1245_v20, %v1215_v18  ;;  %v1144_v32 = vmul.f32 %v1499_v59, %v607_v24  ;;  %v1175_v33 = vadd.f32 %v1174_v19, %v1143_v11  ;;  %v1706_v34 = vpop.f32.mrb[6].mxu0  ;;  %v2001_v35 = vpop.f32.mrb[6].mxu1  ;;  %vm1060_vm0 = vcmp.lt.s32.totalorder %v1028_v10, 512 }
 0x114   : > { %v1582_v36 = vpack.c.bf16 %v1706_v34, %v1705_v21  ;;  %v610_v37 = vpop.f32.mrb[7].mxu0  ;;  %v2009_v40 = vpop.f32.mrb[7].mxu1  ;;  %v1622_v48 = vpack.c.bf16 %v2001_v35, %v1994_v23  ;;  %v1147_v54 = vmul.f32 %v1706_v34, %v1965_v60  ;;  %v1219_v3 = vmul.f32 %v1705_v21, %v1146_v46 }
 0x115   : > { %v1176_v41 = vadd.f32 %v1175_v33, %v1144_v32  ;;  %v1217_v42 = vmul.f32 %v1144_v32, %v607_v24  ;;  %v1247_v44 = vadd.f32 %v1246_v31, %v1216_v30  ;;  %v1577_v45 = vpack.c.bf16 %v610_v37, %v607_v24 }
 0x116   : > { %1646 = vst [vmem:[%s1878_s26 + $0x18] sm:$0xff] %v1582_v36   ;;  %v1145_v47 = vmul.f32 %v1500_v14, %v610_v37  ;;  %v1617_v53 = vpack.c.bf16 %v2009_v40, %v1999_v29  ;;  %1654 = vst [vmem:[%s1878_s26 + $0x58] sm:$0xff] %v1622_v48   ;;  %v1220_v12 = vmul.f32 %v1706_v34, %v1147_v54  ;;  %v998_v21 = vadd.s32 152, %v1927_v26 }
 0x117   : > { %v1248_v50 = vadd.f32 %v1247_v44, %v1217_v42  ;;  %1645 = vst [vmem:[%s1878_s26 + $0x10] sm:$0xff] %v1577_v45   ;;  %v996_v30 = vadd.s32 136, %v1927_v26  ;;  %v1030_v32 = vadd.s32 %v1929_v27, %v997_v9  ;;  %v1509_v42 = vsel %vm1058_vm13, 1.0, %v1822_v43 }
 0x118   : > { %v1177_v56 = vadd.f32 %v1176_v41, %v1145_v47  ;;  %v1218_v57 = vmul.f32 %v1145_v47, %v610_v37  ;;  %1653 = vst [vmem:[%s1878_s26 + $0x50] sm:$0xff] %v1617_v53   ;;  %v1510_v44 = vsel %vm1059_vm14, 1.0, %v1822_v43  ;;  %v1508_v45 = vsel %vm1057_vm15, 1.0, %v1822_v43 }
 0x119   : > { %v1709_v59 = vpop.f32.mrb[8].mxu0  ;;  %v2032_v60 = vpop.f32.mrb[8].mxu1  ;;  %vm1062_vm1 = vcmp.lt.s32.totalorder %v1030_v32, 512  ;;  %v1511_v51 = vsel %vm1060_vm0, 1.0, %v1822_v43  ;;  %v1000_v9 = vadd.s32 168, %v1927_v26 }
 0x11a   : > { %v1178_v4 = vadd.f32 %v1177_v56, %v1146_v46  ;;  %v1249_v0 = vadd.f32 %v1248_v50, %v1218_v57  ;;  %v623_v5 = vpop.f32.mrb[9].mxu0  ;;  %v2035_v7 = vpop.f32.mrb[9].mxu1  ;;  %v1150_v24 = vmul.f32 %v1709_v59, %v1992_v22  ;;  %v1031_v46 = vadd.s32 %v1929_v27, %v998_v21 }
 0x11b   : > { %v1148_v6 = vmul.f32 %v1503_v58, %v623_v5  ;;  %v1710_v8 = vpop.f32.mrb[10].mxu0  ;;  %v2039_v11 = vpop.f32.mrb[10].mxu1  ;;  %v999_v57 = vadd.s32 160, %v1927_v26 }
 0x11c   : > { %v1250_v13 = vadd.f32 %v1249_v0, %v1219_v3  ;;  %v1179_v14 = vadd.f32 %v1178_v4, %v1147_v54  ;;  %v1592_v15 = vpack.c.bf16 %v1710_v8, %v1709_v59  ;;  %v626_v16 = vpop.f32.mrb[11].mxu0  ;;  %v2041_v17 = vpop.f32.mrb[11].mxu1  ;;  %v1632_v33 = vpack.c.bf16 %v2039_v11, %v2032_v60 }
 0x11d   : > { %v1221_v18 = vmul.f32 %v1148_v6, %v623_v5  ;;  %v1587_v19 = vpack.c.bf16 %v626_v16, %v623_v5  ;;  %v1149_v20 = vmul.f32 %v1504_v63, %v626_v16  ;;  %v1151_v36 = vmul.f32 %v1710_v8, %v1506_v62 }
 0x11e   : > { %v1180_v25 = vadd.f32 %v1179_v14, %v1148_v6  ;;  %v1251_v28 = vadd.f32 %v1250_v13, %v1220_v12  ;;  %1648 = vst [vmem:[%s1878_s26 + $0x28] sm:$0xff] %v1592_v15   ;;  %v1627_v22 = vpack.c.bf16 %v2041_v17, %v2035_v7  ;;  %1656 = vst [vmem:[%s1878_s26 + $0x68] sm:$0xff] %v1632_v33   ;;  %vm1063_vm3 = vcmp.lt.s32.totalorder %v1031_v46, 512 }
 0x11f   : > { %1647 = vst [vmem:[%s1878_s26 + $0x20] sm:$0xff] %v1587_v19   ;;  %v1222_v31 = vmul.f32 %v1149_v20, %v626_v16  ;;  %v1223_v48 = vmul.f32 %v1709_v59, %v1150_v24  ;;  %v1029_v54 = vadd.s32 %v1929_v27, %v996_v30  ;;  %v1224_v59 = vmul.f32 %v1710_v8, %v1151_v36 }
 0x120   : > { %v1252_v34 = vadd.f32 %v1251_v28, %v1221_v18  ;;  %v1181_v37 = vadd.f32 %v1180_v25, %v1149_v20  ;;  %1655 = vst [vmem:[%s1878_s26 + $0x60] sm:$0xff] %v1627_v22   ;;  %v1001_v8 = vadd.s32 176, %v1927_v26  ;;  %v1032_v15 = vadd.s32 %v1929_v27, %v999_v57 }
 0x121   : > { %v1713_v41 = vpop.f32.mrb[12].mxu0  ;;  %v2063_v47 = vpop.f32.mrb[12].mxu1  ;;  %vm1061_vm2 = vcmp.lt.s32.totalorder %v1029_v54, 512  ;;  %v1002_v25 = vadd.s32 184, %v1927_v26  ;;  %v1033_v28 = vadd.s32 %v1929_v27, %v1000_v9  ;;  %v1003_v22 = vadd.s32 192, %v1927_v26 }
 0x122   : > { %v1182_v50 = vadd.f32 %v1181_v37, %v1150_v24  ;;  %v1253_v52 = vadd.f32 %v1252_v34, %v1222_v31  ;;  %v639_v53 = vpop.f32.mrb[13].mxu0  ;;  %v2067_v38 = vpop.f32.mrb[13].mxu1  ;;  %v1154_v10 = vmul.f32 %v1713_v41, %v1509_v42  ;;  %v1512_v24 = vsel %vm1061_vm2, 1.0, %v1822_v43 }
 0x123   : > { %v1152_v56 = vmul.f32 %v1507_v1, %v639_v53  ;;  %v1714_v39 = vpop.f32.mrb[14].mxu0  ;;  %v2072_v58 = vpop.f32.mrb[14].mxu1  ;;  %v1156_v34 = vmul.f32 %v1511_v51, %v1957_v55  ;;  %v1034_v37 = vadd.s32 %v1929_v27, %v1001_v8  ;;  %vm1064_vm4 = vcmp.lt.s32.totalorder %v1032_v15, 512 }
 0x124   : > { %v1254_v62 = vadd.f32 %v1253_v52, %v1223_v48  ;;  %v1183_v63 = vadd.f32 %v1182_v50, %v1151_v36  ;;  %v1602_v3 = vpack.c.bf16 %v1714_v39, %v1713_v41  ;;  %v642_v4 = vpop.f32.mrb[15].mxu0  ;;  %v2074_v0 = vpop.f32.mrb[15].mxu1  ;;  %v1642_v16 = vpack.c.bf16 %v2072_v58, %v2063_v47 }
 0x125   : > { %v1225_v5 = vmul.f32 %v1152_v56, %v639_v53  ;;  %v1597_v1 = vpack.c.bf16 %v642_v4, %v639_v53  ;;  %v1153_v6 = vmul.f32 %v1508_v45, %v642_v4  ;;  %v1155_v19 = vmul.f32 %v1714_v39, %v1510_v44 }
 0x126   : > { %v1184_v12 = vadd.f32 %v1183_v63, %v1152_v56  ;;  %v1255_v13 = vadd.f32 %v1254_v62, %v1224_v59  ;;  %1650 = vst [vmem:[%s1878_s26 + $0x38] sm:$0xff] %v1602_v3   ;;  %v1637_v21 = vpack.c.bf16 %v2074_v0, %v2067_v38  ;;  %1658 = vst [vmem:[%s1878_s26 + $0x78] sm:$0xff] %v1642_v16   ;;  %v1513_v36 = vsel %vm1062_vm1, 1.0, %v1822_v43 }
 0x127   : > { %1649 = vst [vmem:[%s1878_s26 + $0x30] sm:$0xff] %v1597_v1   ;;  %v1226_v14 = vmul.f32 %v1153_v6, %v642_v4  ;;  %v1227_v30 = vmul.f32 %v1713_v41, %v1154_v10  ;;  %v1228_v42 = vmul.f32 %v1714_v39, %v1155_v19  ;;  %v1157_v48 = vmul.f32 %v1512_v24, %v1973_v2 }
 0x128   : > { %v1256_v18 = vadd.f32 %v1255_v13, %v1225_v5  ;;  %v1185_v20 = vadd.f32 %v1184_v12, %v1153_v6  ;;  %1657 = vst [vmem:[%s1878_s26 + $0x70] sm:$0xff] %v1637_v21   ;;  %v1514_v41 = vsel %vm1063_vm3, 1.0, %v1822_v43  ;;  %v1035_v50 = vadd.s32 %v1929_v27, %v1002_v25 }
 0x129   : > { %vm1065_vm5 = vcmp.lt.s32.totalorder %v1033_v28, 512  ;;  %v1004_v52 = vadd.s32 200, %v1927_v26  ;;  %v1158_v32 = vmul.f32 %v1951_v49, %v1513_v36  ;;  %v1229_v54 = vmul.f32 %v1156_v34, %v1957_v55 }
 0x12a   : > { %v1186_v31 = vadd.f32 %v1185_v20, %v1154_v10  ;;  %v1257_v33 = vadd.f32 %v1256_v18, %v1226_v14  ;;  %vm1066_vm6 = vcmp.lt.s32.totalorder %v1034_v37, 512  ;;  %v1515_v39 = vsel %vm1064_vm4, 1.0, %v1822_v43 }
 0x12b   : > { %v1005_v51 = vadd.s32 208, %v1927_v26  ;;  %v1036_v57 = vadd.s32 %v1929_v27, %v1003_v22  ;;  %v1159_v59 = vmul.f32 %v1967_v61, %v1514_v41  ;;  %v1230_v63 = vmul.f32 %v1157_v48, %v1973_v2 }
 0x12c   : > { %v1258_v44 = vadd.f32 %v1257_v33, %v1227_v30  ;;  %v1187_v45 = vadd.f32 %v1186_v31, %v1155_v19  ;;  %vm1067_vm7 = vcmp.lt.s32.totalorder %v1035_v50, 512  ;;  %v1516_v3 = vsel %vm1065_vm5, 1.0, %v1822_v43 }
 0x12d   : > { %v1006_v4 = vadd.s32 216, %v1927_v26  ;;  %v1037_v55 = vadd.s32 %v1929_v27, %v1004_v52  ;;  %v1231_v5 = vmul.f32 %v1951_v49, %v1158_v32  ;;  %v1160_v9 = vmul.f32 %v1515_v39, %v1999_v29 }
 0x12e   : > { %v1188_v53 = vadd.f32 %v1187_v45, %v1156_v34  ;;  %v1259_v56 = vadd.f32 %v1258_v44, %v1228_v42  ;;  %v1517_v10 = vsel %vm1066_vm6, 1.0, %v1822_v43  ;;  %v1038_v12 = vadd.s32 %v1929_v27, %v1005_v51 }
 0x12f   : > { %vm1068_vm8 = vcmp.lt.s32.totalorder %v1036_v57, 512  ;;  %v1007_v2 = vadd.s32 224, %v1927_v26  ;;  %v1232_v13 = vmul.f32 %v1967_v61, %v1159_v59  ;;  %v1161_v15 = vmul.f32 %v1516_v3, %v2009_v40 }
 0x130   : > { %v1260_v46 = vadd.f32 %v1259_v56, %v1229_v54  ;;  %v1189_v62 = vadd.f32 %v1188_v53, %v1157_v48  ;;  %v1518_v49 = vsel %vm1067_vm7, 1.0, %v1822_v43  ;;  %v1039_v16 = vadd.s32 %v1929_v27, %v1006_v4 }
 0x131   : > { %vm1069_vm9 = vcmp.lt.s32.totalorder %v1037_v55, 512  ;;  %v1008_v18 = vadd.s32 232, %v1927_v26  ;;  %v1162_v19 = vmul.f32 %v1994_v23, %v1517_v10  ;;  %v1233_v21 = vmul.f32 %v1160_v9, %v1999_v29 }
 0x132   : > { %v1190_v1 = vadd.f32 %v1189_v62, %v1158_v32  ;;  %v1261_v6 = vadd.f32 %v1260_v46, %v1230_v63  ;;  %vm1070_vm10 = vcmp.lt.s32.totalorder %v1038_v12, 512  ;;  %v1519_v61 = vsel %vm1068_vm8, 1.0, %v1822_v43 }
 0x133   : > { %v1009_v25 = vadd.s32 240, %v1927_v26  ;;  %v1040_v28 = vadd.s32 %v1929_v27, %v1007_v2  ;;  %v1163_v31 = vmul.f32 %v2001_v35, %v1518_v49  ;;  %v1234_v34 = vmul.f32 %v1161_v15, %v2009_v40 }
 0x134   : > { %v1262_v14 = vadd.f32 %v1261_v6, %v1231_v5  ;;  %v1191_v8 = vadd.f32 %v1190_v1, %v1159_v59  ;;  %vm1071_vm11 = vcmp.lt.s32.totalorder %v1039_v16, 512  ;;  %v1520_v36 = vsel %vm1069_vm9, 1.0, %v1822_v43 }
 0x135   : > { %v1010_v37 = vadd.s32 248, %v1927_v26  ;;  %v1041_v29 = vadd.s32 %v1929_v27, %v1008_v18  ;;  %v1235_v22 = vmul.f32 %v1994_v23, %v1162_v19  ;;  %v1164_v45 = vmul.f32 %v1519_v61, %v2035_v7 }
 0x136   : > { %v1192_v20 = vadd.f32 %v1191_v8, %v1160_v9  ;;  %v1263_v24 = vadd.f32 %v1262_v14, %v1232_v13  ;;  %v1521_v48 = vsel %vm1070_vm10, 1.0, %v1822_v43  ;;  %v1042_v41 = vadd.s32 %v1929_v27, %v1009_v25 }
 0x137   : > { %vm1072_vm12 = vcmp.lt.s32.totalorder %v1040_v28, 512  ;;  %v1236_v40 = vmul.f32 %v2001_v35, %v1163_v31  ;;  %v1165_v26 = vmul.f32 %v1520_v36, %v2041_v17  ;;  %v1522_v32 = vsel %vm1071_vm11, 1.0, %v1822_v43 }
 0x138   : > { %v1264_v30 = vadd.f32 %v1263_v24, %v1233_v21  ;;  %v1193_v33 = vadd.f32 %v1192_v20, %v1161_v15  ;;  %v1043_v23 = vadd.s32 %v1929_v27, %v1010_v37  ;;  %vm1073_vm13 = vcmp.lt.s32.totalorder %v1041_v29, 512 }
 0x139   : > { %v1166_v53 = vmul.f32 %v2032_v60, %v1521_v48  ;;  %v1237_v56 = vmul.f32 %v1164_v45, %v2035_v7  ;;  %vm1074_vm14 = vcmp.lt.s32.totalorder %v1042_v41, 512  ;;  %v1523_v51 = vsel %vm1072_vm12, 1.0, %v1822_v43 }
 0x13a   : > { %v1194_v42 = vadd.f32 %v1193_v33, %v1162_v19  ;;  %v1265_v44 = vadd.f32 %v1264_v30, %v1234_v34  ;;  %v1167_v35 = vmul.f32 %v2039_v11, %v1522_v32  ;;  %v1238_v59 = vmul.f32 %v1165_v26, %v2041_v17 }
 0x13b   : > { %vm1075_vm15 = vcmp.lt.s32.totalorder %v1043_v23, 512  ;;  %v1524_v62 = vsel %vm1073_vm13, 1.0, %v1822_v43  ;;  %v1239_v27 = vmul.f32 %v2032_v60, %v1166_v53  ;;  %v1168_v4 = vmul.f32 %v1523_v51, %v2067_v38 }
 0x13c   : > { %v1266_v50 = vadd.f32 %v1265_v44, %v1235_v22  ;;  %v1195_v52 = vadd.f32 %v1194_v42, %v1163_v31  ;;  %v1525_v7 = vsel %vm1074_vm14, 1.0, %v1822_v43  ;;  %v1240_v55 = vmul.f32 %v2039_v11, %v1167_v35 }
 0x13d   : > { %v1169_v6 = vmul.f32 %v1524_v62, %v2074_v0  ;;  %v1526_v9 = vsel %vm1075_vm15, 1.0, %v1822_v43  ;;  %v1170_v17 = vmul.f32 %v2063_v47, %v1525_v7  ;;  %v1241_v12 = vmul.f32 %v1168_v4, %v2067_v38 }
 0x13e   : > { %v1196_v54 = vadd.f32 %v1195_v52, %v1164_v45  ;;  %v1267_v39 = vadd.f32 %v1266_v50, %v1236_v40  ;;  %v1171_v13 = vmul.f32 %v2072_v58, %v1526_v9 }
 0x13f   : > { %v1242_v8 = vmul.f32 %v1169_v6, %v2074_v0  ;;  %v1243_v11 = vmul.f32 %v2063_v47, %v1170_v17  ;;  %v1172_v47 = vld [vmem:[%s2183_s3] sm:$0x1] }
 0x140   : > { %v1268_v57 = vadd.f32 %v1267_v39, %v1237_v56  ;;  %v1197_v46 = vadd.f32 %v1196_v54, %v1165_v26  ;;  %v1244_v16 = vmul.f32 %v2072_v58, %v1171_v13  ;;  %v1212_v58 = vld [vmem:[%s2184_s4] sm:$0x1] }
 0x142   : > { %v1198_v63 = vadd.f32 %v1197_v46, %v1166_v53  ;;  %v1269_v3 = vadd.f32 %v1268_v57, %v1238_v59 }
 0x144   : > { %v1270_v5 = vadd.f32 %v1269_v3, %v1239_v27  ;;  %v1199_v1 = vadd.f32 %v1198_v63, %v1167_v35 }
 0x146   : > { %v1200_v10 = vadd.f32 %v1199_v1, %v1168_v4  ;;  %v1271_v60 = vadd.f32 %v1270_v5, %v1240_v55 }
 0x148   : > { %v1272_v2 = vadd.f32 %v1271_v60, %v1241_v12  ;;  %v1201_v14 = vadd.f32 %v1200_v10, %v1169_v6 }
 0x14a   : > { %v1202_v15 = vadd.f32 %v1201_v14, %v1170_v17  ;;  %v1273_v49 = vadd.f32 %v1272_v2, %v1242_v8 }
 0x14c   : > { %v1203_v18 = vadd.f32 %v1202_v15, %v1171_v13  ;;  %v1274_v43 = vadd.f32 %v1273_v49, %v1243_v11 }
 0x14e   : > { %v1204_v19 = vrot.slane %v1203_v18, 4  ;;  %v1275_v20 = vadd.f32 %v1274_v43, %v1244_v16 }
 0x150   : > { %v1205_v21 = vadd.f32 %v1204_v19, %v1203_v18  ;;  %v1276_v24 = vrot.slane %v1275_v20, 4 }
 0x152   : > { %v1206_v38 = vrot.slane %v1205_v21, 2  ;;  %v1277_v61 = vadd.f32 %v1276_v24, %v1275_v20 }
 0x154   : > { %v1207_v25 = vadd.f32 %v1206_v38, %v1205_v21  ;;  %v1278_v28 = vrot.slane %v1277_v61, 2 }
 0x156   : > { %v1208_v30 = vrot.slane %v1207_v25, 1  ;;  %v1279_v31 = vadd.f32 %v1278_v28, %v1277_v61 }
 0x158   : > { %v1209_v0 = vadd.f32 %v1208_v30, %v1207_v25  ;;  %v1280_v33 = vrot.slane %v1279_v31, 1 }
 0x15a   : > { %v1210_v34 = vadd.f32 %v1209_v0, %v1172_v47  ;;  %v1281_v36 = vadd.f32 %v1280_v33, %v1279_v31 }
 0x15c   : > { %1211 = vst [vmem:[%s2183_s3] sm:$0x1] %v1210_v34  ;;  %v1282_v37 = vadd.f32 %v1281_v36, %v1212_v58 }
 0x15e   : > { %1283 = vst [vmem:[%s2184_s4] sm:$0x1] %v1282_v37 }
 0x15f PF: > { %s15_s17 = sadd.s32 1, %s1819_s17   ;;  %s2185_s15 = smov %s1815_s16 }
 0x160   : > { %p12_p6 = scmp.ge.s32.totalorder %s15_s17, 4   ;;  %s2186_s16 = smov %s2188_s18 }
 0x162   :  { %14 = sbr.rel (!%p12_p6) target bundleno = 2 (0x2), region = 97 }

// kernel: bottleneck_forward.7
= control target key start
LH: loop header
LB: loop body
LE: loop exit
PB: predicated region body
PF: predicated region fallthrough
CT: control target
= control target key end

     0   :  { %s1502_s0 = inlined_call_operand.vmem [shape: bf16[512,128], index: 0, kind: input, shape index: {}]   ;;  %s1503_s1 = inlined_call_operand.vmem [shape: f32[1,128], index: 1, kind: input, shape index: {}]   ;;  %s1504_s2 = inlined_call_operand.vmem [shape: f32[1,128], index: 2, kind: input, shape index: {}]   ;;  %s1505_s3 = inlined_call_operand.vmem [shape: bf16[512,128], index: 3, kind: output, shape index: {}]  }
   0x1   :  { %v803_v0 = vld [vmem:[%s1502_s0] sm:$0xff]   ;;  %v1090_v4 = vld [vmem:[%s1502_s0 + $0x8] sm:$0xff]   ;;  %v1091_v5 = vld [vmem:[%s1502_s0 + $0x10] sm:$0xff]  }
   0x2   :  { %v1178_v1 = vld [vmem:[%s1503_s1] ss:$0 sm:$0xff]  ;;  %v804_v2 = vunpack.c.l.bf16 %v803_v0  ;;  %v805_v3 = vunpack.c.h.bf16 %v803_v0  ;;  %v1092_v6 = vld [vmem:[%s1502_s0 + $0x18] sm:$0xff]   ;;  %v808_v8 = vunpack.c.l.bf16 %v1090_v4  ;;  %v809_v9 = vunpack.c.h.bf16 %v1090_v4  ;;  %v1094_v33 = vld [vmem:[%s1502_s0 + $0x28] sm:$0xff]  }
   0x3   :  { %v1192_v7 = vld [vmem:[%s1504_s2] ss:$0 sm:$0xff]  ;;  %v812_v10 = vunpack.c.l.bf16 %v1091_v5  ;;  %v813_v11 = vunpack.c.h.bf16 %v1091_v5  ;;  %v816_v14 = vunpack.c.l.bf16 %v1092_v6  ;;  %v817_v15 = vunpack.c.h.bf16 %v1092_v6  ;;  %v1095_v38 = vld [vmem:[%s1502_s0 + $0x30] sm:$0xff]   ;;  %v1096_v43 = vld [vmem:[%s1502_s0 + $0x38] sm:$0xff]  }
   0x4   :  { %v149_v12 = vmul.f32 %v804_v2, %v1178_v1  ;;  %v150_v13 = vmul.f32 %v805_v3, %v1178_v1  ;;  %v151_v16 = vmul.f32 %v808_v8, %v1178_v1  ;;  %v152_v17 = vmul.f32 %v809_v9, %v1178_v1  ;;  %v1093_v28 = vld [vmem:[%s1502_s0 + $0x20] sm:$0xff]  }
   0x5   :  { %v153_v18 = vmul.f32 %v812_v10, %v1178_v1  ;;  %v154_v19 = vmul.f32 %v813_v11, %v1178_v1  ;;  %v155_v22 = vmul.f32 %v816_v14, %v1178_v1  ;;  %v156_v23 = vmul.f32 %v817_v15, %v1178_v1  ;;  %v1097_v0 = vld [vmem:[%s1502_s0 + $0x40] sm:$0xff]   ;;  %v1098_v11 = vld [vmem:[%s1502_s0 + $0x48] sm:$0xff]  }
   0x6   :  { %v220_v20 = vadd.f32 %v1192_v7, %v149_v12  ;;  %v221_v21 = vadd.f32 %v1192_v7, %v150_v13  ;;  %v222_v24 = vadd.f32 %v1192_v7, %v151_v16  ;;  %v223_v25 = vadd.f32 %v1192_v7, %v152_v17  ;;  %v1099_v16 = vld [vmem:[%s1502_s0 + $0x50] sm:$0xff]  }
   0x7   :  { %v224_v26 = vadd.f32 %v1192_v7, %v153_v18  ;;  %v225_v27 = vadd.f32 %v1192_v7, %v154_v19  ;;  %v226_v31 = vadd.f32 %v1192_v7, %v155_v22  ;;  %v227_v32 = vadd.f32 %v1192_v7, %v156_v23 }
   0x8   :  { %v284_v29 = vmax.f32 %v220_v20, 0.0  ;;  %v285_v30 = vmax.f32 %v221_v21, 0.0  ;;  %v286_v34 = vmax.f32 %v222_v24, 0.0  ;;  %v287_v35 = vmax.f32 %v223_v25, 0.0  ;;  %v1100_v25 = vld [vmem:[%s1502_s0 + $0x58] sm:$0xff]  }
   0x9   :  { %v288_v36 = vmax.f32 %v224_v26, 0.0  ;;  %v289_v37 = vmax.f32 %v225_v27, 0.0  ;;  %v290_v40 = vmax.f32 %v226_v31, 0.0  ;;  %v291_v41 = vmax.f32 %v227_v32, 0.0 }
   0xa   :  { %v933_v39 = vpack.c.bf16 %v285_v30, %v284_v29  ;;  %v820_v42 = vunpack.c.l.bf16 %v1093_v28  ;;  %v938_v44 = vpack.c.bf16 %v287_v35, %v286_v34  ;;  %v821_v46 = vunpack.c.h.bf16 %v1093_v28 }
   0xb   :  { %v943_v45 = vpack.c.bf16 %v289_v37, %v288_v36  ;;  %v824_v47 = vunpack.c.l.bf16 %v1094_v33  ;;  %v948_v48 = vpack.c.bf16 %v291_v41, %v290_v40  ;;  %v825_v50 = vunpack.c.h.bf16 %v1094_v33 }
   0xc   :  { %934 = vst [vmem:[%s1505_s3] sm:$0xff] %v933_v39   ;;  %v157_v49 = vmul.f32 %v820_v42, %v1178_v1  ;;  %v828_v51 = vunpack.c.l.bf16 %v1095_v38  ;;  %1121 = vst [vmem:[%s1505_s3 + $0x8] sm:$0xff] %v938_v44   ;;  %v158_v52 = vmul.f32 %v821_v46, %v1178_v1  ;;  %v829_v54 = vunpack.c.h.bf16 %v1095_v38  ;;  %v1101_v38 = vld [vmem:[%s1502_s0 + $0x60] sm:$0xff]  }
   0xd   :  { %1122 = vst [vmem:[%s1505_s3 + $0x10] sm:$0xff] %v943_v45   ;;  %v159_v53 = vmul.f32 %v824_v47, %v1178_v1  ;;  %v832_v55 = vunpack.c.l.bf16 %v1096_v43  ;;  %1123 = vst [vmem:[%s1505_s3 + $0x18] sm:$0xff] %v948_v48   ;;  %v160_v57 = vmul.f32 %v825_v50, %v1178_v1  ;;  %v833_v59 = vunpack.c.h.bf16 %v1096_v43 }
   0xe   :  { %v228_v56 = vadd.f32 %v1192_v7, %v157_v49  ;;  %v161_v58 = vmul.f32 %v828_v51, %v1178_v1  ;;  %v229_v60 = vadd.f32 %v1192_v7, %v158_v52  ;;  %v162_v62 = vmul.f32 %v829_v54, %v1178_v1  ;;  %v1102_v51 = vld [vmem:[%s1502_s0 + $0x68] sm:$0xff]  }
   0xf   :  { %v230_v61 = vadd.f32 %v1192_v7, %v159_v53  ;;  %v163_v63 = vmul.f32 %v832_v55, %v1178_v1  ;;  %v231_v3 = vadd.f32 %v1192_v7, %v160_v57  ;;  %v164_v5 = vmul.f32 %v833_v59, %v1178_v1 }
  0x10   :  { %v292_v2 = vmax.f32 %v228_v56, 0.0  ;;  %v232_v4 = vadd.f32 %v1192_v7, %v161_v58  ;;  %v293_v6 = vmax.f32 %v229_v60, 0.0  ;;  %v233_v9 = vadd.f32 %v1192_v7, %v162_v62  ;;  %v1103_v60 = vld [vmem:[%s1502_s0 + $0x70] sm:$0xff]  }
  0x11   :  { %v294_v8 = vmax.f32 %v230_v61, 0.0  ;;  %v234_v10 = vadd.f32 %v1192_v7, %v163_v63  ;;  %v295_v12 = vmax.f32 %v231_v3, 0.0  ;;  %v235_v14 = vadd.f32 %v1192_v7, %v164_v5 }
  0x12   :  { %v296_v13 = vmax.f32 %v232_v4, 0.0  ;;  %v836_v15 = vunpack.c.l.bf16 %v1097_v0  ;;  %v953_v17 = vpack.c.bf16 %v293_v6, %v292_v2  ;;  %v297_v18 = vmax.f32 %v233_v9, 0.0  ;;  %v1104_v2 = vld [vmem:[%s1502_s0 + $0x78] sm:$0xff]  }
  0x13   :  { %v298_v19 = vmax.f32 %v234_v10, 0.0  ;;  %v837_v20 = vunpack.c.h.bf16 %v1097_v0  ;;  %v958_v21 = vpack.c.bf16 %v295_v12, %v294_v8  ;;  %v299_v22 = vmax.f32 %v235_v14, 0.0  ;;  %v1105_v12 = vld [vmem:[%s1502_s0 + $0x80] sm:$0xff]  }
  0x14   :  { %v165_v23 = vmul.f32 %v836_v15, %v1178_v1  ;;  %v840_v24 = vunpack.c.l.bf16 %v1098_v11  ;;  %1124 = vst [vmem:[%s1505_s3 + $0x20] sm:$0xff] %v953_v17   ;;  %v963_v26 = vpack.c.bf16 %v297_v18, %v296_v13  ;;  %v841_v28 = vunpack.c.h.bf16 %v1098_v11 }
  0x15   :  { %v166_v27 = vmul.f32 %v837_v20, %v1178_v1  ;;  %v844_v29 = vunpack.c.l.bf16 %v1099_v16  ;;  %1125 = vst [vmem:[%s1505_s3 + $0x28] sm:$0xff] %v958_v21   ;;  %v968_v30 = vpack.c.bf16 %v299_v22, %v298_v19  ;;  %v845_v33 = vunpack.c.h.bf16 %v1099_v16 }
  0x16   :  { %v236_v31 = vadd.f32 %v1192_v7, %v165_v23  ;;  %v167_v32 = vmul.f32 %v840_v24, %v1178_v1  ;;  %1126 = vst [vmem:[%s1505_s3 + $0x30] sm:$0xff] %v963_v26   ;;  %v168_v35 = vmul.f32 %v841_v28, %v1178_v1  ;;  %v848_v37 = vunpack.c.l.bf16 %v1100_v25 }
  0x17   :  { %v237_v34 = vadd.f32 %v1192_v7, %v166_v27  ;;  %v169_v36 = vmul.f32 %v844_v29, %v1178_v1  ;;  %1127 = vst [vmem:[%s1505_s3 + $0x38] sm:$0xff] %v968_v30   ;;  %v170_v41 = vmul.f32 %v845_v33, %v1178_v1  ;;  %v849_v42 = vunpack.c.h.bf16 %v1100_v25  ;;  %v1106_v29 = vld [vmem:[%s1502_s0 + $0x88] sm:$0xff]  }
  0x18   :  { %v300_v39 = vmax.f32 %v236_v31, 0.0  ;;  %v238_v40 = vadd.f32 %v1192_v7, %v167_v32  ;;  %v239_v44 = vadd.f32 %v1192_v7, %v168_v35  ;;  %v171_v46 = vmul.f32 %v848_v37, %v1178_v1 }
  0x19   :  { %v301_v43 = vmax.f32 %v237_v34, 0.0  ;;  %v240_v45 = vadd.f32 %v1192_v7, %v169_v36  ;;  %v241_v48 = vadd.f32 %v1192_v7, %v170_v41  ;;  %v172_v49 = vmul.f32 %v849_v42, %v1178_v1  ;;  %v1107_v34 = vld [vmem:[%s1502_s0 + $0x90] sm:$0xff]  }
  0x1a   :  { %v302_v47 = vmax.f32 %v238_v40, 0.0  ;;  %v852_v50 = vunpack.c.l.bf16 %v1101_v38  ;;  %v303_v53 = vmax.f32 %v239_v44, 0.0  ;;  %v242_v55 = vadd.f32 %v1192_v7, %v171_v46 }
  0x1b   :  { %v973_v52 = vpack.c.bf16 %v301_v43, %v300_v39  ;;  %v304_v54 = vmax.f32 %v240_v45, 0.0  ;;  %v305_v56 = vmax.f32 %v241_v48, 0.0  ;;  %v243_v57 = vadd.f32 %v1192_v7, %v172_v49  ;;  %v1108_v43 = vld [vmem:[%s1502_s0 + $0x98] sm:$0xff]  }
  0x1c   :  { %v853_v58 = vunpack.c.h.bf16 %v1101_v38  ;;  %v173_v59 = vmul.f32 %v852_v50, %v1178_v1  ;;  %v978_v61 = vpack.c.bf16 %v303_v53, %v302_v47  ;;  %v306_v62 = vmax.f32 %v242_v55, 0.0 }
  0x1d   :  { %1128 = vst [vmem:[%s1505_s3 + $0x40] sm:$0xff] %v973_v52   ;;  %v856_v63 = vunpack.c.l.bf16 %v1102_v51  ;;  %v857_v0 = vunpack.c.h.bf16 %v1102_v51  ;;  %v983_v3 = vpack.c.bf16 %v305_v56, %v304_v54  ;;  %v307_v4 = vmax.f32 %v243_v57, 0.0  ;;  %v1109_v56 = vld [vmem:[%s1502_s0 + $0xa0] sm:$0xff]  }
  0x1e   :  { %v174_v5 = vmul.f32 %v853_v58, %v1178_v1  ;;  %v244_v6 = vadd.f32 %v1192_v7, %v173_v59  ;;  %1129 = vst [vmem:[%s1505_s3 + $0x48] sm:$0xff] %v978_v61   ;;  %v860_v10 = vunpack.c.l.bf16 %v1103_v60  ;;  %v861_v11 = vunpack.c.h.bf16 %v1103_v60 }
  0x1f   :  { %v175_v8 = vmul.f32 %v856_v63, %v1178_v1  ;;  %v176_v9 = vmul.f32 %v857_v0, %v1178_v1  ;;  %1130 = vst [vmem:[%s1505_s3 + $0x50] sm:$0xff] %v983_v3   ;;  %v988_v13 = vpack.c.bf16 %v307_v4, %v306_v62  ;;  %v864_v16 = vunpack.c.l.bf16 %v1104_v2 }
  0x20   :  { %v245_v14 = vadd.f32 %v1192_v7, %v174_v5  ;;  %v308_v15 = vmax.f32 %v244_v6, 0.0  ;;  %v177_v19 = vmul.f32 %v860_v10, %v1178_v1  ;;  %v178_v20 = vmul.f32 %v861_v11, %v1178_v1 }
  0x21   :  { %v246_v17 = vadd.f32 %v1192_v7, %v175_v8  ;;  %v247_v18 = vadd.f32 %v1192_v7, %v176_v9  ;;  %1131 = vst [vmem:[%s1505_s3 + $0x58] sm:$0xff] %v988_v13   ;;  %v865_v22 = vunpack.c.h.bf16 %v1104_v2  ;;  %v179_v23 = vmul.f32 %v864_v16, %v1178_v1  ;;  %v1110_v2 = vld [vmem:[%s1502_s0 + $0xa8] sm:$0xff]   ;;  %v1111_v16 = vld [vmem:[%s1502_s0 + $0xb0] sm:$0xff]  }
  0x22   :  { %v309_v21 = vmax.f32 %v245_v14, 0.0  ;;  %v868_v24 = vunpack.c.l.bf16 %v1105_v12  ;;  %v248_v27 = vadd.f32 %v1192_v7, %v177_v19  ;;  %v249_v28 = vadd.f32 %v1192_v7, %v178_v20 }
  0x23   :  { %v310_v25 = vmax.f32 %v246_v17, 0.0  ;;  %v311_v26 = vmax.f32 %v247_v18, 0.0  ;;  %v180_v31 = vmul.f32 %v865_v22, %v1178_v1  ;;  %v250_v32 = vadd.f32 %v1192_v7, %v179_v23 }
  0x24   :  { %v993_v30 = vpack.c.bf16 %v309_v21, %v308_v15  ;;  %v869_v33 = vunpack.c.h.bf16 %v1105_v12  ;;  %v312_v36 = vmax.f32 %v248_v27, 0.0  ;;  %v313_v37 = vmax.f32 %v249_v28, 0.0  ;;  %v1112_v21 = vld [vmem:[%s1502_s0 + $0xb8] sm:$0xff]  }
  0x25   :  { %v998_v35 = vpack.c.bf16 %v311_v26, %v310_v25  ;;  %v181_v38 = vmul.f32 %v868_v24, %v1178_v1  ;;  %v251_v39 = vadd.f32 %v1192_v7, %v180_v31  ;;  %v314_v40 = vmax.f32 %v250_v32, 0.0 }
  0x26   :  { %1132 = vst [vmem:[%s1505_s3 + $0x60] sm:$0xff] %v993_v30   ;;  %v182_v41 = vmul.f32 %v869_v33, %v1178_v1  ;;  %v872_v42 = vunpack.c.l.bf16 %v1106_v29  ;;  %v1003_v44 = vpack.c.bf16 %v313_v37, %v312_v36  ;;  %v873_v46 = vunpack.c.h.bf16 %v1106_v29 }
  0x27   :  { %1133 = vst [vmem:[%s1505_s3 + $0x68] sm:$0xff] %v998_v35   ;;  %v252_v45 = vadd.f32 %v1192_v7, %v181_v38  ;;  %v876_v47 = vunpack.c.l.bf16 %v1107_v34  ;;  %v315_v48 = vmax.f32 %v251_v39, 0.0  ;;  %v877_v51 = vunpack.c.h.bf16 %v1107_v34  ;;  %v1113_v34 = vld [vmem:[%s1502_s0 + $0xc0] sm:$0xff]  }
  0x28   :  { %v253_v49 = vadd.f32 %v1192_v7, %v182_v41  ;;  %v183_v50 = vmul.f32 %v872_v42, %v1178_v1  ;;  %1134 = vst [vmem:[%s1505_s3 + $0x70] sm:$0xff] %v1003_v44   ;;  %v184_v53 = vmul.f32 %v873_v46, %v1178_v1  ;;  %v880_v55 = vunpack.c.l.bf16 %v1108_v43 }
  0x29   :  { %v316_v52 = vmax.f32 %v252_v45, 0.0  ;;  %v185_v54 = vmul.f32 %v876_v47, %v1178_v1  ;;  %v1008_v57 = vpack.c.bf16 %v315_v48, %v314_v40  ;;  %v186_v60 = vmul.f32 %v877_v51, %v1178_v1  ;;  %v1114_v47 = vld [vmem:[%s1502_s0 + $0xc8] sm:$0xff]  }
  0x2a   :  { %v317_v58 = vmax.f32 %v253_v49, 0.0  ;;  %v254_v59 = vadd.f32 %v1192_v7, %v183_v50  ;;  %v255_v61 = vadd.f32 %v1192_v7, %v184_v53  ;;  %v881_v63 = vunpack.c.h.bf16 %v1108_v43 }
  0x2b   :  { %v256_v62 = vadd.f32 %v1192_v7, %v185_v54  ;;  %v187_v0 = vmul.f32 %v880_v55, %v1178_v1  ;;  %1135 = vst [vmem:[%s1505_s3 + $0x78] sm:$0xff] %v1008_v57   ;;  %v257_v5 = vadd.f32 %v1192_v7, %v186_v60  ;;  %v884_v6 = vunpack.c.l.bf16 %v1109_v56 }
  0x2c   :  { %v1013_v3 = vpack.c.bf16 %v317_v58, %v316_v52  ;;  %v318_v4 = vmax.f32 %v254_v59, 0.0  ;;  %v319_v8 = vmax.f32 %v255_v61, 0.0  ;;  %v188_v10 = vmul.f32 %v881_v63, %v1178_v1  ;;  %v1115_v52 = vld [vmem:[%s1502_s0 + $0xd0] sm:$0xff]   ;;  %v1116_v61 = vld [vmem:[%s1502_s0 + $0xd8] sm:$0xff]  }
  0x2d   :  { %v320_v9 = vmax.f32 %v256_v62, 0.0  ;;  %v258_v11 = vadd.f32 %v1192_v7, %v187_v0  ;;  %v321_v12 = vmax.f32 %v257_v5, 0.0  ;;  %v885_v13 = vunpack.c.h.bf16 %v1109_v56 }
  0x2e   :  { %1136 = vst [vmem:[%s1505_s3 + $0x80] sm:$0xff] %v1013_v3   ;;  %v189_v14 = vmul.f32 %v884_v6, %v1178_v1  ;;  %v888_v15 = vunpack.c.l.bf16 %v1110_v2  ;;  %v1018_v17 = vpack.c.bf16 %v319_v8, %v318_v4  ;;  %v259_v18 = vadd.f32 %v1192_v7, %v188_v10 }
  0x2f   :  { %v322_v19 = vmax.f32 %v258_v11, 0.0  ;;  %v889_v20 = vunpack.c.h.bf16 %v1110_v2  ;;  %v1023_v22 = vpack.c.bf16 %v321_v12, %v320_v9  ;;  %v190_v23 = vmul.f32 %v885_v13, %v1178_v1  ;;  %v1117_v12 = vld [vmem:[%s1502_s0 + $0xe0] sm:$0xff]  }
  0x30   :  { %v260_v24 = vadd.f32 %v1192_v7, %v189_v14  ;;  %v191_v25 = vmul.f32 %v888_v15, %v1178_v1  ;;  %1137 = vst [vmem:[%s1505_s3 + $0x88] sm:$0xff] %v1018_v17   ;;  %v323_v26 = vmax.f32 %v259_v18, 0.0  ;;  %v892_v28 = vunpack.c.l.bf16 %v1111_v16 }
  0x31   :  { %v192_v27 = vmul.f32 %v889_v20, %v1178_v1  ;;  %v893_v29 = vunpack.c.h.bf16 %v1111_v16  ;;  %1138 = vst [vmem:[%s1505_s3 + $0x90] sm:$0xff] %v1023_v22   ;;  %v261_v30 = vadd.f32 %v1192_v7, %v190_v23  ;;  %v896_v33 = vunpack.c.l.bf16 %v1112_v21 }
  0x32   :  { %v324_v31 = vmax.f32 %v260_v24, 0.0  ;;  %v262_v32 = vadd.f32 %v1192_v7, %v191_v25  ;;  %v1028_v35 = vpack.c.bf16 %v323_v26, %v322_v19  ;;  %v193_v37 = vmul.f32 %v892_v28, %v1178_v1 }
  0x33   :  { %v263_v36 = vadd.f32 %v1192_v7, %v192_v27  ;;  %v194_v38 = vmul.f32 %v893_v29, %v1178_v1  ;;  %v325_v39 = vmax.f32 %v261_v30, 0.0  ;;  %v897_v41 = vunpack.c.h.bf16 %v1112_v21  ;;  %v1118_v21 = vld [vmem:[%s1502_s0 + $0xe8] sm:$0xff]  }
  0x34   :  { %v326_v40 = vmax.f32 %v262_v32, 0.0  ;;  %v195_v42 = vmul.f32 %v896_v33, %v1178_v1  ;;  %1139 = vst [vmem:[%s1505_s3 + $0x98] sm:$0xff] %v1028_v35   ;;  %v264_v44 = vadd.f32 %v1192_v7, %v193_v37  ;;  %v900_v46 = vunpack.c.l.bf16 %v1113_v34 }
  0x35   :  { %v327_v43 = vmax.f32 %v263_v36, 0.0  ;;  %v265_v45 = vadd.f32 %v1192_v7, %v194_v38  ;;  %v1033_v48 = vpack.c.bf16 %v325_v39, %v324_v31  ;;  %v196_v49 = vmul.f32 %v897_v41, %v1178_v1  ;;  %v1120_v39 = vld [vmem:[%s1502_s0 + $0xf8] sm:$0xff]  }
  0x36   :  { %v266_v50 = vadd.f32 %v1192_v7, %v195_v42  ;;  %v901_v51 = vunpack.c.h.bf16 %v1113_v34  ;;  %v328_v54 = vmax.f32 %v264_v44, 0.0  ;;  %v197_v56 = vmul.f32 %v900_v46, %v1178_v1  ;;  %v1119_v34 = vld [vmem:[%s1502_s0 + $0xf0] sm:$0xff]  }
  0x37   :  { %v1038_v53 = vpack.c.bf16 %v327_v43, %v326_v40  ;;  %v329_v55 = vmax.f32 %v265_v45, 0.0  ;;  %1140 = vst [vmem:[%s1505_s3 + $0xa0] sm:$0xff] %v1033_v48   ;;  %v267_v57 = vadd.f32 %v1192_v7, %v196_v49  ;;  %v904_v60 = vunpack.c.l.bf16 %v1114_v47 }
  0x38   :  { %v330_v58 = vmax.f32 %v266_v50, 0.0  ;;  %v198_v59 = vmul.f32 %v901_v51, %v1178_v1  ;;  %v268_v63 = vadd.f32 %v1192_v7, %v197_v56  ;;  %v905_v0 = vunpack.c.h.bf16 %v1114_v47 }
  0x39   :  { %1141 = vst [vmem:[%s1505_s3 + $0xa8] sm:$0xff] %v1038_v53   ;;  %v1043_v62 = vpack.c.bf16 %v329_v55, %v328_v54  ;;  %v908_v2 = vunpack.c.l.bf16 %v1115_v52  ;;  %v331_v3 = vmax.f32 %v267_v57, 0.0  ;;  %v199_v5 = vmul.f32 %v904_v60, %v1178_v1 }
  0x3a   :  { %v269_v4 = vadd.f32 %v1192_v7, %v198_v59  ;;  %v909_v6 = vunpack.c.h.bf16 %v1115_v52  ;;  %v332_v8 = vmax.f32 %v268_v63, 0.0  ;;  %v200_v9 = vmul.f32 %v905_v0, %v1178_v1 }
  0x3b   :  { %1142 = vst [vmem:[%s1505_s3 + $0xb0] sm:$0xff] %v1043_v62   ;;  %v201_v10 = vmul.f32 %v908_v2, %v1178_v1  ;;  %v912_v11 = vunpack.c.l.bf16 %v1116_v61  ;;  %v1048_v13 = vpack.c.bf16 %v331_v3, %v330_v58  ;;  %v270_v15 = vadd.f32 %v1192_v7, %v199_v5 }
  0x3c   :  { %v333_v14 = vmax.f32 %v269_v4, 0.0  ;;  %v202_v16 = vmul.f32 %v909_v6, %v1178_v1  ;;  %v271_v17 = vadd.f32 %v1192_v7, %v200_v9  ;;  %v913_v19 = vunpack.c.h.bf16 %v1116_v61 }
  0x3d   :  { %v272_v18 = vadd.f32 %v1192_v7, %v201_v10  ;;  %v203_v20 = vmul.f32 %v912_v11, %v1178_v1  ;;  %1143 = vst [vmem:[%s1505_s3 + $0xb8] sm:$0xff] %v1048_v13   ;;  %v334_v23 = vmax.f32 %v270_v15, 0.0  ;;  %v916_v25 = vunpack.c.l.bf16 %v1117_v12 }
  0x3e   :  { %v1053_v22 = vpack.c.bf16 %v333_v14, %v332_v8  ;;  %v273_v24 = vadd.f32 %v1192_v7, %v202_v16  ;;  %v335_v26 = vmax.f32 %v271_v17, 0.0  ;;  %v204_v28 = vmul.f32 %v913_v19, %v1178_v1 }
  0x3f   :  { %v336_v27 = vmax.f32 %v272_v18, 0.0  ;;  %v274_v29 = vadd.f32 %v1192_v7, %v203_v20  ;;  %v917_v31 = vunpack.c.h.bf16 %v1117_v12  ;;  %v205_v32 = vmul.f32 %v916_v25, %v1178_v1 }
  0x40   :  { %1144 = vst [vmem:[%s1505_s3 + $0xc0] sm:$0xff] %v1053_v22   ;;  %v337_v30 = vmax.f32 %v273_v24, 0.0  ;;  %v920_v33 = vunpack.c.l.bf16 %v1118_v21  ;;  %v1058_v35 = vpack.c.bf16 %v335_v26, %v334_v23  ;;  %v275_v36 = vadd.f32 %v1192_v7, %v204_v28 }
  0x41   :  { %v338_v37 = vmax.f32 %v274_v29, 0.0  ;;  %v921_v38 = vunpack.c.h.bf16 %v1118_v21  ;;  %v206_v41 = vmul.f32 %v917_v31, %v1178_v1  ;;  %v276_v42 = vadd.f32 %v1192_v7, %v205_v32 }
  0x42   :  { %v1063_v40 = vpack.c.bf16 %v337_v30, %v336_v27  ;;  %v207_v43 = vmul.f32 %v920_v33, %v1178_v1  ;;  %1145 = vst [vmem:[%s1505_s3 + $0xc8] sm:$0xff] %v1058_v35   ;;  %v339_v44 = vmax.f32 %v275_v36, 0.0  ;;  %v924_v46 = vunpack.c.l.bf16 %v1119_v34 }
  0x43   :  { %v208_v45 = vmul.f32 %v921_v38, %v1178_v1  ;;  %v925_v47 = vunpack.c.h.bf16 %v1119_v34  ;;  %v277_v48 = vadd.f32 %v1192_v7, %v206_v41  ;;  %v340_v49 = vmax.f32 %v276_v42, 0.0 }
  0x44   :  { %1146 = vst [vmem:[%s1505_s3 + $0xd0] sm:$0xff] %v1063_v40   ;;  %v278_v50 = vadd.f32 %v1192_v7, %v207_v43  ;;  %v928_v51 = vunpack.c.l.bf16 %v1120_v39  ;;  %v1068_v52 = vpack.c.bf16 %v339_v44, %v338_v37  ;;  %v209_v54 = vmul.f32 %v924_v46, %v1178_v1 }
  0x45   :  { %v279_v53 = vadd.f32 %v1192_v7, %v208_v45  ;;  %v210_v55 = vmul.f32 %v925_v47, %v1178_v1  ;;  %v341_v56 = vmax.f32 %v277_v48, 0.0  ;;  %v929_v58 = vunpack.c.h.bf16 %v1120_v39 }
  0x46   :  { %v342_v57 = vmax.f32 %v278_v50, 0.0  ;;  %v211_v59 = vmul.f32 %v928_v51, %v1178_v1  ;;  %1147 = vst [vmem:[%s1505_s3 + $0xd8] sm:$0xff] %v1068_v52   ;;  %v280_v61 = vadd.f32 %v1192_v7, %v209_v54 }
  0x47   :  { %v343_v60 = vmax.f32 %v279_v53, 0.0  ;;  %v281_v62 = vadd.f32 %v1192_v7, %v210_v55  ;;  %v1073_v63 = vpack.c.bf16 %v341_v56, %v340_v49  ;;  %v212_v0 = vmul.f32 %v929_v58, %v1178_v1 }
  0x48   :  { %v282_v2 = vadd.f32 %v1192_v7, %v211_v59  ;;  %v344_v4 = vmax.f32 %v280_v61, 0.0 }
  0x49   :  { %v1078_v3 = vpack.c.bf16 %v343_v60, %v342_v57  ;;  %v345_v5 = vmax.f32 %v281_v62, 0.0  ;;  %1148 = vst [vmem:[%s1505_s3 + $0xe0] sm:$0xff] %v1073_v63   ;;  %v283_v6 = vadd.f32 %v1192_v7, %v212_v0 }
  0x4a   :  { %v346_v8 = vmax.f32 %v282_v2, 0.0 }
  0x4b   :  { %1149 = vst [vmem:[%s1505_s3 + $0xe8] sm:$0xff] %v1078_v3   ;;  %v1083_v9 = vpack.c.bf16 %v345_v5, %v344_v4  ;;  %v347_v10 = vmax.f32 %v283_v6, 0.0 }
  0x4d   :  { %1150 = vst [vmem:[%s1505_s3 + $0xf0] sm:$0xff] %v1083_v9   ;;  %v1088_v1 = vpack.c.bf16 %v347_v10, %v346_v8 }
  0x4f   :  { %1151 = vst [vmem:[%s1505_s3 + $0xf8] sm:$0xff] %v1088_v1  }

// kernel: bottleneck_forward.8
= control target key start
LH: loop header
LB: loop body
LE: loop exit
PB: predicated region body
PF: predicated region fallthrough
CT: control target
= control target key end

     0   :  { %v765_v16 = vmov 0.0   ;;  %s881_s1 = inlined_call_operand.vmem [shape: bf16[128,128], index: 1, kind: input, shape index: {}]   ;;  %s882_s0 = inlined_call_operand.vmem [shape: bf16[128,128], index: 0, kind: input, shape index: {}]   ;;  %s883_s3 = inlined_call_operand.vmem [shape: f32[1,128], index: 3, kind: output, shape index: {1}]   ;;  %s884_s4 = inlined_call_operand.vmem [shape: f32[1,128], index: 4, kind: output, shape index: {2}]   ;;  %s885_s2 = inlined_call_operand.vmem [shape: bf16[128,128], index: 2, kind: output, shape index: {0}]  }
   0x1   :  { %v749_v0 = vld [vmem:[%s881_s1] sm:$0xff]   ;;  %v750_v1 = vld [vmem:[%s881_s1 + $0x8] sm:$0xff]   ;;  %v751_v2 = vld [vmem:[%s881_s1 + $0x10] sm:$0xff]   ;;  %21 = vst [vmem:[%s883_s3] sm:$0x1] %v765_v16 }
   0x2   :  { %700 = vmatprep.subr.bf16.mxu0 %v749_v0  ;;  %732 = vmatprep.subr.bf16.mxu1 %v749_v0  ;;  %v752_v3 = vld [vmem:[%s881_s1 + $0x18] sm:$0xff]   ;;  %v757_v4 = vld [vmem:[%s882_s0] sm:$0xff]   ;;  %v754_v7 = vld [vmem:[%s881_s1 + $0x28] sm:$0xff]   ;;  %22 = vst [vmem:[%s884_s4] sm:$0x1] %v765_v16 }
   0x3   :  { %701 = vmatpush3.bf16.msra.mxu0 %v749_v0  ;;  %740 = vmatpush3.bf16.msra.mxu1 %v749_v0  ;;  %v753_v5 = vld [vmem:[%s881_s1 + $0x20] sm:$0xff]   ;;  %v755_v8 = vld [vmem:[%s881_s1 + $0x30] sm:$0xff]   ;;  %v756_v9 = vld [vmem:[%s881_s1 + $0x38] sm:$0xff]  }
   0x4   :  { %702 = vmatprep.subr.bf16.mxu0 %v750_v1  ;;  %733 = vmatprep.subr.bf16.mxu1 %v750_v1  ;;  %v761_v6 = vld [vmem:[%s882_s0 + $0x20] sm:$0xff]   ;;  %v758_v10 = vld [vmem:[%s882_s0 + $0x8] sm:$0xff]   ;;  %v759_v12 = vld [vmem:[%s882_s0 + $0x10] sm:$0xff]  }
   0x5   :  { %716 = vmatprep.mubr.bf16.mxu0 %v757_v4  ;;  %724 = vmatprep.mubr.bf16.mxu1 %v761_v6  ;;  %v762_v11 = vld [vmem:[%s882_s0 + $0x28] sm:$0xff]   ;;  %v763_v13 = vld [vmem:[%s882_s0 + $0x30] sm:$0xff]   ;;  %v760_v14 = vld [vmem:[%s882_s0 + $0x18] sm:$0xff]  }
   0x6   :  { %v764_v15 = vld [vmem:[%s882_s0 + $0x38] sm:$0xff]  }
   0x7   :  { %703 = vmatpush3.bf16.msra.mxu0 %v750_v1  ;;  %741 = vmatpush3.bf16.msra.mxu1 %v750_v1 }
   0x8   :  { %704 = vmatprep.subr.bf16.mxu0 %v751_v2  ;;  %734 = vmatprep.subr.bf16.mxu1 %v751_v2 }
   0xb   :  { %705 = vmatpush3.bf16.msra.mxu0 %v751_v2  ;;  %742 = vmatpush3.bf16.msra.mxu1 %v751_v2 }
   0xc   :  { %706 = vmatprep.subr.bf16.mxu0 %v752_v3  ;;  %735 = vmatprep.subr.bf16.mxu1 %v752_v3 }
   0xf   :  { %707 = vmatpush3.bf16.msra.mxu0 %v752_v3  ;;  %743 = vmatpush3.bf16.msra.mxu1 %v752_v3 }
  0x10   :  { %708 = vmatprep.subr.bf16.mxu0 %v753_v5  ;;  %736 = vmatprep.subr.bf16.mxu1 %v753_v5 }
  0x13   :  { %709 = vmatpush3.bf16.msra.mxu0 %v753_v5  ;;  %744 = vmatpush3.bf16.msra.mxu1 %v753_v5 }
  0x14   :  { %710 = vmatprep.subr.bf16.mxu0 %v754_v7  ;;  %737 = vmatprep.subr.bf16.mxu1 %v754_v7 }
  0x17   :  { %711 = vmatpush3.bf16.msra.mxu0 %v754_v7  ;;  %745 = vmatpush3.bf16.msra.mxu1 %v754_v7 }
  0x18   :  { %712 = vmatprep.subr.bf16.mxu0 %v755_v8  ;;  %738 = vmatprep.subr.bf16.mxu1 %v755_v8 }
  0x1b   :  { %713 = vmatpush3.bf16.msra.mxu0 %v755_v8  ;;  %746 = vmatpush3.bf16.msra.mxu1 %v755_v8 }
  0x1c   :  { %714 = vmatprep.subr.bf16.mxu0 %v756_v9  ;;  %739 = vmatprep.subr.bf16.mxu1 %v756_v9 }
  0x1f   :  { %715 = vmatpush3.bf16.msra.mxu0 %v756_v9  ;;  %747 = vmatpush3.bf16.msra.mxu1 %v756_v9 }
  0x22   :  { %717 = vmatmul.mubr.bf16.vlgmr.msra.gmra.mrb[0].mxu0 %v758_v10  ;;  %725 = vmatmul.mubr.bf16.vlgmr.msra.gmra.mrb[0].mxu1 %v762_v11 }
  0x23   :  { %720 = vmatprep.mubr.bf16.mxu0 %v759_v12  ;;  %728 = vmatprep.mubr.bf16.mxu1 %v763_v13 }
  0x2a   :  { %721 = vmatmul.mubr.bf16.gmra.mrb[4].mxu0 %v760_v14  ;;  %729 = vmatmul.mubr.bf16.gmra.mrb[4].mxu1 %v764_v15 }
  0xf5   :  { %v718_v17 = vpop.f32.mrb[0].mxu0  ;;  %v726_v18 = vpop.f32.mrb[0].mxu1 }
  0xf6   :  { %v220_v19 = vpop.f32.mrb[1].mxu0  ;;  %v252_v20 = vpop.f32.mrb[1].mxu1  ;;  %v540_v32 = vmul.f32 %v718_v17, %v718_v17  ;;  %v548_v4 = vmul.f32 %v726_v18, %v726_v18 }
  0xf7   :  { %v719_v21 = vpop.f32.mrb[2].mxu0  ;;  %v727_v22 = vpop.f32.mrb[2].mxu1  ;;  %v538_v23 = vmul.f32 %v220_v19, %v220_v19  ;;  %v546_v62 = vmul.f32 %v252_v20, %v252_v20 }
  0xf8   :  { %v645_v24 = vpack.c.bf16 %v719_v21, %v718_v17  ;;  %v223_v25 = vpop.f32.mrb[3].mxu0  ;;  %v665_v26 = vpack.c.bf16 %v727_v22, %v726_v18  ;;  %v255_v27 = vpop.f32.mrb[3].mxu1  ;;  %v541_v35 = vmul.f32 %v719_v21, %v719_v21  ;;  %v549_v7 = vmul.f32 %v727_v22, %v727_v22 }
  0xf9   :  { %v640_v28 = vpack.c.bf16 %v223_v25, %v220_v19  ;;  %v514_v29 = vadd.f32 %v223_v25, %v220_v19  ;;  %v539_v30 = vmul.f32 %v223_v25, %v223_v25  ;;  %v660_v31 = vpack.c.bf16 %v255_v27, %v252_v20 }
  0xfa   :  { %677 = vst [vmem:[%s885_s2 + $0x8] sm:$0xff] %v645_v24   ;;  %681 = vst [vmem:[%s885_s2 + $0x28] sm:$0xff] %v665_v26   ;;  %v547_v3 = vmul.f32 %v255_v27, %v255_v27 }
  0xfb   :  { %641 = vst [vmem:[%s885_s2] sm:$0xff] %v640_v28   ;;  %v515_v33 = vadd.f32 %v718_v17, %v514_v29  ;;  %v554_v34 = vadd.f32 %v539_v30, %v538_v23  ;;  %680 = vst [vmem:[%s885_s2 + $0x20] sm:$0xff] %v660_v31  }
  0xfd   :  { %v555_v36 = vadd.f32 %v554_v34, %v540_v32  ;;  %v722_v37 = vpop.f32.mrb[4].mxu0  ;;  %v516_v38 = vadd.f32 %v719_v21, %v515_v33  ;;  %v730_v39 = vpop.f32.mrb[4].mxu1  ;;  %v513_v32 = vld [vmem:[%s883_s3] sm:$0x1] }
  0xfe   :  { %v236_v40 = vpop.f32.mrb[5].mxu0  ;;  %v268_v41 = vpop.f32.mrb[5].mxu1  ;;  %v544_v56 = vmul.f32 %v722_v37, %v722_v37  ;;  %v552_v16 = vmul.f32 %v730_v39, %v730_v39 }
  0xff   :  { %v517_v42 = vadd.f32 %v516_v38, %v236_v40  ;;  %v542_v43 = vmul.f32 %v236_v40, %v236_v40  ;;  %v556_v44 = vadd.f32 %v555_v36, %v541_v35  ;;  %v723_v45 = vpop.f32.mrb[6].mxu0  ;;  %v731_v46 = vpop.f32.mrb[6].mxu1  ;;  %v550_v10 = vmul.f32 %v268_v41, %v268_v41  ;;  %v537_v35 = vld [vmem:[%s884_s4] sm:$0x1] }
 0x100   :  { %v655_v47 = vpack.c.bf16 %v723_v45, %v722_v37  ;;  %v239_v48 = vpop.f32.mrb[7].mxu0  ;;  %v675_v49 = vpack.c.bf16 %v731_v46, %v730_v39  ;;  %v271_v50 = vpop.f32.mrb[7].mxu1  ;;  %v545_v59 = vmul.f32 %v723_v45, %v723_v45 }
 0x101   :  { %v557_v51 = vadd.f32 %v556_v44, %v542_v43  ;;  %v650_v52 = vpack.c.bf16 %v239_v48, %v236_v40  ;;  %v518_v53 = vadd.f32 %v517_v42, %v239_v48  ;;  %v543_v54 = vmul.f32 %v239_v48, %v239_v48 }
 0x102   :  { %679 = vst [vmem:[%s885_s2 + $0x18] sm:$0xff] %v655_v47   ;;  %683 = vst [vmem:[%s885_s2 + $0x38] sm:$0xff] %v675_v49   ;;  %v670_v55 = vpack.c.bf16 %v271_v50, %v268_v41  ;;  %v551_v15 = vmul.f32 %v271_v50, %v271_v50 }
 0x103   :  { %678 = vst [vmem:[%s885_s2 + $0x10] sm:$0xff] %v650_v52   ;;  %v519_v57 = vadd.f32 %v722_v37, %v518_v53  ;;  %v558_v58 = vadd.f32 %v557_v51, %v543_v54 }
 0x104   :  { %682 = vst [vmem:[%s885_s2 + $0x30] sm:$0xff] %v670_v55  }
 0x105   :  { %v559_v60 = vadd.f32 %v558_v58, %v544_v56  ;;  %v520_v61 = vadd.f32 %v723_v45, %v519_v57 }
 0x107   :  { %v521_v63 = vadd.f32 %v520_v61, %v252_v20  ;;  %v560_v0 = vadd.f32 %v559_v60, %v545_v59  ;;  %v553_v20 = vmul.f32 %v731_v46, %v731_v46 }
 0x109   :  { %v561_v1 = vadd.f32 %v560_v0, %v546_v62  ;;  %v522_v2 = vadd.f32 %v521_v63, %v255_v27 }
 0x10b   :  { %v523_v5 = vadd.f32 %v726_v18, %v522_v2  ;;  %v562_v6 = vadd.f32 %v561_v1, %v547_v3 }
 0x10d   :  { %v563_v8 = vadd.f32 %v562_v6, %v548_v4  ;;  %v524_v9 = vadd.f32 %v727_v22, %v523_v5 }
 0x10f   :  { %v525_v11 = vadd.f32 %v524_v9, %v268_v41  ;;  %v564_v12 = vadd.f32 %v563_v8, %v549_v7 }
 0x111   :  { %v565_v13 = vadd.f32 %v564_v12, %v550_v10  ;;  %v526_v14 = vadd.f32 %v525_v11, %v271_v50 }
 0x113   :  { %v527_v17 = vadd.f32 %v730_v39, %v526_v14  ;;  %v566_v19 = vadd.f32 %v565_v13, %v551_v15 }
 0x115   :  { %v528_v21 = vadd.f32 %v731_v46, %v527_v17  ;;  %v567_v23 = vadd.f32 %v566_v19, %v552_v16 }
 0x117   :  { %v529_v24 = vrot.slane %v528_v21, 4  ;;  %v568_v25 = vadd.f32 %v567_v23, %v553_v20 }
 0x119   :  { %v530_v26 = vadd.f32 %v529_v24, %v528_v21  ;;  %v569_v18 = vrot.slane %v568_v25, 4 }
 0x11b   :  { %v531_v27 = vrot.slane %v530_v26, 2  ;;  %v570_v28 = vadd.f32 %v569_v18, %v568_v25 }
 0x11d   :  { %v532_v29 = vadd.f32 %v531_v27, %v530_v26  ;;  %v571_v22 = vrot.slane %v570_v28, 2 }
 0x11f   :  { %v533_v30 = vrot.slane %v532_v29, 1  ;;  %v572_v31 = vadd.f32 %v571_v22, %v570_v28 }
 0x121   :  { %v534_v33 = vadd.f32 %v533_v30, %v532_v29  ;;  %v573_v34 = vrot.slane %v572_v31, 1 }
 0x123   :  { %v535_v36 = vadd.f32 %v534_v33, %v513_v32  ;;  %v574_v37 = vadd.f32 %v573_v34, %v572_v31 }
 0x125   :  { %536 = vst [vmem:[%s883_s3] sm:$0x1] %v535_v36  ;;  %v575_v38 = vadd.f32 %v574_v37, %v537_v35 }
 0x127   :  { %576 = vst [vmem:[%s884_s4] sm:$0x1] %v575_v38 }

// kernel: bottleneck_forward.9
= control target key start
LH: loop header
LB: loop body
LE: loop exit
PB: predicated region body
PF: predicated region fallthrough
CT: control target
= control target key end

     0   :  { %s883_s3 = inlined_call_operand.vmem [shape: bf16[128,128], index: 3, kind: input, shape index: {}]   ;;  %s884_s0 = inlined_call_operand.vmem [shape: f32[1,128], index: 0, kind: input, shape index: {}]   ;;  %s885_s2 = inlined_call_operand.vmem [shape: bf16[128,128], index: 2, kind: input, shape index: {}]   ;;  %s886_s1 = inlined_call_operand.vmem [shape: f32[1,128], index: 1, kind: input, shape index: {}]   ;;  %s887_s5 = inlined_call_operand.vmem [shape: f32[1,128], index: 5, kind: output, shape index: {1}]   ;;  %s888_s6 = inlined_call_operand.vmem [shape: f32[1,128], index: 6, kind: output, shape index: {2}]   ;;  %s889_s4 = inlined_call_operand.vmem [shape: f32[128,128], index: 4, kind: output, shape index: {0}]  }
   0x1   :  { %v683_v0 = vld [vmem:[%s883_s3] sm:$0xff]   ;;  %v684_v1 = vld [vmem:[%s883_s3 + $0x8] sm:$0xff]   ;;  %v685_v2 = vld [vmem:[%s883_s3 + $0x10] sm:$0xff]  }
   0x2   :  { %634 = vmatprep.subr.bf16.mxu0 %v683_v0  ;;  %666 = vmatprep.subr.bf16.mxu1 %v683_v0  ;;  %v686_v3 = vld [vmem:[%s883_s3 + $0x18] sm:$0xff]   ;;  %v580_v4 = vld [vmem:[%s885_s2] sm:$0xff]   ;;  %v611_v8 = vld [vmem:[%s885_s2 + $0x8] sm:$0xff]  }
   0x3   :  { %635 = vmatpush3.bf16.msra.mxu0 %v683_v0  ;;  %674 = vmatpush3.bf16.msra.mxu1 %v683_v0  ;;  %v745_v5 = vld [vmem:[%s884_s0] ss:$0 sm:$0xff]  ;;  %v581_v6 = vunpack.c.l.bf16 %v580_v4  ;;  %v582_v7 = vunpack.c.h.bf16 %v580_v4  ;;  %v612_v9 = vld [vmem:[%s885_s2 + $0x10] sm:$0xff]   ;;  %v585_v11 = vunpack.c.l.bf16 %v611_v8  ;;  %v586_v14 = vunpack.c.h.bf16 %v611_v8  ;;  %v613_v22 = vld [vmem:[%s885_s2 + $0x18] sm:$0xff]  }
   0x4   :  { %636 = vmatprep.subr.bf16.mxu0 %v684_v1  ;;  %667 = vmatprep.subr.bf16.mxu1 %v684_v1  ;;  %v756_v10 = vld [vmem:[%s886_s1] ss:$0 sm:$0xff]  ;;  %v589_v17 = vunpack.c.l.bf16 %v612_v9  ;;  %v590_v21 = vunpack.c.h.bf16 %v612_v9  ;;  %v615_v27 = vld [vmem:[%s885_s2 + $0x28] sm:$0xff]   ;;  %v616_v30 = vld [vmem:[%s885_s2 + $0x30] sm:$0xff]   ;;  %v593_v32 = vunpack.c.l.bf16 %v613_v22  ;;  %v594_v33 = vunpack.c.h.bf16 %v613_v22 }
   0x5   :  { %v87_v12 = vmul.f32 %v581_v6, %v745_v5  ;;  %v88_v13 = vmul.f32 %v582_v7, %v745_v5  ;;  %v614_v15 = vld [vmem:[%s885_s2 + $0x20] sm:$0xff]   ;;  %v89_v20 = vmul.f32 %v585_v11, %v745_v5  ;;  %v90_v26 = vmul.f32 %v586_v14, %v745_v5  ;;  %v688_v28 = vld [vmem:[%s883_s3 + $0x28] sm:$0xff]   ;;  %v617_v39 = vld [vmem:[%s885_s2 + $0x38] sm:$0xff]  }
   0x6   :  { %v687_v16 = vld [vmem:[%s883_s3 + $0x20] sm:$0xff]   ;;  %v597_v23 = vunpack.c.l.bf16 %v614_v15  ;;  %v91_v29 = vmul.f32 %v589_v17, %v745_v5  ;;  %v598_v34 = vunpack.c.h.bf16 %v614_v15  ;;  %v92_v36 = vmul.f32 %v590_v21, %v745_v5  ;;  %v689_v44 = vld [vmem:[%s883_s3 + $0x30] sm:$0xff]   ;;  %v690_v61 = vld [vmem:[%s883_s3 + $0x38] sm:$0xff]  }
   0x7   :  { %637 = vmatpush3.bf16.msra.mxu0 %v684_v1  ;;  %675 = vmatpush3.bf16.msra.mxu1 %v684_v1  ;;  %v110_v18 = vadd.f32 %v756_v10, %v87_v12  ;;  %v111_v19 = vadd.f32 %v756_v10, %v88_v13  ;;  %v112_v35 = vadd.f32 %v756_v10, %v89_v20  ;;  %v601_v38 = vunpack.c.l.bf16 %v615_v27 }
   0x8   :  { %638 = vmatprep.subr.bf16.mxu0 %v685_v2  ;;  %668 = vmatprep.subr.bf16.mxu1 %v685_v2  ;;  %v95_v37 = vmul.f32 %v597_v23, %v745_v5  ;;  %v113_v40 = vadd.f32 %v756_v10, %v90_v26  ;;  %v96_v41 = vmul.f32 %v598_v34, %v745_v5  ;;  %v602_v42 = vunpack.c.h.bf16 %v615_v27 }
   0x9   :  { %v126_v24 = vmax.f32 %v110_v18, 0.0  ;;  %v127_v25 = vmax.f32 %v111_v19, 0.0  ;;  %v605_v43 = vunpack.c.l.bf16 %v616_v30  ;;  %v114_v45 = vadd.f32 %v756_v10, %v91_v29 }
   0xa   :  { %v118_v46 = vadd.f32 %v756_v10, %v95_v37  ;;  %v97_v47 = vmul.f32 %v601_v38, %v745_v5  ;;  %v606_v48 = vunpack.c.h.bf16 %v616_v30  ;;  %v119_v49 = vadd.f32 %v756_v10, %v96_v41 }
   0xb   :  { %639 = vmatpush3.bf16.msra.mxu0 %v685_v2  ;;  %676 = vmatpush3.bf16.msra.mxu1 %v685_v2  ;;  %v142_v31 = vpack.c.bf16 %v127_v25, %v126_v24  ;;  %v98_v50 = vmul.f32 %v602_v42, %v745_v5  ;;  %v99_v51 = vmul.f32 %v605_v43, %v745_v5  ;;  %v609_v52 = vunpack.c.l.bf16 %v617_v39 }
   0xc   :  { %640 = vmatprep.subr.bf16.mxu0 %v686_v3  ;;  %669 = vmatprep.subr.bf16.mxu1 %v686_v3  ;;  %v134_v53 = vmax.f32 %v118_v46, 0.0  ;;  %v120_v54 = vadd.f32 %v756_v10, %v97_v47  ;;  %v100_v55 = vmul.f32 %v606_v48, %v745_v5  ;;  %v610_v56 = vunpack.c.h.bf16 %v617_v39 }
   0xd   :  { %650 = vmatprep.mubr.bf16.mxu0 %v142_v31  ;;  %v115_v57 = vadd.f32 %v756_v10, %v92_v36  ;;  %v135_v58 = vmax.f32 %v119_v49, 0.0  ;;  %v121_v59 = vadd.f32 %v756_v10, %v98_v50  ;;  %v122_v60 = vadd.f32 %v756_v10, %v99_v51 }
   0xe   :  { %v93_v62 = vmul.f32 %v593_v32, %v745_v5  ;;  %v123_v63 = vadd.f32 %v756_v10, %v100_v55  ;;  %v128_v0 = vmax.f32 %v112_v35, 0.0  ;;  %v129_v1 = vmax.f32 %v113_v40, 0.0 }
   0xf   :  { %641 = vmatpush3.bf16.msra.mxu0 %v686_v3  ;;  %677 = vmatpush3.bf16.msra.mxu1 %v686_v3  ;;  %v94_v2 = vmul.f32 %v594_v33, %v745_v5  ;;  %v146_v3 = vpack.c.bf16 %v135_v58, %v134_v53  ;;  %v136_v4 = vmax.f32 %v120_v54, 0.0  ;;  %v137_v6 = vmax.f32 %v121_v59, 0.0 }
  0x10   :  { %642 = vmatprep.subr.bf16.mxu0 %v687_v16  ;;  %670 = vmatprep.subr.bf16.mxu1 %v687_v16  ;;  %v101_v7 = vmul.f32 %v609_v52, %v745_v5  ;;  %v102_v8 = vmul.f32 %v610_v56, %v745_v5  ;;  %v130_v9 = vmax.f32 %v114_v45, 0.0  ;;  %v131_v11 = vmax.f32 %v115_v57, 0.0 }
  0x11   :  { %v138_v12 = vmax.f32 %v122_v60, 0.0  ;;  %v139_v13 = vmax.f32 %v123_v63, 0.0  ;;  %v116_v14 = vadd.f32 %v756_v10, %v93_v62  ;;  %v117_v15 = vadd.f32 %v756_v10, %v94_v2  ;;  %658 = vmatprep.mubr.bf16.mxu1 %v146_v3 }
  0x12   :  { %v147_v17 = vpack.c.bf16 %v137_v6, %v136_v4  ;;  %v124_v18 = vadd.f32 %v756_v10, %v101_v7  ;;  %v125_v19 = vadd.f32 %v756_v10, %v102_v8  ;;  %v144_v5 = vpack.c.bf16 %v131_v11, %v130_v9 }
  0x13   :  { %643 = vmatpush3.bf16.msra.mxu0 %v687_v16  ;;  %678 = vmatpush3.bf16.msra.mxu1 %v687_v16  ;;  %v143_v16 = vpack.c.bf16 %v129_v1, %v128_v0  ;;  %v148_v20 = vpack.c.bf16 %v139_v13, %v138_v12  ;;  %v132_v21 = vmax.f32 %v116_v14, 0.0  ;;  %v133_v22 = vmax.f32 %v117_v15, 0.0 }
  0x14   :  { %644 = vmatprep.subr.bf16.mxu0 %v688_v28  ;;  %671 = vmatprep.subr.bf16.mxu1 %v688_v28  ;;  %v140_v23 = vmax.f32 %v124_v18, 0.0  ;;  %v141_v24 = vmax.f32 %v125_v19, 0.0  ;;  %v691_v27 = vmov 0.0  }
  0x15   :  { %v145_v25 = vpack.c.bf16 %v133_v22, %v132_v21  ;;  %27 = vst [vmem:[%s887_s5] sm:$0x1] %v691_v27  ;;  %28 = vst [vmem:[%s888_s6] sm:$0x1] %v691_v27 }
  0x16   :  { %v149_v26 = vpack.c.bf16 %v141_v24, %v140_v23 }
  0x17   :  { %645 = vmatpush3.bf16.msra.mxu0 %v688_v28  ;;  %679 = vmatpush3.bf16.msra.mxu1 %v688_v28 }
  0x18   :  { %646 = vmatprep.subr.bf16.mxu0 %v689_v44  ;;  %672 = vmatprep.subr.bf16.mxu1 %v689_v44 }
  0x1b   :  { %647 = vmatpush3.bf16.msra.mxu0 %v689_v44  ;;  %680 = vmatpush3.bf16.msra.mxu1 %v689_v44 }
  0x1c   :  { %648 = vmatprep.subr.bf16.mxu0 %v690_v61  ;;  %673 = vmatprep.subr.bf16.mxu1 %v690_v61 }
  0x1f   :  { %649 = vmatpush3.bf16.msra.mxu0 %v690_v61  ;;  %681 = vmatpush3.bf16.msra.mxu1 %v690_v61 }
  0x22   :  { %651 = vmatmul.mubr.bf16.vlgmr.msra.gmra.mrb[0].mxu0 %v143_v16  ;;  %659 = vmatmul.mubr.bf16.vlgmr.msra.gmra.mrb[0].mxu1 %v147_v17 }
  0x23   :  { %654 = vmatprep.mubr.bf16.mxu0 %v144_v5  ;;  %662 = vmatprep.mubr.bf16.mxu1 %v148_v20 }
  0x2a   :  { %655 = vmatmul.mubr.bf16.gmra.mrb[4].mxu0 %v145_v25  ;;  %663 = vmatmul.mubr.bf16.gmra.mrb[4].mxu1 %v149_v26 }
  0xf5   :  { %v652_v10 = vpop.f32.mrb[0].mxu0  ;;  %v660_v28 = vpop.f32.mrb[0].mxu1 }
  0xf6   :  { %380 = vst [vmem:[%s889_s4 + $0x10] sm:$0xff] %v652_v10  ;;  %v264_v29 = vpop.f32.mrb[1].mxu0  ;;  %388 = vst [vmem:[%s889_s4 + $0x50] sm:$0xff] %v660_v28  ;;  %v296_v30 = vpop.f32.mrb[1].mxu1  ;;  %v520_v38 = vmul.f32 %v652_v10, %v652_v10  ;;  %v528_v7 = vmul.f32 %v660_v28, %v660_v28 }
  0xf7   :  { %378 = vst [vmem:[%s889_s4] sm:$0xff] %v264_v29  ;;  %v653_v31 = vpop.f32.mrb[2].mxu0  ;;  %386 = vst [vmem:[%s889_s4 + $0x40] sm:$0xff] %v296_v30  ;;  %v661_v32 = vpop.f32.mrb[2].mxu1  ;;  %v518_v35 = vmul.f32 %v264_v29, %v264_v29  ;;  %v526_v0 = vmul.f32 %v296_v30, %v296_v30 }
  0xf8   :  { %381 = vst [vmem:[%s889_s4 + $0x18] sm:$0xff] %v653_v31  ;;  %v267_v33 = vpop.f32.mrb[3].mxu0  ;;  %389 = vst [vmem:[%s889_s4 + $0x58] sm:$0xff] %v661_v32  ;;  %v299_v34 = vpop.f32.mrb[3].mxu1  ;;  %v521_v41 = vmul.f32 %v653_v31, %v653_v31  ;;  %v529_v11 = vmul.f32 %v661_v32, %v661_v32 }
  0xf9   :  { %379 = vst [vmem:[%s889_s4 + $0x8] sm:$0xff] %v267_v33  ;;  %v494_v36 = vadd.f32 %v267_v33, %v264_v29  ;;  %v519_v37 = vmul.f32 %v267_v33, %v267_v33  ;;  %387 = vst [vmem:[%s889_s4 + $0x48] sm:$0xff] %v299_v34  ;;  %v527_v6 = vmul.f32 %v299_v34, %v299_v34 }
  0xfb   :  { %v495_v39 = vadd.f32 %v652_v10, %v494_v36  ;;  %v534_v40 = vadd.f32 %v519_v37, %v518_v35  ;;  %v517_v37 = vld [vmem:[%s888_s6] sm:$0x1] }
  0xfd   :  { %v535_v42 = vadd.f32 %v534_v40, %v520_v38  ;;  %v656_v43 = vpop.f32.mrb[4].mxu0  ;;  %v496_v44 = vadd.f32 %v653_v31, %v495_v39  ;;  %v664_v45 = vpop.f32.mrb[4].mxu1 }
  0xfe   :  { %384 = vst [vmem:[%s889_s4 + $0x30] sm:$0xff] %v656_v43  ;;  %v280_v46 = vpop.f32.mrb[5].mxu0  ;;  %392 = vst [vmem:[%s889_s4 + $0x70] sm:$0xff] %v664_v45  ;;  %v312_v47 = vpop.f32.mrb[5].mxu1  ;;  %v524_v58 = vmul.f32 %v656_v43, %v656_v43  ;;  %v532_v5 = vmul.f32 %v664_v45, %v664_v45 }
  0xff   :  { %382 = vst [vmem:[%s889_s4 + $0x20] sm:$0xff] %v280_v46  ;;  %v497_v48 = vadd.f32 %v496_v44, %v280_v46  ;;  %v522_v49 = vmul.f32 %v280_v46, %v280_v46  ;;  %v536_v50 = vadd.f32 %v535_v42, %v521_v41  ;;  %v657_v51 = vpop.f32.mrb[6].mxu0  ;;  %390 = vst [vmem:[%s889_s4 + $0x60] sm:$0xff] %v312_v47  ;;  %v665_v52 = vpop.f32.mrb[6].mxu1 }
 0x100   :  { %385 = vst [vmem:[%s889_s4 + $0x38] sm:$0xff] %v657_v51  ;;  %v283_v53 = vpop.f32.mrb[7].mxu0  ;;  %393 = vst [vmem:[%s889_s4 + $0x78] sm:$0xff] %v665_v52  ;;  %v315_v54 = vpop.f32.mrb[7].mxu1  ;;  %v525_v61 = vmul.f32 %v657_v51, %v657_v51  ;;  %v530_v14 = vmul.f32 %v312_v47, %v312_v47  ;;  %v533_v22 = vmul.f32 %v665_v52, %v665_v52 }
 0x101   :  { %v537_v55 = vadd.f32 %v536_v50, %v522_v49  ;;  %383 = vst [vmem:[%s889_s4 + $0x28] sm:$0xff] %v283_v53  ;;  %v498_v56 = vadd.f32 %v497_v48, %v283_v53  ;;  %v523_v57 = vmul.f32 %v283_v53, %v283_v53  ;;  %391 = vst [vmem:[%s889_s4 + $0x68] sm:$0xff] %v315_v54 }
 0x102   :  { %v531_v19 = vmul.f32 %v315_v54, %v315_v54 }
 0x103   :  { %v499_v59 = vadd.f32 %v656_v43, %v498_v56  ;;  %v538_v60 = vadd.f32 %v537_v55, %v523_v57 }
 0x105   :  { %v539_v62 = vadd.f32 %v538_v60, %v524_v58  ;;  %v500_v63 = vadd.f32 %v657_v51, %v499_v59 }
 0x107   :  { %v501_v1 = vadd.f32 %v500_v63, %v296_v30  ;;  %v540_v2 = vadd.f32 %v539_v62, %v525_v61 }
 0x109   :  { %v541_v3 = vadd.f32 %v540_v2, %v526_v0  ;;  %v502_v4 = vadd.f32 %v501_v1, %v299_v34  ;;  %v493_v34 = vld [vmem:[%s887_s5] sm:$0x1] }
 0x10b   :  { %v503_v8 = vadd.f32 %v660_v28, %v502_v4  ;;  %v542_v9 = vadd.f32 %v541_v3, %v527_v6 }
 0x10d   :  { %v543_v12 = vadd.f32 %v542_v9, %v528_v7  ;;  %v504_v13 = vadd.f32 %v661_v32, %v503_v8 }
 0x10f   :  { %v505_v15 = vadd.f32 %v504_v13, %v312_v47  ;;  %v544_v16 = vadd.f32 %v543_v12, %v529_v11 }
 0x111   :  { %v545_v17 = vadd.f32 %v544_v16, %v530_v14  ;;  %v506_v18 = vadd.f32 %v505_v15, %v315_v54 }
 0x113   :  { %v507_v20 = vadd.f32 %v664_v45, %v506_v18  ;;  %v546_v21 = vadd.f32 %v545_v17, %v531_v19 }
 0x115   :  { %v508_v23 = vadd.f32 %v665_v52, %v507_v20  ;;  %v547_v24 = vadd.f32 %v546_v21, %v532_v5 }
 0x117   :  { %v509_v25 = vrot.slane %v508_v23, 4  ;;  %v548_v26 = vadd.f32 %v547_v24, %v533_v22 }
 0x119   :  { %v510_v27 = vadd.f32 %v509_v25, %v508_v23  ;;  %v549_v10 = vrot.slane %v548_v26, 4 }
 0x11b   :  { %v511_v28 = vrot.slane %v510_v27, 2  ;;  %v550_v29 = vadd.f32 %v549_v10, %v548_v26 }
 0x11d   :  { %v512_v30 = vadd.f32 %v511_v28, %v510_v27  ;;  %v551_v31 = vrot.slane %v550_v29, 2 }
 0x11f   :  { %v513_v32 = vrot.slane %v512_v30, 1  ;;  %v552_v33 = vadd.f32 %v551_v31, %v550_v29 }
 0x121   :  { %v514_v35 = vadd.f32 %v513_v32, %v512_v30  ;;  %v553_v36 = vrot.slane %v552_v33, 1 }
 0x123   :  { %v515_v38 = vadd.f32 %v514_v35, %v493_v34  ;;  %v554_v39 = vadd.f32 %v553_v36, %v552_v33 }
 0x125   :  { %516 = vst [vmem:[%s887_s5] sm:$0x1] %v515_v38  ;;  %v555_v40 = vadd.f32 %v554_v39, %v517_v37 }
 0x127   :  { %556 = vst [vmem:[%s888_s6] sm:$0x1] %v555_v40 }

// kernel: bottleneck_forward.11
= control target key start
LH: loop header
LB: loop body
LE: loop exit
PB: predicated region body
PF: predicated region fallthrough
CT: control target
= control target key end

     0   :  { %s473_s0 = inlined_call_operand.vmem [shape: f32[128,128], index: 0, kind: input, shape index: {}]   ;;  %s474_s1 = inlined_call_operand.vmem [shape: f32[1,128], index: 1, kind: input, shape index: {}]   ;;  %s475_s2 = inlined_call_operand.vmem [shape: f32[1,128], index: 2, kind: input, shape index: {}]   ;;  %s476_s3 = inlined_call_operand.vmem [shape: f32[128,128], index: 3, kind: input, shape index: {}]   ;;  %s477_s4 = inlined_call_operand.vmem [shape: f32[1,128], index: 4, kind: input, shape index: {}]   ;;  %s478_s5 = inlined_call_operand.vmem [shape: f32[1,128], index: 5, kind: input, shape index: {}]   ;;  %s479_s6 = inlined_call_operand.hbm [shape: f32[128,128], index: 6, kind: output, shape index: {}]  }
   0x1   :  { %v24_v0 = vld [vmem:[%s473_s0] sm:$0xff]  ;;  %v25_v8 = vld [vmem:[%s473_s0 + $0x8] sm:$0xff]  ;;  %v26_v10 = vld [vmem:[%s473_s0 + $0x10] sm:$0xff] }
   0x2   :  { %v287_v1 = vld [vmem:[%s474_s1] ss:$0 sm:$0xff]  ;;  %v87_v9 = vld [vmem:[%s476_s3 + $0x8] sm:$0xff]  ;;  %v88_v15 = vld [vmem:[%s476_s3 + $0x10] sm:$0xff] }
   0x3   :  { %v292_v2 = vld [vmem:[%s475_s2] ss:$0 sm:$0xff]  ;;  %v47_v3 = vmul.f32 %v287_v1, %v24_v0  ;;  %v48_v12 = vmul.f32 %v287_v1, %v25_v8  ;;  %v49_v14 = vmul.f32 %v287_v1, %v26_v10  ;;  %v27_v16 = vld [vmem:[%s473_s0 + $0x18] sm:$0xff]  ;;  %v29_v23 = vld [vmem:[%s473_s0 + $0x28] sm:$0xff] }
   0x4   :  { %v86_v4 = vld [vmem:[%s476_s3] sm:$0xff]  ;;  %v89_v17 = vld [vmem:[%s476_s3 + $0x18] sm:$0xff]  ;;  %v50_v19 = vmul.f32 %v287_v1, %v27_v16  ;;  %v91_v28 = vld [vmem:[%s476_s3 + $0x28] sm:$0xff]  ;;  %v52_v33 = vmul.f32 %v287_v1, %v29_v23 }
   0x5   :  { %v301_v5 = vld [vmem:[%s477_s4] ss:$0 sm:$0xff]  ;;  %v70_v11 = vadd.f32 %v292_v2, %v47_v3  ;;  %v71_v25 = vadd.f32 %v292_v2, %v48_v12  ;;  %v72_v26 = vadd.f32 %v292_v2, %v49_v14  ;;  %v30_v29 = vld [vmem:[%s473_s0 + $0x30] sm:$0xff]  ;;  %v31_v39 = vld [vmem:[%s473_s0 + $0x38] sm:$0xff] }
   0x6   :  { %v109_v6 = vmul.f32 %v301_v5, %v86_v4  ;;  %v307_v7 = vld [vmem:[%s478_s5] ss:$0 sm:$0xff]  ;;  %v110_v13 = vmul.f32 %v301_v5, %v87_v9  ;;  %v111_v18 = vmul.f32 %v301_v5, %v88_v15  ;;  %v112_v20 = vmul.f32 %v301_v5, %v89_v17  ;;  %v92_v30 = vld [vmem:[%s476_s3 + $0x30] sm:$0xff]  ;;  %v93_v44 = vld [vmem:[%s476_s3 + $0x38] sm:$0xff] }
   0x7   :  { %v28_v21 = vld [vmem:[%s473_s0 + $0x20] sm:$0xff]  ;;  %v73_v31 = vadd.f32 %v292_v2, %v50_v19  ;;  %v114_v34 = vmul.f32 %v301_v5, %v91_v28  ;;  %v75_v41 = vadd.f32 %v292_v2, %v52_v33  ;;  %v53_v42 = vmul.f32 %v287_v1, %v30_v29  ;;  %v33_v55 = vld [vmem:[%s473_s0 + $0x48] sm:$0xff]  ;;  %v34_v3 = vld [vmem:[%s473_s0 + $0x50] sm:$0xff] }
   0x8   :  { %v90_v22 = vld [vmem:[%s476_s3 + $0x20] sm:$0xff]  ;;  %v125_v24 = vadd.f32 %v109_v6, %v70_v11  ;;  %v51_v27 = vmul.f32 %v287_v1, %v28_v21  ;;  %v126_v36 = vadd.f32 %v110_v13, %v71_v25  ;;  %v127_v37 = vadd.f32 %v111_v18, %v72_v26  ;;  %v95_v60 = vld [vmem:[%s476_s3 + $0x48] sm:$0xff]  ;;  %v96_v4 = vld [vmem:[%s476_s3 + $0x50] sm:$0xff] }
   0x9   :  { %v113_v32 = vmul.f32 %v301_v5, %v90_v22  ;;  %v128_v40 = vadd.f32 %v112_v20, %v73_v31  ;;  %v115_v43 = vmul.f32 %v301_v5, %v92_v30  ;;  %v130_v50 = vadd.f32 %v114_v34, %v75_v41  ;;  %v32_v53 = vld [vmem:[%s473_s0 + $0x40] sm:$0xff] }
   0xa   :  { %v148_v35 = vadd.f32 %v307_v7, %v125_v24  ;;  %v74_v38 = vadd.f32 %v292_v2, %v51_v27  ;;  %v149_v46 = vadd.f32 %v307_v7, %v126_v36  ;;  %v150_v47 = vadd.f32 %v307_v7, %v127_v37  ;;  %v94_v54 = vld [vmem:[%s476_s3 + $0x40] sm:$0xff] }
   0xb   :  { %v151_v49 = vadd.f32 %v307_v7, %v128_v40  ;;  %v76_v51 = vadd.f32 %v292_v2, %v53_v42  ;;  %v54_v52 = vmul.f32 %v287_v1, %v31_v39  ;;  %v116_v59 = vmul.f32 %v301_v5, %v93_v44 }
   0xc   :  { %v164_v45 = vmax.f32 %v148_v35, 0.0  ;;  %v129_v48 = vadd.f32 %v113_v32, %v74_v38  ;;  %v165_v56 = vmax.f32 %v149_v46, 0.0  ;;  %v166_v57 = vmax.f32 %v150_v47, 0.0 }
   0xd   :  { %v167_v61 = vmax.f32 %v151_v49, 0.0  ;;  %v153_v62 = vadd.f32 %v307_v7, %v130_v50  ;;  %v131_v63 = vadd.f32 %v115_v43, %v76_v51  ;;  %v77_v0 = vadd.f32 %v292_v2, %v54_v52 }
   0xe   :  { %180 = vst [vmem:[#allocation2] sm:$0xff] %v164_v45  ;;  %v152_v58 = vadd.f32 %v307_v7, %v129_v48 }
   0xf   :  { %11 = vsyncpa [#allocation3], 0  ;;  %181 = vst [vmem:[#allocation2 + $0x8] sm:$0xff] %v165_v56  ;;  %v55_v8 = vmul.f32 %v287_v1, %v32_v53  ;;  %v117_v9 = vmul.f32 %v301_v5, %v94_v54  ;;  %v56_v10 = vmul.f32 %v287_v1, %v33_v55  ;;  %v35_v11 = vld [vmem:[%s473_s0 + $0x58] sm:$0xff]  ;;  %v169_v13 = vmax.f32 %v153_v62, 0.0  ;;  %v36_v17 = vld [vmem:[%s473_s0 + $0x60] sm:$0xff] }
  0x10   :  { %182 = vst [vmem:[#allocation2 + $0x10] sm:$0xff] %v166_v57  ;;  %v168_v6 = vmax.f32 %v152_v58, 0.0  ;;  %v97_v12 = vld [vmem:[%s476_s3 + $0x58] sm:$0xff]  ;;  %183 = vst [vmem:[#allocation2 + $0x18] sm:$0xff] %v167_v61  ;;  %v154_v14 = vadd.f32 %v307_v7, %v131_v63  ;;  %v132_v15 = vadd.f32 %v116_v59, %v77_v0  ;;  %v118_v16 = vmul.f32 %v301_v5, %v95_v60  ;;  %v98_v22 = vld [vmem:[%s476_s3 + $0x60] sm:$0xff] }
  0x11   :  { %v78_v18 = vadd.f32 %v292_v2, %v55_v8  ;;  %v79_v19 = vadd.f32 %v292_v2, %v56_v10  ;;  %v57_v20 = vmul.f32 %v287_v1, %v34_v3  ;;  %v119_v21 = vmul.f32 %v301_v5, %v96_v4  ;;  %v37_v23 = vld [vmem:[%s473_s0 + $0x68] sm:$0xff]  ;;  %185 = vst [vmem:[#allocation2 + $0x28] sm:$0xff] %v169_v13  ;;  %v38_v33 = vld [vmem:[%s473_s0 + $0x70] sm:$0xff]  ;;  %v39_v47 = vld [vmem:[%s473_s0 + $0x78] sm:$0xff]  ;;  %s243_s0 = smov [#allocation2]  }
  0x12   :  { %184 = vst [vmem:[#allocation2 + $0x20] sm:$0xff] %v168_v6  ;;  %v170_v24 = vmax.f32 %v154_v14, 0.0  ;;  %v155_v25 = vadd.f32 %v307_v7, %v132_v15  ;;  %v58_v26 = vmul.f32 %v287_v1, %v35_v11  ;;  %v120_v27 = vmul.f32 %v301_v5, %v97_v12  ;;  %v99_v32 = vld [vmem:[%s476_s3 + $0x68] sm:$0xff]  ;;  %v100_v42 = vld [vmem:[%s476_s3 + $0x70] sm:$0xff]  ;;  %v101_v48 = vld [vmem:[%s476_s3 + $0x78] sm:$0xff]  ;;  %s201_s3 = sshll.u32 %s243_s0, 4  ;;  %s202_s3 = int_to_ptr.vmem [resolvable:$true] %s201_s3 }
  0x13   :  { %v133_v28 = vadd.f32 %v117_v9, %v78_v18  ;;  %v134_v29 = vadd.f32 %v118_v16, %v79_v19  ;;  %v80_v30 = vadd.f32 %v292_v2, %v57_v20  ;;  %v59_v31 = vmul.f32 %v287_v1, %v36_v17  ;;  %s219_s11 = scalar_lea.vmem %s202_s3, 2048  ;;  %p224_p1 = scmp.lt.s32.totalorder %s202_s3, %s202_s3 }
  0x14   :  { %186 = vst [vmem:[#allocation2 + $0x30] sm:$0xff] %v170_v24  ;;  %v171_v34 = vmax.f32 %v155_v25, 0.0  ;;  %v81_v35 = vadd.f32 %v292_v2, %v58_v26  ;;  %v121_v36 = vmul.f32 %v301_v5, %v98_v22  ;;  %v60_v37 = vmul.f32 %v287_v1, %v37_v23  ;;  %p220_p0 = scmp.ne.s32.totalorder %s202_s3, %s219_s11  ;;  %p225_p2 = scmp.lt.s32.totalorder %s219_s11, %s219_s11 }
  0x15   :  { %v156_v38 = vadd.f32 %v307_v7, %v133_v28  ;;  %v157_v39 = vadd.f32 %v307_v7, %v134_v29  ;;  %v135_v40 = vadd.f32 %v119_v21, %v80_v30  ;;  %v82_v41 = vadd.f32 %v292_v2, %v59_v31 }
  0x16   :  { %187 = vst [vmem:[#allocation2 + $0x38] sm:$0xff] %v171_v34  ;;  %v136_v43 = vadd.f32 %v120_v27, %v81_v35  ;;  %v83_v44 = vadd.f32 %v292_v2, %v60_v37  ;;  %v122_v45 = vmul.f32 %v301_v5, %v99_v32  ;;  %v61_v46 = vmul.f32 %v287_v1, %v38_v33  ;;  %p226_p3 = por %p225_p2, %p224_p1 }
  0x17   :  { %v172_v49 = vmax.f32 %v156_v38, 0.0  ;;  %v173_v50 = vmax.f32 %v157_v39, 0.0  ;;  %v158_v51 = vadd.f32 %v307_v7, %v135_v40  ;;  %v137_v52 = vadd.f32 %v121_v36, %v82_v41 }
  0x18   :  { %v159_v53 = vadd.f32 %v307_v7, %v136_v43  ;;  %v138_v54 = vadd.f32 %v122_v45, %v83_v44  ;;  %v84_v55 = vadd.f32 %v292_v2, %v61_v46  ;;  %v123_v56 = vmul.f32 %v301_v5, %v100_v42  ;;  %p227_p4 = pnand %p226_p3, %p220_p0 }
  0x19   :  { %188 = vst [vmem:[#allocation2 + $0x40] sm:$0xff] %v172_v49  ;;  %189 = vst [vmem:[#allocation2 + $0x48] sm:$0xff] %v173_v50  ;;  %v174_v57 = vmax.f32 %v158_v51, 0.0  ;;  %v160_v58 = vadd.f32 %v307_v7, %v137_v52  ;;  %v62_v59 = vmul.f32 %v287_v1, %v39_v47  ;;  %v124_v60 = vmul.f32 %v301_v5, %v101_v48 }
  0x1a   :  { %v175_v61 = vmax.f32 %v159_v53, 0.0  ;;  %v161_v62 = vadd.f32 %v307_v7, %v138_v54  ;;  %v139_v63 = vadd.f32 %v123_v56, %v84_v55 }
  0x1b   :  { %190 = vst [vmem:[#allocation2 + $0x50] sm:$0xff] %v174_v57  ;;  %v176_v0 = vmax.f32 %v160_v58, 0.0  ;;  %v85_v3 = vadd.f32 %v292_v2, %v62_v59 }
  0x1c   :  { %191 = vst [vmem:[#allocation2 + $0x58] sm:$0xff] %v175_v61  ;;  %v177_v4 = vmax.f32 %v161_v62, 0.0  ;;  %v162_v6 = vadd.f32 %v307_v7, %v139_v63 }
  0x1d   :  { %192 = vst [vmem:[#allocation2 + $0x60] sm:$0xff] %v176_v0  ;;  %v140_v8 = vadd.f32 %v124_v60, %v85_v3 }
  0x1e   :  { %193 = vst [vmem:[#allocation2 + $0x68] sm:$0xff] %v177_v4  ;;  %v178_v1 = vmax.f32 %v162_v6, 0.0 }
  0x1f   :  { %v163_v5 = vadd.f32 %v307_v7, %v140_v8 }
  0x20   :  { %194 = vst [vmem:[#allocation2 + $0x70] sm:$0xff] %v178_v1 }
  0x21   :  { %v179_v9 = vmax.f32 %v163_v5, 0.0 }
  0x23   :  { %195 = vst [vmem:[#allocation2 + $0x78] sm:$0xff] %v179_v9 }
  0x24   :  { %230 = shalt.err (!%p227_p4)
}
  0x25   :  { %s231_s5 = scalar_lea.hbm %s479_s6, 2048 }
  0x26   :  { %p232_p5 = scmp.ne.s32.totalorder %s479_s6, %s231_s5  ;;  %p235_p6 = scmp.lt.u32.totalorder %s231_s5, %s479_s6 }
  0x28   :  { %p237_p7 = pnand %p235_p6, %p232_p5 }
  0x2a   :  { %240 = shalt.err (!%p237_p7)
}
  0x2b   :  { %s244_s17 = smov 128   ;;  %s245_s18 = smov 8  }
  0x2c   :  { %207 = dma.vmem_to_hbm [thread:$0]  %s202_s3, 2048, %s479_s6, [#allocation3], %s244_s17, %s244_s17, %s245_s18  }
  0x2d   :  { %241 = dma.done.wait [#allocation3], 2048  }
  0x2e   :  { %242 = vsyncadd [#allocation3], 4294965248 }
  0x2f   :  { %211 = vsyncpa [#allocation3], 1 }

</bundles_post_ra>
